<compile_context>
chip_gen: v6e
topology: v6e:2x2x1
jax: 0.10.0
libtpu: 0.0.40
codegen_flags: <defaults>
</compile_context>

<pallas_src>
import math

import jax
import jax.numpy as jnp
import numpy as np
from jax.experimental import pallas as pl
from jax.experimental.pallas import tpu as pltpu

# ---------------------------------------------------------------------------
# Geometry fixed by the PyTorch module (LeNet-5 on 3x32x32 inputs).
# ---------------------------------------------------------------------------
IMG, C_IN, KS = 32, 3, 5
C1, C2 = 6, 16
OH1, PH1 = IMG - KS + 1, (IMG - KS + 1) // 2          # 28, 14
OH2, PH2 = PH1 - KS + 1, (PH1 - KS + 1) // 2          # 10, 5
L1_OUT = OH1 * C1                                     # 168  lanes: (ow1, c1)
L1_KEEP = (OH1 - 1) * C1                              # 162  lanes after W sliding-max
L2_OUT = OH2 * C2                                     # 160  lanes: (ow2, c2)
L2_KEEP = (OH2 - 1) * C2                              # 144
N_FC1, N_FC2, N_CLS = 120, 84, 10

# Single-matmul contraction (K) sizes.
R_T1 = C_IN * KS * IMG                                # 480  conv1 slab lanes
R_T2 = KS * L1_KEEP                                   # 810  conv2 slab lanes
R_F1 = PH2 * L2_KEEP                                  # 720  fc1 slab lanes
R_F2 = N_FC1                                          # 120
R_F3 = N_FC2                                          # 84


def _r16(n):                                          # 16-row (bf16 tile) alignment
    return -(-n // 16) * 16


# Row offsets of each weight block inside the single packed weight buffer.
O_T1 = 0
O_T2 = O_T1 + _r16(R_T1)                              # 480
O_F1 = O_T2 + _r16(R_T2)                              # 1296
O_F2 = O_F1 + _r16(R_F1)                              # 2016
O_F3 = O_F2 + _r16(R_F2)                              # 2144
WPACK_ROWS = O_F3 + _r16(R_F3)                        # 2240
WPACK_LANES = L1_OUT                                  # 168 (widest output)
BPACK_ROWS = 8                                        # 5 bias rows, padded to 8


# ---------------------------------------------------------------------------
# The fused Pallas kernel
# ---------------------------------------------------------------------------
def lenet5_kernel(x_ref, w_ref, b_ref, o_ref, slab1_ref, slab2_ref, zslab_ref):
    """Whole LeNet5_MOD_LIGHT forward on VMEM-resident data.

    x_ref     : (TB, 96, 32) f32   raw NCHW input reshaped to rows=(cin,h), lanes=w
    w_ref     : (2240, 168)  bf16  all weights, row blocks at O_T1/O_T2/O_F1/O_F2/O_F3
    b_ref     : (8, 168)     f32   row 0..4 = conv1/conv2/fc1/fc2/fc3 biases
    o_ref     : (TB, 10)     f32   logits
    slab*_ref : VMEM scratch used to pack shifted views into one matmul operand
    """
    tb = x_ref.shape[0]
    cdt = w_ref.dtype                                 # bf16 prod / f32 validation

    # ---- conv1 + bias + ReLU : one (TB*28, 480) x (480, 168) matmul ---------
    x = x_ref[...].astype(cdt)                        # cast ONCE  (TB, 96, 32)
    for c in range(C_IN):
        for kh in range(KS):
            lo = (c * KS + kh) * IMG
            slab1_ref[:, :, lo:lo + IMG] = x[:, c * IMG + kh: c * IMG + kh + OH1, :]
    slab1 = slab1_ref[...].reshape(tb * OH1, R_T1)    # (TB*28, 480)
    y = jnp.dot(slab1, w_ref[O_T1:O_T1 + R_T1, :L1_OUT],
                preferred_element_type=jnp.float32)
    y = jnp.maximum(y + b_ref[0:1, :L1_OUT], 0.0)     # (TB*28, 168)

    # ---- 2x2 max-pool #1 -----------------------------------------------------
    y = y.reshape(tb * PH1, 2, L1_OUT)
    y = jnp.maximum(y[:, 0, :], y[:, 1, :])           # H direction (even/odd oh)
    y = jnp.maximum(y[:, :L1_KEEP], y[:, C1:])        # W sliding max
    # Valid pooled values at lanes (2*pw1)*C1 + c; odd-ow1 lanes hold finite
    # garbage masked by the zero rows of the conv2 banded weights below.
    y3 = y.astype(cdt).reshape(tb, PH1, L1_KEEP)      # cast ONCE  (TB, 14, 162)

    # ---- conv2 + bias + ReLU : one (TB*10, 810) x (810, 160) matmul ----------
    for kh in range(KS):
        slab2_ref[:, :, kh * L1_KEEP:(kh + 1) * L1_KEEP] = y3[:, kh:kh + OH2, :]
    slab2 = slab2_ref[...].reshape(tb * OH2, R_T2)    # (TB*10, 810)
    z = jnp.dot(slab2, w_ref[O_T2:O_T2 + R_T2, :L2_OUT],
                preferred_element_type=jnp.float32)
    z = jnp.maximum(z + b_ref[1:2, :L2_OUT], 0.0)     # (TB*10, 160)

    # ---- 2x2 max-pool #2 -----------------------------------------------------
    z = z.reshape(tb * PH2, 2, L2_OUT)
    z = jnp.maximum(z[:, 0, :], z[:, 1, :])
    z = jnp.maximum(z[:, :L2_KEEP], z[:, C2:])        # (TB*5, 144)
    z3 = z.astype(cdt).reshape(tb, PH2, L2_KEEP)      # cast ONCE  (TB, 5, 144)

    # ---- fc1 : single (TB, 720) x (720, 120) matmul --------------------------
    # (PyTorch NCHW flatten is folded into the packed fc1 weights on the host.)
    for ph in range(PH2):
        zslab_ref[:, ph * L2_KEEP:(ph + 1) * L2_KEEP] = z3[:, ph, :]
    h = jnp.dot(zslab_ref[...], w_ref[O_F1:O_F1 + R_F1, :N_FC1],
                preferred_element_type=jnp.float32)
    h = jnp.maximum(h + b_ref[2:3, :N_FC1], 0.0)

    # ---- fc2 -> relu -> fc3 ---------------------------------------------------
    h = jnp.dot(h.astype(cdt), w_ref[O_F2:O_F2 + R_F2, :N_FC2],
                preferred_element_type=jnp.float32)
    h = jnp.maximum(h + b_ref[3:4, :N_FC2], 0.0)
    o_ref[...] = jnp.dot(h.astype(cdt), w_ref[O_F3:O_F3 + R_F3, :N_CLS],
                         preferred_element_type=jnp.float32) + b_ref[4:5, :N_CLS]


# ---------------------------------------------------------------------------
# pallas_call wrapper: 3 DMA'd inputs, batch grid, constant weight blocks
# ---------------------------------------------------------------------------
def lenet5_pallas(x_rows, wpack, bpack):
    batch = x_rows.shape[0]
    if batch > 8 and batch % 16 == 0:
        tb = 16
    elif batch > 8 and batch % 8 == 0:
        tb = 8
    else:
        tb = batch
    nb = batch // tb
    cdt = wpack.dtype

    flops = 2 * batch * (OH1 * R_T1 * L1_OUT + OH2 * R_T2 * L2_OUT
                         + R_F1 * N_FC1 + N_FC1 * N_FC2 + N_FC2 * N_CLS)
    bytes_accessed = int(x_rows.size * x_rows.dtype.itemsize
                         + wpack.size * wpack.dtype.itemsize
                         + bpack.size * 4 + batch * N_CLS * 4)

    return pl.pallas_call(
        lenet5_kernel,
        out_shape=jax.ShapeDtypeStruct((batch, N_CLS), jnp.float32),
        grid=(nb,),
        in_specs=[
            pl.BlockSpec((tb, C_IN * IMG, IMG), lambda b: (b, 0, 0)),
            # Constant block index -> weights/biases stay VMEM-resident.
            pl.BlockSpec((WPACK_ROWS, WPACK_LANES), lambda b: (0, 0)),
            pl.BlockSpec((BPACK_ROWS, WPACK_LANES), lambda b: (0, 0)),
        ],
        out_specs=pl.BlockSpec((tb, N_CLS), lambda b: (b, 0)),
        scratch_shapes=[
            pltpu.VMEM((tb, OH1, R_T1), cdt),         # conv1 slab
            pltpu.VMEM((tb, OH2, R_T2), cdt),         # conv2 slab
            pltpu.VMEM((tb, R_F1), cdt),              # fc1 slab
        ],
        compiler_params=pltpu.CompilerParams(
            dimension_semantics=("parallel",),        # both TCs on v7x when nb>1
            # Actual footprint is ~3 MiB; well within v7x's 64 MiB physical VMEM.
            vmem_limit_bytes=32 * 1024 * 1024),
        cost_estimate=pl.CostEstimate(flops=flops, transcendentals=0,
                                      bytes_accessed=bytes_accessed),
    )(x_rows, wpack, bpack)


@jax.jit
def lenet5_mod_light_forward(x_nchw, prepared):
    batch = x_nchw.shape[0]
    # NCHW -> (B, C*H, W) is a pure (free) reshape: no transpose, no cast, no
    # extra kernel before the pallas_call.  The bf16 cast happens in-kernel.
    x_rows = x_nchw.reshape(batch, C_IN * IMG, IMG)
    return lenet5_pallas(x_rows, prepared["wpack"], prepared["bpack"])


# ---------------------------------------------------------------------------
# Parameters: PyTorch-layout init + host-side repack into kernel layout
# ---------------------------------------------------------------------------
def init_params(key):
    """Parameters in PyTorch layout (what conv.weight / fc.weight would give)."""
    def u(k, shape, fan_in):
        bound = 1.0 / math.sqrt(fan_in)
        return jax.random.uniform(k, shape, jnp.float32, -bound, bound)

    ks = jax.random.split(key, 10)
    return {
        "conv1.weight": u(ks[0], (C1, C_IN, KS, KS), C_IN * KS * KS),
        "conv1.bias":   u(ks[1], (C1,), C_IN * KS * KS),
        "conv2.weight": u(ks[2], (C2, C1, KS, KS), C1 * KS * KS),
        "conv2.bias":   u(ks[3], (C2,), C1 * KS * KS),
        "fc1.weight":   u(ks[4], (N_FC1, C2 * PH2 * PH2), C2 * PH2 * PH2),
        "fc1.bias":     u(ks[5], (N_FC1,), C2 * PH2 * PH2),
        "fc2.weight":   u(ks[6], (N_FC2, N_FC1), N_FC1),
        "fc2.bias":     u(ks[7], (N_FC2,), N_FC1),
        "fc3.weight":   u(ks[8], (N_CLS, N_FC2), N_FC2),
        "fc3.bias":     u(ks[9], (N_CLS,), N_FC2),
    }


def _conv1_cat_weights(w1):
    """(6,3,5,5) -> (480,168): slab lane (c*5+kh)*32 + (ow+kw) maps to output
    lane ow*6+o.  Input slab lane layout matches the raw NCHW rows (cin,h)."""
    t = np.zeros((R_T1, L1_OUT), np.float32)
    for c in range(C_IN):
        for kh in range(KS):
            for kw in range(KS):
                for ow in range(OH1):
                    t[(c * KS + kh) * IMG + ow + kw, ow * C1:(ow + 1) * C1] = \
                        w1[:, c, kh, kw]
    return t


def _conv2_cat_weights(w2):
    """(16,6,5,5) -> (810,160): slab lane kh*162 + (ow2+kw)*12 + c maps to output
    lane ow2*16+o.  Only even-ow1 lanes of the pooled conv1 output are read."""
    t = np.zeros((R_T2, L2_OUT), np.float32)
    for kh in range(KS):
        for kw in range(KS):
            for c in range(C1):
                for ow in range(OH2):
                    t[kh * L1_KEEP + (ow + kw) * (2 * C1) + c,
                      ow * C2:(ow + 1) * C2] = w2[:, c, kh, kw]
    return t


def _fc1_cat_weights(wfc1):
    """(120,400) fc1 weight (inputs in PyTorch NCHW-flatten order c*25+h*5+w)
    -> (720,120) matching the kernel's fc1 slab lane = ph*144 + 2*pw*16 + c."""
    t = np.zeros((R_F1, N_FC1), np.float32)
    for ph in range(PH2):
        for pw in range(PH2):
            for c in range(C2):
                t[ph * L2_KEEP + 2 * pw * C2 + c, :] = \
                    wfc1[:, c * PH2 * PH2 + ph * PH2 + pw]
    return t


def prepare_params(params, dtype=jnp.bfloat16):
    """Host-side (numpy) repack of PyTorch-layout params into the ONE packed
    weight buffer + ONE packed bias buffer the kernel consumes."""
    p = {k: np.asarray(v, np.float32) for k, v in params.items()}

    wpack = np.zeros((WPACK_ROWS, WPACK_LANES), np.float32)
    wpack[O_T1:O_T1 + R_T1, :L1_OUT] = _conv1_cat_weights(p["conv1.weight"])
    wpack[O_T2:O_T2 + R_T2, :L2_OUT] = _conv2_cat_weights(p["conv2.weight"])
    wpack[O_F1:O_F1 + R_F1, :N_FC1] = _fc1_cat_weights(p["fc1.weight"])
    wpack[O_F2:O_F2 + R_F2, :N_FC2] = p["fc2.weight"].T
    wpack[O_F3:O_F3 + R_F3, :N_CLS] = p["fc3.weight"].T

    bpack = np.zeros((BPACK_ROWS, WPACK_LANES), np.float32)
    bpack[0, :L1_OUT] = np.tile(p["conv1.bias"], OH1)
    bpack[1, :L2_OUT] = np.tile(p["conv2.bias"], OH2)
    bpack[2, :N_FC1] = p["fc1.bias"]
    bpack[3, :N_FC2] = p["fc2.bias"]
    bpack[4, :N_CLS] = p["fc3.bias"]

    return {"wpack": jnp.asarray(wpack, dtype),
            "bpack": jnp.asarray(bpack, jnp.float32)}


# ---------------------------------------------------------------------------
# Plain-JAX reference (matches the PyTorch module, f32) for sanity checks
# ---------------------------------------------------------------------------
def reference_forward(x_nchw, params):
    def conv2d(x_nhwc, w_oihw, b):
        co, ci, kh, kw = w_oihw.shape
        oh = x_nhwc.shape[1] - kh + 1
        ow = x_nhwc.shape[2] - kw + 1
        y = jnp.zeros(x_nhwc.shape[:1] + (oh, ow, co), jnp.float32)
        for i in range(kh):
            for j in range(kw):
                y = y + jnp.einsum("bhwc,oc->bhwo",
                                   x_nhwc[:, i:i + oh, j:j + ow, :],
                                   w_oihw[:, :, i, j])
        return y + b

    def maxpool2(x):
        return jnp.maximum(
            jnp.maximum(x[:, 0::2, 0::2, :], x[:, 0::2, 1::2, :]),
            jnp.maximum(x[:, 1::2, 0::2, :], x[:, 1::2, 1::2, :]))

    x = jnp.transpose(x_nchw, (0, 2, 3, 1))
    x = maxpool2(jax.nn.relu(conv2d(x, params["conv1.weight"], params["conv1.bias"])))
    x = maxpool2(jax.nn.relu(conv2d(x, params["conv2.weight"], params["conv2.bias"])))
    x = jnp.transpose(x, (0, 3, 1, 2)).reshape(x.shape[0], -1)   # NCHW flatten
    x = jax.nn.relu(x @ params["fc1.weight"].T + params["fc1.bias"])
    x = jax.nn.relu(x @ params["fc2.weight"].T + params["fc2.bias"])
    return x @ params["fc3.weight"].T + params["fc3.bias"]


if __name__ == "__main__":
    key = jax.random.PRNGKey(0)
    k_x, k_p = jax.random.split(key)
    # LeNet5 geometry requires 3x32x32 input (fc1 expects 16*5*5 features).
    x = jax.random.normal(k_x, (2, 3, 32, 32), jnp.float32)
    params = init_params(k_p)
    ref = reference_forward(x, params)

    # 1) Validate the host-side banding/permutation with f32 weights in-kernel
    #    (tighter tolerance; catches any repacking mistake).
    prep_f32 = prepare_params(params, dtype=jnp.float32)
    out_f32 = jax.block_until_ready(lenet5_mod_light_forward(x, prep_f32))
    assert out_f32.shape == (2, N_CLS) and out_f32.dtype == jnp.float32
    assert jnp.allclose(out_f32, ref, rtol=5e-2, atol=5e-2), \
        float(jnp.max(jnp.abs(out_f32 - ref)))

    # 2) Production bf16-weight path.
    prepared = prepare_params(params, dtype=jnp.bfloat16)
    out = jax.block_until_ready(lenet5_mod_light_forward(x, prepared))
    assert out.shape == (2, N_CLS) and out.dtype == jnp.float32
    assert jnp.allclose(out, ref, rtol=0.2, atol=0.08), \
        float(jnp.max(jnp.abs(out - ref)))

    print("KERNEL_OK")
</pallas_src>

<mosaic_0001>
module attributes {stable_mosaic.version = 11 : i64} {
  func.func @lenet5_kernel(%arg0: i32, %arg1: memref<2x96x32xf32, #tpu.memory_space<vmem>>, %arg2: memref<2240x168xf32, #tpu.memory_space<vmem>>, %arg3: memref<8x168xf32, #tpu.memory_space<vmem>>, %arg4: memref<2x10xf32, #tpu.memory_space<vmem>>, %arg5: memref<2x28x480xf32, #tpu.memory_space<vmem>>, %arg6: memref<2x10x810xf32, #tpu.memory_space<vmem>>, %arg7: memref<2x720xf32, #tpu.memory_space<vmem>>) attributes {dimension_semantics = [#tpu.dimension_semantics<parallel>], iteration_bounds = array<i64: 1>, scalar_prefetch = 0 : i64, scratch_operands = 3 : i64, tpu.core_type = #tpu.core_type<tc>, window_params = [{transform_indices = @transform_0, window_bounds = array<i64: 2, 96, 32>}, {pipeline_mode = #tpu.pipeline_mode<synchronous>, transform_indices = @transform_1, window_bounds = array<i64: 2240, 168>}, {pipeline_mode = #tpu.pipeline_mode<synchronous>, transform_indices = @transform_2, window_bounds = array<i64: 8, 168>}, {transform_indices = @transform_3, window_bounds = array<i64: 2, 10>}]} {
    %c0 = arith.constant 0 : index
    %c0_0 = arith.constant 0 : index
    %c0_1 = arith.constant 0 : index
    %0 = vector.load %arg1[%c0, %c0_0, %c0_1] : memref<2x96x32xf32, #tpu.memory_space<vmem>>, vector<2x96x32xf32>
    %1 = vector.extract_strided_slice %0 {offsets = [0, 0, 0], sizes = [2, 28, 32], strides = [1, 1, 1]} : vector<2x96x32xf32> to vector<2x28x32xf32>
    %c0_2 = arith.constant 0 : index
    %c0_3 = arith.constant 0 : index
    %c0_4 = arith.constant 0 : index
    %2 = vector.load %arg5[%c0_2, %c0_3, %c0_4] : memref<2x28x480xf32, #tpu.memory_space<vmem>>, vector<2x28x32xf32>
    tpu.vector_store %arg5[%c0_2, %c0_3, %c0_4], %1 {strides = array<i32>} : memref<2x28x480xf32, #tpu.memory_space<vmem>>, vector<2x28x32xf32>,
    %3 = vector.extract_strided_slice %0 {offsets = [0, 1, 0], sizes = [2, 28, 32], strides = [1, 1, 1]} : vector<2x96x32xf32> to vector<2x28x32xf32>
    %c0_5 = arith.constant 0 : index
    %c0_6 = arith.constant 0 : index
    %c32 = arith.constant 32 : index
    %4 = vector.load %arg5[%c0_5, %c0_6, %c32] : memref<2x28x480xf32, #tpu.memory_space<vmem>>, vector<2x28x32xf32>
    tpu.vector_store %arg5[%c0_5, %c0_6, %c32], %3 {strides = array<i32>} : memref<2x28x480xf32, #tpu.memory_space<vmem>>, vector<2x28x32xf32>,
    %5 = vector.extract_strided_slice %0 {offsets = [0, 2, 0], sizes = [2, 28, 32], strides = [1, 1, 1]} : vector<2x96x32xf32> to vector<2x28x32xf32>
    %c0_7 = arith.constant 0 : index
    %c0_8 = arith.constant 0 : index
    %c64 = arith.constant 64 : index
    %6 = vector.load %arg5[%c0_7, %c0_8, %c64] : memref<2x28x480xf32, #tpu.memory_space<vmem>>, vector<2x28x32xf32>
    tpu.vector_store %arg5[%c0_7, %c0_8, %c64], %5 {strides = array<i32>} : memref<2x28x480xf32, #tpu.memory_space<vmem>>, vector<2x28x32xf32>,
    %7 = vector.extract_strided_slice %0 {offsets = [0, 3, 0], sizes = [2, 28, 32], strides = [1, 1, 1]} : vector<2x96x32xf32> to vector<2x28x32xf32>
    %c0_9 = arith.constant 0 : index
    %c0_10 = arith.constant 0 : index
    %c96 = arith.constant 96 : index
    %8 = vector.load %arg5[%c0_9, %c0_10, %c96] : memref<2x28x480xf32, #tpu.memory_space<vmem>>, vector<2x28x32xf32>
    tpu.vector_store %arg5[%c0_9, %c0_10, %c96], %7 {strides = array<i32>} : memref<2x28x480xf32, #tpu.memory_space<vmem>>, vector<2x28x32xf32>,
    %9 = vector.extract_strided_slice %0 {offsets = [0, 4, 0], sizes = [2, 28, 32], strides = [1, 1, 1]} : vector<2x96x32xf32> to vector<2x28x32xf32>
    %c0_11 = arith.constant 0 : index
    %c0_12 = arith.constant 0 : index
    %c128 = arith.constant 128 : index
    %10 = vector.load %arg5[%c0_11, %c0_12, %c128] : memref<2x28x480xf32, #tpu.memory_space<vmem>>, vector<2x28x32xf32>
    tpu.vector_store %arg5[%c0_11, %c0_12, %c128], %9 {strides = array<i32>} : memref<2x28x480xf32, #tpu.memory_space<vmem>>, vector<2x28x32xf32>,
    %11 = vector.extract_strided_slice %0 {offsets = [0, 32, 0], sizes = [2, 28, 32], strides = [1, 1, 1]} : vector<2x96x32xf32> to vector<2x28x32xf32>
    %c0_13 = arith.constant 0 : index
    %c0_14 = arith.constant 0 : index
    %c160 = arith.constant 160 : index
    %12 = vector.load %arg5[%c0_13, %c0_14, %c160] : memref<2x28x480xf32, #tpu.memory_space<vmem>>, vector<2x28x32xf32>
    tpu.vector_store %arg5[%c0_13, %c0_14, %c160], %11 {strides = array<i32>} : memref<2x28x480xf32, #tpu.memory_space<vmem>>, vector<2x28x32xf32>,
    %13 = vector.extract_strided_slice %0 {offsets = [0, 33, 0], sizes = [2, 28, 32], strides = [1, 1, 1]} : vector<2x96x32xf32> to vector<2x28x32xf32>
    %c0_15 = arith.constant 0 : index
    %c0_16 = arith.constant 0 : index
    %c192 = arith.constant 192 : index
    %14 = vector.load %arg5[%c0_15, %c0_16, %c192] : memref<2x28x480xf32, #tpu.memory_space<vmem>>, vector<2x28x32xf32>
    tpu.vector_store %arg5[%c0_15, %c0_16, %c192], %13 {strides = array<i32>} : memref<2x28x480xf32, #tpu.memory_space<vmem>>, vector<2x28x32xf32>,
    %15 = vector.extract_strided_slice %0 {offsets = [0, 34, 0], sizes = [2, 28, 32], strides = [1, 1, 1]} : vector<2x96x32xf32> to vector<2x28x32xf32>
    %c0_17 = arith.constant 0 : index
    %c0_18 = arith.constant 0 : index
    %c224 = arith.constant 224 : index
    %16 = vector.load %arg5[%c0_17, %c0_18, %c224] : memref<2x28x480xf32, #tpu.memory_space<vmem>>, vector<2x28x32xf32>
    tpu.vector_store %arg5[%c0_17, %c0_18, %c224], %15 {strides = array<i32>} : memref<2x28x480xf32, #tpu.memory_space<vmem>>, vector<2x28x32xf32>,
    %17 = vector.extract_strided_slice %0 {offsets = [0, 35, 0], sizes = [2, 28, 32], strides = [1, 1, 1]} : vector<2x96x32xf32> to vector<2x28x32xf32>
    %c0_19 = arith.constant 0 : index
    %c0_20 = arith.constant 0 : index
    %c256 = arith.constant 256 : index
    %18 = vector.load %arg5[%c0_19, %c0_20, %c256] : memref<2x28x480xf32, #tpu.memory_space<vmem>>, vector<2x28x32xf32>
    tpu.vector_store %arg5[%c0_19, %c0_20, %c256], %17 {strides = array<i32>} : memref<2x28x480xf32, #tpu.memory_space<vmem>>, vector<2x28x32xf32>,
    %19 = vector.extract_strided_slice %0 {offsets = [0, 36, 0], sizes = [2, 28, 32], strides = [1, 1, 1]} : vector<2x96x32xf32> to vector<2x28x32xf32>
    %c0_21 = arith.constant 0 : index
    %c0_22 = arith.constant 0 : index
    %c288 = arith.constant 288 : index
    %20 = vector.load %arg5[%c0_21, %c0_22, %c288] : memref<2x28x480xf32, #tpu.memory_space<vmem>>, vector<2x28x32xf32>
    tpu.vector_store %arg5[%c0_21, %c0_22, %c288], %19 {strides = array<i32>} : memref<2x28x480xf32, #tpu.memory_space<vmem>>, vector<2x28x32xf32>,
    %21 = vector.extract_strided_slice %0 {offsets = [0, 64, 0], sizes = [2, 28, 32], strides = [1, 1, 1]} : vector<2x96x32xf32> to vector<2x28x32xf32>
    %c0_23 = arith.constant 0 : index
    %c0_24 = arith.constant 0 : index
    %c320 = arith.constant 320 : index
    %22 = vector.load %arg5[%c0_23, %c0_24, %c320] : memref<2x28x480xf32, #tpu.memory_space<vmem>>, vector<2x28x32xf32>
    tpu.vector_store %arg5[%c0_23, %c0_24, %c320], %21 {strides = array<i32>} : memref<2x28x480xf32, #tpu.memory_space<vmem>>, vector<2x28x32xf32>,
    %23 = vector.extract_strided_slice %0 {offsets = [0, 65, 0], sizes = [2, 28, 32], strides = [1, 1, 1]} : vector<2x96x32xf32> to vector<2x28x32xf32>
    %c0_25 = arith.constant 0 : index
    %c0_26 = arith.constant 0 : index
    %c352 = arith.constant 352 : index
    %24 = vector.load %arg5[%c0_25, %c0_26, %c352] : memref<2x28x480xf32, #tpu.memory_space<vmem>>, vector<2x28x32xf32>
    tpu.vector_store %arg5[%c0_25, %c0_26, %c352], %23 {strides = array<i32>} : memref<2x28x480xf32, #tpu.memory_space<vmem>>, vector<2x28x32xf32>,
    %25 = vector.extract_strided_slice %0 {offsets = [0, 66, 0], sizes = [2, 28, 32], strides = [1, 1, 1]} : vector<2x96x32xf32> to vector<2x28x32xf32>
    %c0_27 = arith.constant 0 : index
    %c0_28 = arith.constant 0 : index
    %c384 = arith.constant 384 : index
    %26 = vector.load %arg5[%c0_27, %c0_28, %c384] : memref<2x28x480xf32, #tpu.memory_space<vmem>>, vector<2x28x32xf32>
    tpu.vector_store %arg5[%c0_27, %c0_28, %c384], %25 {strides = array<i32>} : memref<2x28x480xf32, #tpu.memory_space<vmem>>, vector<2x28x32xf32>,
    %27 = vector.extract_strided_slice %0 {offsets = [0, 67, 0], sizes = [2, 28, 32], strides = [1, 1, 1]} : vector<2x96x32xf32> to vector<2x28x32xf32>
    %c0_29 = arith.constant 0 : index
    %c0_30 = arith.constant 0 : index
    %c416 = arith.constant 416 : index
    %28 = vector.load %arg5[%c0_29, %c0_30, %c416] : memref<2x28x480xf32, #tpu.memory_space<vmem>>, vector<2x28x32xf32>
    tpu.vector_store %arg5[%c0_29, %c0_30, %c416], %27 {strides = array<i32>} : memref<2x28x480xf32, #tpu.memory_space<vmem>>, vector<2x28x32xf32>,
    %29 = vector.extract_strided_slice %0 {offsets = [0, 68, 0], sizes = [2, 28, 32], strides = [1, 1, 1]} : vector<2x96x32xf32> to vector<2x28x32xf32>
    %c0_31 = arith.constant 0 : index
    %c0_32 = arith.constant 0 : index
    %c448 = arith.constant 448 : index
    %30 = vector.load %arg5[%c0_31, %c0_32, %c448] : memref<2x28x480xf32, #tpu.memory_space<vmem>>, vector<2x28x32xf32>
    tpu.vector_store %arg5[%c0_31, %c0_32, %c448], %29 {strides = array<i32>} : memref<2x28x480xf32, #tpu.memory_space<vmem>>, vector<2x28x32xf32>,
    %c0_33 = arith.constant 0 : index
    %c0_34 = arith.constant 0 : index
    %c0_35 = arith.constant 0 : index
    %31 = vector.load %arg5[%c0_33, %c0_34, %c0_35] : memref<2x28x480xf32, #tpu.memory_space<vmem>>, vector<2x28x480xf32>
    %32 = vector.shape_cast %31 : vector<2x28x480xf32> to vector<56x480xf32>
    %c0_36 = arith.constant 0 : index
    %c0_37 = arith.constant 0 : index
    %33 = vector.load %arg2[%c0_36, %c0_37] : memref<2240x168xf32, #tpu.memory_space<vmem>>, vector<480x168xf32>
    %cst = arith.constant dense<0.000000e+00> : vector<56x168xf32>
    %34 = tpu.matmul %32, %33, %cst {dimension_numbers = #tpu.dot_dimension_numbers<[1], [0], [0], [1], [0, 0, 1, 1], [], []>} : vector<56x480xf32>, vector<480x168xf32>, vector<56x168xf32> -> vector<56x168xf32>
    %c0_38 = arith.constant 0 : index
    %c0_39 = arith.constant 0 : index
    %35 = vector.load %arg3[%c0_38, %c0_39] : memref<8x168xf32, #tpu.memory_space<vmem>>, vector<1x168xf32>
    %36 = vector.broadcast %35 : vector<1x168xf32> to vector<56x168xf32>
    %37 = arith.addf %34, %36 : vector<56x168xf32>
    %cst_40 = arith.constant 0.000000e+00 : f32
    %38 = vector.broadcast %cst_40 : f32 to vector<56x168xf32>
    %39 = arith.maximumf %37, %38 : vector<56x168xf32>
    %40 = vector.shape_cast %39 : vector<56x168xf32> to vector<28x2x168xf32>
    %41 = vector.extract_strided_slice %40 {offsets = [0, 0, 0], sizes = [28, 1, 168], strides = [1, 1, 1]} : vector<28x2x168xf32> to vector<28x1x168xf32>
    %42 = vector.shape_cast %41 : vector<28x1x168xf32> to vector<28x168xf32>
    %43 = vector.extract_strided_slice %40 {offsets = [0, 1, 0], sizes = [28, 1, 168], strides = [1, 1, 1]} : vector<28x2x168xf32> to vector<28x1x168xf32>
    %44 = vector.shape_cast %43 : vector<28x1x168xf32> to vector<28x168xf32>
    %45 = arith.maximumf %42, %44 : vector<28x168xf32>
    %46 = vector.extract_strided_slice %45 {offsets = [0, 0], sizes = [28, 162], strides = [1, 1]} : vector<28x168xf32> to vector<28x162xf32>
    %47 = vector.extract_strided_slice %45 {offsets = [0, 6], sizes = [28, 162], strides = [1, 1]} : vector<28x168xf32> to vector<28x162xf32>
    %48 = arith.maximumf %46, %47 : vector<28x162xf32>
    %49 = vector.shape_cast %48 : vector<28x162xf32> to vector<2x14x162xf32>
    %50 = vector.extract_strided_slice %49 {offsets = [0, 0, 0], sizes = [2, 10, 162], strides = [1, 1, 1]} : vector<2x14x162xf32> to vector<2x10x162xf32>
    %c0_41 = arith.constant 0 : index
    %c0_42 = arith.constant 0 : index
    %c0_43 = arith.constant 0 : index
    %51 = vector.load %arg6[%c0_41, %c0_42, %c0_43] : memref<2x10x810xf32, #tpu.memory_space<vmem>>, vector<2x10x162xf32>
    tpu.vector_store %arg6[%c0_41, %c0_42, %c0_43], %50 {strides = array<i32>} : memref<2x10x810xf32, #tpu.memory_space<vmem>>, vector<2x10x162xf32>,
    %52 = vector.extract_strided_slice %49 {offsets = [0, 1, 0], sizes = [2, 10, 162], strides = [1, 1, 1]} : vector<2x14x162xf32> to vector<2x10x162xf32>
    %c0_44 = arith.constant 0 : index
    %c0_45 = arith.constant 0 : index
    %c162 = arith.constant 162 : index
    %53 = vector.load %arg6[%c0_44, %c0_45, %c162] : memref<2x10x810xf32, #tpu.memory_space<vmem>>, vector<2x10x162xf32>
    tpu.vector_store %arg6[%c0_44, %c0_45, %c162], %52 {strides = array<i32>} : memref<2x10x810xf32, #tpu.memory_space<vmem>>, vector<2x10x162xf32>,
    %54 = vector.extract_strided_slice %49 {offsets = [0, 2, 0], sizes = [2, 10, 162], strides = [1, 1, 1]} : vector<2x14x162xf32> to vector<2x10x162xf32>
    %c0_46 = arith.constant 0 : index
    %c0_47 = arith.constant 0 : index
    %c324 = arith.constant 324 : index
    %55 = vector.load %arg6[%c0_46, %c0_47, %c324] : memref<2x10x810xf32, #tpu.memory_space<vmem>>, vector<2x10x162xf32>
    tpu.vector_store %arg6[%c0_46, %c0_47, %c324], %54 {strides = array<i32>} : memref<2x10x810xf32, #tpu.memory_space<vmem>>, vector<2x10x162xf32>,
    %56 = vector.extract_strided_slice %49 {offsets = [0, 3, 0], sizes = [2, 10, 162], strides = [1, 1, 1]} : vector<2x14x162xf32> to vector<2x10x162xf32>
    %c0_48 = arith.constant 0 : index
    %c0_49 = arith.constant 0 : index
    %c486 = arith.constant 486 : index
    %57 = vector.load %arg6[%c0_48, %c0_49, %c486] : memref<2x10x810xf32, #tpu.memory_space<vmem>>, vector<2x10x162xf32>
    tpu.vector_store %arg6[%c0_48, %c0_49, %c486], %56 {strides = array<i32>} : memref<2x10x810xf32, #tpu.memory_space<vmem>>, vector<2x10x162xf32>,
    %58 = vector.extract_strided_slice %49 {offsets = [0, 4, 0], sizes = [2, 10, 162], strides = [1, 1, 1]} : vector<2x14x162xf32> to vector<2x10x162xf32>
    %c0_50 = arith.constant 0 : index
    %c0_51 = arith.constant 0 : index
    %c648 = arith.constant 648 : index
    %59 = vector.load %arg6[%c0_50, %c0_51, %c648] : memref<2x10x810xf32, #tpu.memory_space<vmem>>, vector<2x10x162xf32>
    tpu.vector_store %arg6[%c0_50, %c0_51, %c648], %58 {strides = array<i32>} : memref<2x10x810xf32, #tpu.memory_space<vmem>>, vector<2x10x162xf32>,
    %c0_52 = arith.constant 0 : index
    %c0_53 = arith.constant 0 : index
    %c0_54 = arith.constant 0 : index
    %60 = vector.load %arg6[%c0_52, %c0_53, %c0_54] : memref<2x10x810xf32, #tpu.memory_space<vmem>>, vector<2x10x810xf32>
    %61 = vector.shape_cast %60 : vector<2x10x810xf32> to vector<20x810xf32>
    %c480 = arith.constant 480 : index
    %c0_55 = arith.constant 0 : index
    %62 = vector.load %arg2[%c480, %c0_55] : memref<2240x168xf32, #tpu.memory_space<vmem>>, vector<810x160xf32>
    %cst_56 = arith.constant dense<0.000000e+00> : vector<20x160xf32>
    %63 = tpu.matmul %61, %62, %cst_56 {dimension_numbers = #tpu.dot_dimension_numbers<[1], [0], [0], [1], [0, 0, 1, 1], [], []>} : vector<20x810xf32>, vector<810x160xf32>, vector<20x160xf32> -> vector<20x160xf32>
    %c1 = arith.constant 1 : index
    %c0_57 = arith.constant 0 : index
    %64 = vector.load %arg3[%c1, %c0_57] : memref<8x168xf32, #tpu.memory_space<vmem>>, vector<1x160xf32>
    %65 = vector.broadcast %64 : vector<1x160xf32> to vector<20x160xf32>
    %66 = arith.addf %63, %65 : vector<20x160xf32>
    %cst_58 = arith.constant 0.000000e+00 : f32
    %67 = vector.broadcast %cst_58 : f32 to vector<20x160xf32>
    %68 = arith.maximumf %66, %67 : vector<20x160xf32>
    %69 = vector.shape_cast %68 : vector<20x160xf32> to vector<10x2x160xf32>
    %70 = vector.extract_strided_slice %69 {offsets = [0, 0, 0], sizes = [10, 1, 160], strides = [1, 1, 1]} : vector<10x2x160xf32> to vector<10x1x160xf32>
    %71 = vector.shape_cast %70 : vector<10x1x160xf32> to vector<10x160xf32>
    %72 = vector.extract_strided_slice %69 {offsets = [0, 1, 0], sizes = [10, 1, 160], strides = [1, 1, 1]} : vector<10x2x160xf32> to vector<10x1x160xf32>
    %73 = vector.shape_cast %72 : vector<10x1x160xf32> to vector<10x160xf32>
    %74 = arith.maximumf %71, %73 : vector<10x160xf32>
    %75 = vector.extract_strided_slice %74 {offsets = [0, 0], sizes = [10, 144], strides = [1, 1]} : vector<10x160xf32> to vector<10x144xf32>
    %76 = vector.extract_strided_slice %74 {offsets = [0, 16], sizes = [10, 144], strides = [1, 1]} : vector<10x160xf32> to vector<10x144xf32>
    %77 = arith.maximumf %75, %76 : vector<10x144xf32>
    %78 = vector.shape_cast %77 : vector<10x144xf32> to vector<2x5x144xf32>
    %79 = vector.extract_strided_slice %78 {offsets = [0, 0, 0], sizes = [2, 1, 144], strides = [1, 1, 1]} : vector<2x5x144xf32> to vector<2x1x144xf32>
    %80 = vector.shape_cast %79 : vector<2x1x144xf32> to vector<2x144xf32>
    %c0_59 = arith.constant 0 : index
    %c0_60 = arith.constant 0 : index
    %81 = vector.load %arg7[%c0_59, %c0_60] : memref<2x720xf32, #tpu.memory_space<vmem>>, vector<2x144xf32>
    tpu.vector_store %arg7[%c0_59, %c0_60], %80 {strides = array<i32>} : memref<2x720xf32, #tpu.memory_space<vmem>>, vector<2x144xf32>,
    %82 = vector.extract_strided_slice %78 {offsets = [0, 1, 0], sizes = [2, 1, 144], strides = [1, 1, 1]} : vector<2x5x144xf32> to vector<2x1x144xf32>
    %83 = vector.shape_cast %82 : vector<2x1x144xf32> to vector<2x144xf32>
    %c0_61 = arith.constant 0 : index
    %c144 = arith.constant 144 : index
    %84 = vector.load %arg7[%c0_61, %c144] : memref<2x720xf32, #tpu.memory_space<vmem>>, vector<2x144xf32>
    tpu.vector_store %arg7[%c0_61, %c144], %83 {strides = array<i32>} : memref<2x720xf32, #tpu.memory_space<vmem>>, vector<2x144xf32>,
    %85 = vector.extract_strided_slice %78 {offsets = [0, 2, 0], sizes = [2, 1, 144], strides = [1, 1, 1]} : vector<2x5x144xf32> to vector<2x1x144xf32>
    %86 = vector.shape_cast %85 : vector<2x1x144xf32> to vector<2x144xf32>
    %c0_62 = arith.constant 0 : index
    %c288_63 = arith.constant 288 : index
    %87 = vector.load %arg7[%c0_62, %c288_63] : memref<2x720xf32, #tpu.memory_space<vmem>>, vector<2x144xf32>
    tpu.vector_store %arg7[%c0_62, %c288_63], %86 {strides = array<i32>} : memref<2x720xf32, #tpu.memory_space<vmem>>, vector<2x144xf32>,
    %88 = vector.extract_strided_slice %78 {offsets = [0, 3, 0], sizes = [2, 1, 144], strides = [1, 1, 1]} : vector<2x5x144xf32> to vector<2x1x144xf32>
    %89 = vector.shape_cast %88 : vector<2x1x144xf32> to vector<2x144xf32>
    %c0_64 = arith.constant 0 : index
    %c432 = arith.constant 432 : index
    %90 = vector.load %arg7[%c0_64, %c432] : memref<2x720xf32, #tpu.memory_space<vmem>>, vector<2x144xf32>
    tpu.vector_store %arg7[%c0_64, %c432], %89 {strides = array<i32>} : memref<2x720xf32, #tpu.memory_space<vmem>>, vector<2x144xf32>,
    %91 = vector.extract_strided_slice %78 {offsets = [0, 4, 0], sizes = [2, 1, 144], strides = [1, 1, 1]} : vector<2x5x144xf32> to vector<2x1x144xf32>
    %92 = vector.shape_cast %91 : vector<2x1x144xf32> to vector<2x144xf32>
    %c0_65 = arith.constant 0 : index
    %c576 = arith.constant 576 : index
    %93 = vector.load %arg7[%c0_65, %c576] : memref<2x720xf32, #tpu.memory_space<vmem>>, vector<2x144xf32>
    tpu.vector_store %arg7[%c0_65, %c576], %92 {strides = array<i32>} : memref<2x720xf32, #tpu.memory_space<vmem>>, vector<2x144xf32>,
    %c0_66 = arith.constant 0 : index
    %c0_67 = arith.constant 0 : index
    %94 = vector.load %arg7[%c0_66, %c0_67] : memref<2x720xf32, #tpu.memory_space<vmem>>, vector<2x720xf32>
    %c1296 = arith.constant 1296 : index
    %c0_68 = arith.constant 0 : index
    %95 = vector.load %arg2[%c1296, %c0_68] : memref<2240x168xf32, #tpu.memory_space<vmem>>, vector<720x120xf32>
    %cst_69 = arith.constant dense<0.000000e+00> : vector<2x120xf32>
    %96 = tpu.matmul %94, %95, %cst_69 {dimension_numbers = #tpu.dot_dimension_numbers<[1], [0], [0], [1], [0, 0, 1, 1], [], []>} : vector<2x720xf32>, vector<720x120xf32>, vector<2x120xf32> -> vector<2x120xf32>
    %c2 = arith.constant 2 : index
    %c0_70 = arith.constant 0 : index
    %97 = vector.load %arg3[%c2, %c0_70] : memref<8x168xf32, #tpu.memory_space<vmem>>, vector<1x120xf32>
    %98 = vector.broadcast %97 : vector<1x120xf32> to vector<2x120xf32>
    %99 = arith.addf %96, %98 : vector<2x120xf32>
    %cst_71 = arith.constant 0.000000e+00 : f32
    %100 = vector.broadcast %cst_71 : f32 to vector<2x120xf32>
    %101 = arith.maximumf %99, %100 : vector<2x120xf32>
    %c2016 = arith.constant 2016 : index
    %c0_72 = arith.constant 0 : index
    %102 = vector.load %arg2[%c2016, %c0_72] : memref<2240x168xf32, #tpu.memory_space<vmem>>, vector<120x84xf32>
    %cst_73 = arith.constant dense<0.000000e+00> : vector<2x84xf32>
    %103 = tpu.matmul %101, %102, %cst_73 {dimension_numbers = #tpu.dot_dimension_numbers<[1], [0], [0], [1], [0, 0, 1, 1], [], []>} : vector<2x120xf32>, vector<120x84xf32>, vector<2x84xf32> -> vector<2x84xf32>
    %c3 = arith.constant 3 : index
    %c0_74 = arith.constant 0 : index
    %104 = vector.load %arg3[%c3, %c0_74] : memref<8x168xf32, #tpu.memory_space<vmem>>, vector<1x84xf32>
    %105 = vector.broadcast %104 : vector<1x84xf32> to vector<2x84xf32>
    %106 = arith.addf %103, %105 : vector<2x84xf32>
    %cst_75 = arith.constant 0.000000e+00 : f32
    %107 = vector.broadcast %cst_75 : f32 to vector<2x84xf32>
    %108 = arith.maximumf %106, %107 : vector<2x84xf32>
    %c2144 = arith.constant 2144 : index
    %c0_76 = arith.constant 0 : index
    %109 = vector.load %arg2[%c2144, %c0_76] : memref<2240x168xf32, #tpu.memory_space<vmem>>, vector<84x10xf32>
    %cst_77 = arith.constant dense<0.000000e+00> : vector<2x10xf32>
    %110 = tpu.matmul %108, %109, %cst_77 {dimension_numbers = #tpu.dot_dimension_numbers<[1], [0], [0], [1], [0, 0, 1, 1], [], []>} : vector<2x84xf32>, vector<84x10xf32>, vector<2x10xf32> -> vector<2x10xf32>
    %c4 = arith.constant 4 : index
    %c0_78 = arith.constant 0 : index
    %111 = vector.load %arg3[%c4, %c0_78] : memref<8x168xf32, #tpu.memory_space<vmem>>, vector<1x10xf32>
    %112 = vector.broadcast %111 : vector<1x10xf32> to vector<2x10xf32>
    %113 = arith.addf %110, %112 : vector<2x10xf32>
    %c0_79 = arith.constant 0 : index
    %c0_80 = arith.constant 0 : index
    %114 = vector.load %arg4[%c0_79, %c0_80] : memref<2x10xf32, #tpu.memory_space<vmem>>, vector<2x10xf32>
    tpu.vector_store %arg4[%c0_79, %c0_80], %113 {strides = array<i32>} : memref<2x10xf32, #tpu.memory_space<vmem>>, vector<2x10xf32>,
    return
  }
  func.func @transform_0(%arg0: i32) -> (i32, i32, i32) {
    %c0_i32 = arith.constant 0 : i32
    %c0_i32_0 = arith.constant 0 : i32
    %c0_i32_1 = arith.constant 0 : i32
    return %arg0, %c0_i32, %c0_i32_0 : i32, i32, i32
  }
  func.func @transform_1(%arg0: i32) -> (i32, i32) {
    %c0_i32 = arith.constant 0 : i32
    %c0_i32_0 = arith.constant 0 : i32
    %c0_i32_1 = arith.constant 0 : i32
    return %c0_i32, %c0_i32_0 : i32, i32
  }
  func.func @transform_2(%arg0: i32) -> (i32, i32) {
    %c0_i32 = arith.constant 0 : i32
    %c0_i32_0 = arith.constant 0 : i32
    %c0_i32_1 = arith.constant 0 : i32
    return %c0_i32, %c0_i32_0 : i32, i32
  }
  func.func @transform_3(%arg0: i32) -> (i32, i32) {
    %c0_i32 = arith.constant 0 : i32
    %c0_i32_0 = arith.constant 0 : i32
    return %arg0, %c0_i32 : i32, i32
  }
}

</mosaic_0001>

<bundles_post_ra>
// kernel: lenet5_mod_light_forward.1
= control target key start
LH: loop header
LB: loop body
LE: loop exit
PB: predicated region body
PF: predicated region fallthrough
CT: control target
= control target key end

     0   :  { %vm57_vm0 = vcmask 1046528   ;;  %s4370_s18 = smov 32   ;;  %vm106_vm1 = vcmask 1045504   ;;  %s4371_s21 = smov 64   ;;  %vm155_vm2 = vcmask 1044480   ;;  %vm7728_vm3 = vcmask 1043456   ;;  %s7716_s0 = inlined_call_operand.vmem [shape: f32[2,96,32], index: 0, kind: input, shape index: {}]   ;;  %s7717_s1 = inlined_call_operand.vmem [shape: f32[2240,168], index: 1, kind: input, shape index: {}]   ;;  %s7718_s2 = inlined_call_operand.vmem [shape: f32[8,168], index: 2, kind: input, shape index: {}]   ;;  %s7719_s3 = inlined_call_operand.hbm [shape: f32[2,10], index: 3, kind: output, shape index: {}]  }
   0x1   :  { %v4408_v0 = vld [vmem:[%s7716_s0 + $0x20] sm:$0xff]  ;;  %v4413_v1 = vld [vmem:[%s7716_s0 + $0x28] sm:$0xff]  ;;  %v774_v17 = vld [vmem:[%s7717_s1 + $0xf8] sm:$0xff]  ;;  %s4372_s11 = smov 96   ;;  %vm7729_vm4 = vcmask 261120  }
   0x2   :  { %v4418_v2 = vld [vmem:[%s7716_s0] sm:$0xff]  ;;  %243 = vrot.lane.b32.xlu0 %v4408_v0, %s4370_s18  ;;  %v275_v3 = vrot.slane %v4408_v0, 1  ;;  %v276_v4 = vrot.slane %v4413_v1, 1  ;;  %v4427_v5 = vld [vmem:[%s7716_s0 + $0x8] sm:$0xff]  ;;  %v321_v10 = vrot.slane %v4408_v0, 2  ;;  %v322_v12 = vrot.slane %v4413_v1, 2  ;;  %939 = vmatprep.subr.mxu0 %v774_v17 }
   0x3   :  { %v58_v6 = vrot.slane %v4418_v2, 1  ;;  %v59_v7 = vrot.slane %v4427_v5, 1  ;;  %v107_v8 = vrot.slane %v4418_v2, 2  ;;  %v108_v9 = vrot.slane %v4427_v5, 2  ;;  %v773_v18 = vld [vmem:[%s7717_s1 + $0xf0] sm:$0xff]  ;;  %v4462_v22 = vld [vmem:[%s7716_s0 + $0x40] sm:$0xff] }
   0x4   :  { %v277_v11 = vsel %vm57_vm0, %v275_v3, %v276_v4  ;;  %v156_v15 = vrot.slane %v4418_v2, 3  ;;  %v157_v16 = vrot.slane %v4427_v5, 3  ;;  %v323_v19 = vsel %vm106_vm1, %v321_v10, %v322_v12  ;;  %v4467_v23 = vld [vmem:[%s7716_s0 + $0x48] sm:$0xff]  ;;  %940 = vmatpush1.msra.mxu0 %v773_v18  ;;  %v771_v25 = vld [vmem:[%s7717_s1 + $0xe0] sm:$0xff]  ;;  %v770_v26 = vld [vmem:[%s7717_s1 + $0xd8] sm:$0xff]  ;;  %40 = vst.msk [vmem:[#allocation2] sm:$0xff] %vm7729_vm4, %v4418_v2 }
   0x5   :  { %289 = vrot.lane.b32.xlu1 %v277_v11, %s4371_s21  ;;  %v60_v13 = vsel %vm57_vm0, %v58_v6, %v59_v7  ;;  %v109_v14 = vsel %vm106_vm1, %v107_v8, %v108_v9  ;;  %v397_v20 = vrot.slane %v4408_v0, 4  ;;  %v398_v21 = vrot.slane %v4413_v1, 4  ;;  %v772_v24 = vld [vmem:[%s7717_s1 + $0xe8] sm:$0xff]  ;;  %v769_v27 = vld [vmem:[%s7717_s1 + $0xd0] sm:$0xff]  ;;  %v767_v33 = vld [vmem:[%s7717_s1 + $0xc0] sm:$0xff]  ;;  %41 = vst.msk [vmem:[#allocation2 + $0x20] sm:$0xff] %vm7729_vm4, %v4427_v5 }
   0x6   :  { %72 = vrot.lane.b32.xlu0 %v60_v13, %s4370_s18  ;;  %941 = vmatprep.subr.mxu0 %v772_v24  ;;  %v158_v28 = vsel %vm155_vm2, %v156_v15, %v157_v16  ;;  %v559_v29 = vrot.slane %v4462_v22, 3  ;;  %v560_v30 = vrot.slane %v4467_v23, 3  ;;  %v768_v31 = vld [vmem:[%s7717_s1 + $0xc8] sm:$0xff]  ;;  %v766_v34 = vld [vmem:[%s7717_s1 + $0xb8] sm:$0xff]  ;;  %v765_v35 = vld [vmem:[%s7717_s1 + $0xb0] sm:$0xff]  ;;  %v605_v38 = vrot.slane %v4462_v22, 4 }
   0x7   :  { %942 = vmatpush1.msra.mxu0 %v771_v25  ;;  %v399_v32 = vsel %vm7728_vm3, %v397_v20, %v398_v21  ;;  %v764_v37 = vld [vmem:[%s7717_s1 + $0xa8] sm:$0xff]  ;;  %v606_v39 = vrot.slane %v4467_v23, 4  ;;  %v4516_v40 = vld [vmem:[%s7716_s0 + $0x10] sm:$0xff]  ;;  %v763_v41 = vld [vmem:[%s7717_s1 + $0xa0] sm:$0xff]  ;;  %v483_v60 = vrot.slane %v4462_v22, 1  ;;  %v484_v61 = vrot.slane %v4467_v23, 1 }
   0x8   :  { %943 = vmatprep.subr.mxu0 %v770_v26  ;;  %v561_v36 = vsel %vm155_vm2, %v559_v29, %v560_v30  ;;  %v4524_v42 = vld [vmem:[%s7716_s0 + $0x30] sm:$0xff]  ;;  %v762_v43 = vld [vmem:[%s7717_s1 + $0x98] sm:$0xff]  ;;  %v61_v47 = vrot.slane %v4516_v40, 1  ;;  %v760_v48 = vld [vmem:[%s7717_s1 + $0x88] sm:$0xff]  ;;  %v205_v24 = vrot.slane %v4418_v2, 4  ;;  %v159_v26 = vrot.slane %v4516_v40, 3 }
   0x9   :  { %121 = vrot.lane.b32.xlu1 %v109_v14, %s4371_s21  ;;  %944 = vmatpush1.msra.mxu0 %v769_v27  ;;  %v838_v44 = vld [vmem:[%s7717_s1 + $0x2f8] sm:$0xff]  ;;  %v761_v45 = vld [vmem:[%s7717_s1 + $0x90] sm:$0xff]  ;;  %v607_v49 = vsel %vm7728_vm3, %v605_v38, %v606_v39  ;;  %v278_v50 = vrot.slane %v4524_v42, 1  ;;  %v759_v51 = vld [vmem:[%s7717_s1 + $0x80] sm:$0xff]  ;;  %v485_v18 = vsel %vm57_vm0, %v483_v60, %v484_v61  ;;  %42 = vst.msk [vmem:[#allocation2 + $0x40] sm:$0xff] %vm7729_vm4, %v4516_v40  ;;  %v368_v38 = vrot.slane %v4413_v1, 3 }
   0xa   :  { %335 = vrot.lane.b32.xlu0 %v323_v19, %s4372_s11  ;;  %945 = vmatprep.subr.mxu0 %v768_v31  ;;  %v837_v46 = vld [vmem:[%s7717_s1 + $0x2f0] sm:$0xff]  ;;  %v4555_v52 = vld [vmem:[%s7716_s0 + $0x60] sm:$0xff]  ;;  %v758_v53 = vld [vmem:[%s7717_s1 + $0x78] sm:$0xff]  ;;  %v62_v59 = vsel %vm57_vm0, %v59_v7, %v61_v47  ;;  %v110_v7 = vrot.slane %v4516_v40, 2  ;;  %v324_v19 = vrot.slane %v4524_v42, 2  ;;  %v400_v31 = vrot.slane %v4524_v42, 4 }
   0xb   :  { %946 = vmatpush1.msra.mxu0 %v767_v33  ;;  %1046 = vmatprep.subr.mxu1 %v838_v44  ;;  %v836_v54 = vld [vmem:[%s7717_s1 + $0x2e8] sm:$0xff]  ;;  %v757_v56 = vld [vmem:[%s7717_s1 + $0x70] sm:$0xff]  ;;  %v163_v57 = vrot.slane %v4555_v52, 3  ;;  %v835_v58 = vld [vmem:[%s7717_s1 + $0x2e0] sm:$0xff]  ;;  %v279_v6 = vsel %vm57_vm0, %v276_v4, %v278_v50  ;;  %45 = vst.msk [vmem:[#allocation2 + $0x80] sm:$0xff] %vm7729_vm4, %v4555_v52 }
   0xc   :  { %947 = vmatprep.subr.mxu0 %v766_v34  ;;  %1047 = vmatpush1.msra.mxu1 %v837_v46  ;;  %v4568_v55 = vld [vmem:[%s7716_s0 + $0x68] sm:$0xff]  ;;  %v4588_v62 = vld [vmem:[%s7716_s0 + $0x70] sm:$0xff]  ;;  %v755_v8 = vld [vmem:[%s7717_s1 + $0x60] sm:$0xff]  ;;  %v111_v25 = vsel %vm106_vm1, %v108_v9, %v110_v7  ;;  %v370_v46 = vrot.slane %v4524_v42, 3 }
   0xd   :  { %170 = vrot.lane.b32.xlu1 %v158_v28, %s4372_s11  ;;  %948 = vmatpush1.msra.mxu0 %v765_v35  ;;  %v756_v63 = vld [vmem:[%s7717_s1 + $0x68] sm:$0xff]  ;;  %v164_v3 = vrot.slane %v4568_v55, 3  ;;  %v166_v10 = vrot.slane %v4588_v62, 3  ;;  %v754_v11 = vld [vmem:[%s7717_s1 + $0x58] sm:$0xff]  ;;  %v753_v14 = vld [vmem:[%s7717_s1 + $0x50] sm:$0xff]  ;;  %v206_v28 = vrot.slane %v4427_v5, 4 }
   0xe   :  { %411 = vrot.lane.b32.xlu0 %v399_v32, %s4370_s18  ;;  %949 = vmatprep.subr.mxu0 %v764_v37  ;;  %v834_v4 = vld [vmem:[%s7717_s1 + $0x2d8] sm:$0xff]  ;;  %v833_v15 = vld [vmem:[%s7717_s1 + $0x2d0] sm:$0xff]  ;;  %v752_v20 = vld [vmem:[%s7717_s1 + $0x48] sm:$0xff]  ;;  %46 = vst.msk [vmem:[#allocation2 + $0xa0] sm:$0xff] %vm7729_vm4, %v4568_v55  ;;  %v367_v35 = vrot.slane %v4408_v0, 3  ;;  %v530_v0 = vrot.slane %v4467_v23, 2 }
   0xf   :  { %950 = vmatpush1.msra.mxu0 %v763_v41  ;;  %1048 = vmatprep.subr.mxu1 %v836_v54  ;;  %v4608_v13 = vsel %vm155_vm2, %v163_v57, %v164_v3  ;;  %v4623_v17 = vsel %vm155_vm2, %v164_v3, %v166_v10  ;;  %v751_v27 = vld [vmem:[%s7717_s1 + $0x40] sm:$0xff]  ;;  %47 = vst.msk [vmem:[#allocation2 + $0xc0] sm:$0xff] %vm7729_vm4, %v4588_v62  ;;  %v4659_v9 = vld [vmem:[%s7716_s0 + $0x50] sm:$0xff]  ;;  %v750_v2 = vld [vmem:[%s7717_s1 + $0x38] sm:$0xff]  ;;  %v529_v41 = vrot.slane %v4462_v22, 2 }
  0x10   :  { %951 = vmatprep.subr.mxu0 %v762_v43  ;;  %1049 = vmatpush1.msra.mxu1 %v835_v58  ;;  %v832_v29 = vld [vmem:[%s7717_s1 + $0x2c8] sm:$0xff]  ;;  %v749_v32 = vld [vmem:[%s7717_s1 + $0x30] sm:$0xff]  ;;  %v831_v33 = vld [vmem:[%s7717_s1 + $0x2c0] sm:$0xff]  ;;  %v207_v34 = vsel %vm7728_vm3, %v205_v24, %v206_v28  ;;  %v160_v43 = vsel %vm155_vm2, %v157_v16, %v159_v26  ;;  %v371_v58 = vsel %vm155_vm2, %v368_v38, %v370_v46 }
  0x11   :  { %573 = vrot.lane.b32.xlu1 %v561_v36, %s4370_s18  ;;  %952 = vmatpush1.msra.mxu0 %v761_v45  ;;  %v325_v36 = vsel %vm106_vm1, %v322_v12, %v324_v19  ;;  %v748_v37 = vld [vmem:[%s7717_s1 + $0x28] sm:$0xff]  ;;  %227 = vst.msk [vmem:[#allocation2 + $0x8] sm:$0xff] %vm7729_vm4, %v207_v34  ;;  %v562_v12 = vrot.slane %v4659_v9, 3  ;;  %v4699_v44 = vld [vmem:[%s7716_s0 + $0x18] sm:$0xff]  ;;  %v208_v45 = vrot.slane %v4516_v40, 4  ;;  %v745_v54 = vld [vmem:[%s7717_s1 + $0x10] sm:$0xff] }
  0x12   :  { %245 = vrot.lane.b32.xlu0 %v4413_v1, %s4370_s18  ;;  %953 = vmatprep.subr.mxu0 %v760_v48  ;;  %v746_v5 = vld [vmem:[%s7717_s1 + $0x18] sm:$0xff]  ;;  %v369_v48 = vsel %vm155_vm2, %v367_v35, %v368_v38  ;;  %v744_v60 = vld [vmem:[%s7717_s1 + $0x8] sm:$0xff]  ;;  %390 = vst.msk [vmem:[#allocation2 + $0x30] sm:$0xff] %vm7729_vm4, %v371_v58 }
  0x13   :  { %954 = vmatpush1.msra.mxu0 %v759_v51  ;;  %1050 = vmatprep.subr.mxu1 %v834_v4  ;;  %v830_v16 = vld [vmem:[%s7717_s1 + $0x2b8] sm:$0xff]  ;;  %v532_v51 = vrot.slane %v4659_v9, 2  ;;  %389 = vst.msk [vmem:[#allocation2 + $0x10] sm:$0xff] %vm7729_vm4, %v369_v48  ;;  %v209_v57 = vsel %vm7728_vm3, %v206_v28, %v208_v45  ;;  %v563_v1 = vsel %vm155_vm2, %v560_v30, %v562_v12  ;;  %v828_v30 = vld [vmem:[%s7717_s1 + $0x2a8] sm:$0xff]  ;;  %v827_v4 = vld [vmem:[%s7717_s1 + $0x2a0] sm:$0xff] }
  0x14   :  { %955 = vmatprep.subr.mxu0 %v758_v53  ;;  %1051 = vmatpush1.msra.mxu1 %v833_v15  ;;  %v210_v53 = vrot.slane %v4699_v44, 4  ;;  %228 = vst.msk [vmem:[#allocation2 + $0x28] sm:$0xff] %vm7729_vm4, %v209_v57  ;;  %v4786_v24 = vld [vmem:[%s7716_s0 + $0x38] sm:$0xff]  ;;  %v825_v28 = vld [vmem:[%s7717_s1 + $0x290] sm:$0xff]  ;;  %v824_v35 = vld [vmem:[%s7717_s1 + $0x288] sm:$0xff] }
  0x15   :  { %451 = vrot.lane.b32.xlu1 %v4462_v22, %s4371_s21  ;;  %956 = vmatpush1.msra.mxu0 %v757_v56  ;;  %v747_v22 = vld [vmem:[%s7717_s1 + $0x20] sm:$0xff]  ;;  %v829_v56 = vld [vmem:[%s7717_s1 + $0x2b0] sm:$0xff]  ;;  %v4816_v34 = vld [vmem:[%s7716_s0 + $0x58] sm:$0xff] }
  0x16   :  { %619 = vrot.lane.b32.xlu0 %v607_v49, %s4371_s21  ;;  %957 = vmatprep.subr.mxu0 %v756_v63  ;;  %v531_v49 = vsel %vm106_vm1, %v529_v41, %v530_v0  ;;  %v533_v63 = vsel %vm106_vm1, %v530_v0, %v532_v51  ;;  %v211_v3 = vsel %vm7728_vm3, %v208_v45, %v210_v53  ;;  %v798_v38 = vld [vmem:[%s7717_s1 + $0x1b8] sm:$0xff]  ;;  %v821_v48 = vld [vmem:[%s7717_s1 + $0x270] sm:$0xff] }
  0x17   :  { %958 = vmatpush1.msra.mxu0 %v755_v8  ;;  %1052 = vmatprep.subr.mxu1 %v832_v29  ;;  %551 = vst.msk [vmem:[#allocation2 + $0x18] sm:$0xff] %vm7729_vm4, %v531_v49  ;;  %552 = vst.msk [vmem:[#allocation2 + $0x38] sm:$0xff] %vm7729_vm4, %v533_v63  ;;  %v806_v8 = vld [vmem:[%s7717_s1 + $0x1f8] sm:$0xff]  ;;  %v800_v29 = vld [vmem:[%s7717_s1 + $0x1c8] sm:$0xff] }
  0x18   :  { %959 = vmatprep.subr.mxu0 %v754_v11  ;;  %1053 = vmatpush1.msra.mxu1 %v831_v33  ;;  %229 = vst.msk [vmem:[#allocation2 + $0x48] sm:$0xff] %vm7729_vm4, %v211_v3  ;;  %v805_v11 = vld [vmem:[%s7717_s1 + $0x1f0] sm:$0xff]  ;;  %v280_v33 = vrot.slane %v4786_v24, 1  ;;  %v822_v41 = vld [vmem:[%s7717_s1 + $0x278] sm:$0xff]  ;;  %v795_v49 = vld [vmem:[%s7717_s1 + $0x1a0] sm:$0xff] }
  0x19   :  { %74 = vrot.lane.b32.xlu1 %v62_v59, %s4370_s18  ;;  %960 = vmatpush1.msra.mxu0 %v753_v14  ;;  %v401_v59 = vsel %vm7728_vm3, %v398_v21, %v400_v31  ;;  %v608_v21 = vrot.slane %v4659_v9, 4  ;;  %v804_v14 = vld [vmem:[%s7717_s1 + $0x1e8] sm:$0xff]  ;;  %v794_v57 = vld [vmem:[%s7717_s1 + $0x198] sm:$0xff] }
  0x1a   :  { %291 = vrot.lane.b32.xlu0 %v279_v6, %s4371_s21  ;;  %961 = vmatprep.subr.mxu0 %v752_v20  ;;  %v743_v6 = vld [vmem:[%s7717_s1] sm:$0xff] }
  0x1b   :  { %962 = vmatpush1.msra.mxu0 %v751_v27  ;;  %1054 = vmatprep.subr.mxu1 %v830_v16  ;;  %v609_v15 = vsel %vm7728_vm3, %v606_v39, %v608_v21  ;;  %v803_v20 = vld [vmem:[%s7717_s1 + $0x1e0] sm:$0xff]  ;;  %v826_v39 = vld [vmem:[%s7717_s1 + $0x298] sm:$0xff]  ;;  %v801_v27 = vld [vmem:[%s7717_s1 + $0x1d0] sm:$0xff]  ;;  %v326_v16 = vrot.slane %v4786_v24, 2 }
  0x1c   :  { %963 = vmatprep.subr.mxu0 %v750_v2  ;;  %1055 = vmatpush1.msra.mxu1 %v829_v56  ;;  %v63_v2 = vrot.slane %v4699_v44, 1  ;;  %v161_v56 = vrot.slane %v4699_v44, 3 }
  0x1d   :  { %497 = vrot.lane.b32.xlu1 %v485_v18, %s4372_s11  ;;  %964 = vmatpush1.msra.mxu0 %v749_v32  ;;  %v486_v18 = vrot.slane %v4659_v9, 1 }
  0x1e   :  { %123 = vrot.lane.b32.xlu0 %v111_v25, %s4371_s21  ;;  %965 = vmatprep.subr.mxu0 %v748_v37  ;;  %v802_v25 = vld [vmem:[%s7717_s1 + $0x1d8] sm:$0xff]  ;;  %v534_v37 = vrot.slane %v4816_v34, 2  ;;  %v64_v0 = vsel %vm57_vm0, %v61_v47, %v63_v2  ;;  %v281_v47 = vsel %vm57_vm0, %v278_v50, %v280_v33  ;;  %v820_v50 = vld [vmem:[%s7717_s1 + $0x268] sm:$0xff] }
  0x1f   :  { %966 = vmatpush1.msra.mxu0 %v747_v22  ;;  %1056 = vmatprep.subr.mxu1 %v828_v30  ;;  %v487_v32 = vsel %vm57_vm0, %v484_v61, %v486_v18  ;;  %v823_v61 = vld [vmem:[%s7717_s1 + $0x280] sm:$0xff]  ;;  %v797_v22 = vld [vmem:[%s7717_s1 + $0x1b0] sm:$0xff] }
  0x20   :  { %967 = vmatprep.subr.mxu0 %v746_v5  ;;  %1057 = vmatpush1.msra.mxu1 %v827_v4  ;;  %v535_v5 = vsel %vm106_vm1, %v532_v51, %v534_v37  ;;  %v819_v51 = vld [vmem:[%s7717_s1 + $0x260] sm:$0xff] }
  0x21   :  { %337 = vrot.lane.b32.xlu1 %v325_v36, %s4372_s11  ;;  %968 = vmatpush1.msra.mxu0 %v745_v54  ;;  %v372_v36 = vrot.slane %v4786_v24, 3  ;;  %553 = vst.msk [vmem:[#allocation2 + $0x58] sm:$0xff] %vm7729_vm4, %v535_v5 }
  0x22   :  { %172 = vrot.lane.b32.xlu0 %v160_v43, %s4372_s11  ;;  %969 = vmatprep.subr.mxu0 %v744_v60  ;;  %v112_v43 = vrot.slane %v4699_v44, 2 }
  0x23   :  { %970 = vmatpush1.msra.mxu0 %v743_v6  ;;  %1058 = vmatprep.subr.mxu1 %v826_v39  ;;  %v373_v45 = vsel %vm155_vm2, %v370_v46, %v372_v36  ;;  %v796_v46 = vld [vmem:[%s7717_s1 + $0x1a8] sm:$0xff] }
  0x24   :  { %971 = vmatprep.subr.mxu0 %v806_v8  ;;  %1059 = vmatpush1.msra.mxu1 %v825_v28  ;;  %391 = vst.msk [vmem:[#allocation2 + $0x50] sm:$0xff] %vm7729_vm4, %v373_v45  ;;  %v113_v54 = vsel %vm106_vm1, %v110_v7, %v112_v43 }
  0x25   :  { %413 = vrot.lane.b32.xlu1 %v401_v59, %s4370_s18  ;;  %972 = vmatpush2.msra.mxu0 %v805_v11 }
  0x26   :  { %575 = vrot.lane.b32.xlu0 %v563_v1, %s4370_s18  ;;  %973 = vmatprep.subr.mxu0 %v804_v14 }
  0x27   :  { %974 = vmatpush2.msra.mxu0 %v803_v20  ;;  %1060 = vmatprep.subr.mxu1 %v824_v35 }
  0x28   :  { %975 = vmatprep.subr.mxu0 %v802_v25  ;;  %1061 = vmatpush1.msra.mxu1 %v823_v61 }
  0x29   :  { %453 = vrot.lane.b32.xlu1 %v4467_v23, %s4371_s21  ;;  %976 = vmatpush2.msra.mxu0 %v801_v27  ;;  %v799_v23 = vld [vmem:[%s7717_s1 + $0x1c0] sm:$0xff] }
  0x2a   :  { %621 = vrot.lane.b32.xlu0 %v609_v15, %s4371_s21  ;;  %977 = vmatprep.subr.mxu0 %v800_v29 }
  0x2b   :  { %978 = vmatpush2.msra.mxu0 %v799_v23  ;;  %1062 = vmatprep.subr.mxu1 %v822_v41 }
  0x2c   :  { %979 = vmatprep.subr.mxu0 %v798_v38  ;;  %1063 = vmatpush1.msra.mxu1 %v821_v48 }
  0x2d   :  { %247 = vrot.lane.b32.xlu1 %v4524_v42, %s4370_s18  ;;  %980 = vmatpush2.msra.mxu0 %v797_v22 }
  0x2e   :  { %499 = vrot.lane.b32.xlu0 %v487_v32, %s4372_s11 }
  0x31   :  { %76 = vrot.lane.b32.xlu1 %v64_v0, %s4370_s18 }
  0x32   :  { %293 = vrot.lane.b32.xlu0 %v281_v47, %s4371_s21 }
  0x33   :  { %8 = vsyncpa [#allocation6], 0  ;;  %v327_v58 = vsel %vm106_vm1, %v324_v19, %v326_v16  ;;  %v402_v59 = vrot.slane %v4786_v24, 4  ;;  %981 = vmatprep.subr.mxu0 %v796_v46  ;;  %1064 = vmatprep.subr.mxu1 %v820_v50  ;;  %v818_v7 = vld [vmem:[%s7717_s1 + $0x258] sm:$0xff]  ;;  %v793_v60 = vld [vmem:[%s7717_s1 + $0x190] sm:$0xff]  ;;  %vm43_vm5 = vcmask 257024   ;;  %v162_v6 = vsel %vm155_vm2, %v159_v26, %v161_v56 }
  0x34   :  { %982 = vmatpush2.msra.mxu0 %v795_v49  ;;  %1065 = vmatpush1.msra.mxu1 %v819_v51  ;;  %v817_v63 = vld [vmem:[%s7717_s1 + $0x250] sm:$0xff]  ;;  %v792_v19 = vld [vmem:[%s7717_s1 + $0x188] sm:$0xff]  ;;  %v4912_v1 = vld [vmem:[%s7716_s0 + $0x78] sm:$0xff]  ;;  %v564_v8 = vrot.slane %v4816_v34, 3  ;;  %230 = vst.msk [vmem:[#allocation2 + $0x68] sm:$0xf] %vm43_vm5, %v210_v53 }
  0x35   :  { %125 = vrot.lane.b32.xlu1 %v113_v54, %s4371_s21  ;;  %983 = vmatprep.subr.mxu0 %v794_v57  ;;  %v816_v3 = vld [vmem:[%s7717_s1 + $0x248] sm:$0xff]  ;;  %v791_v30 = vld [vmem:[%s7717_s1 + $0x180] sm:$0xff]  ;;  %44 = vst.msk [vmem:[#allocation2 + $0x60] sm:$0xf] %vm43_vm5, %v4699_v44  ;;  %48 = vst.msk [vmem:[#allocation2 + $0xe0] sm:$0xf] %vm43_vm5, %v4912_v1  ;;  %v403_v40 = vsel %vm7728_vm3, %v400_v31, %v402_v59 }
  0x36   :  { %339 = vrot.lane.b32.xlu0 %v327_v58, %s4372_s11  ;;  %1066 = vmatprep.subr.mxu1 %v818_v7  ;;  %392 = vst.msk [vmem:[#allocation2 + $0x70] sm:$0xf] %vm43_vm5, %v372_v36  ;;  %554 = vst.msk [vmem:[#allocation2 + $0x78] sm:$0xf] %vm43_vm5, %v534_v37  ;;  %v815_v26 = vld [vmem:[%s7717_s1 + $0x240] sm:$0xff]  ;;  %v790_v53 = vld [vmem:[%s7717_s1 + $0x178] sm:$0xff]  ;;  %v565_v15 = vsel %vm155_vm2, %v562_v12, %v564_v8 }
  0x37   :  { %984 = vmatpush2.msra.mxu0 %v793_v60  ;;  %1067 = vmatpush1.msra.mxu1 %v817_v63  ;;  %v814_v11 = vld [vmem:[%s7717_s1 + $0x238] sm:$0xff]  ;;  %v212_v42 = vrot.slane %v4555_v52, 4  ;;  %v213_v31 = vrot.slane %v4568_v55, 4  ;;  %v789_v4 = vld [vmem:[%s7717_s1 + $0x170] sm:$0xff]  ;;  %v610_v20 = vrot.slane %v4816_v34, 4  ;;  %v788_v25 = vld [vmem:[%s7717_s1 + $0x168] sm:$0xff] }
  0x38   :  { %985 = vmatprep.subr.mxu0 %v792_v19  ;;  %1068 = vmatprep.subr.mxu1 %v816_v3  ;;  %v813_v14 = vld [vmem:[%s7717_s1 + $0x230] sm:$0xff]  ;;  %v488_v27 = vrot.slane %v4816_v34, 1  ;;  %v812_v28 = vld [vmem:[%s7717_s1 + $0x228] sm:$0xff]  ;;  %v787_v12 = vld [vmem:[%s7717_s1 + $0x160] sm:$0xff]  ;;  %v65_v22 = vrot.slane %v4555_v52, 1  ;;  %v66_v45 = vrot.slane %v4568_v55, 1 }
  0x39   :  { %174 = vrot.lane.b32.xlu1 %v162_v6, %s4372_s11  ;;  %986 = vmatpush2.msra.mxu0 %v791_v30  ;;  %v214_v39 = vsel %vm7728_vm3, %v212_v42, %v213_v31  ;;  %v811_v29 = vld [vmem:[%s7717_s1 + $0x220] sm:$0xff]  ;;  %v786_v32 = vld [vmem:[%s7717_s1 + $0x158] sm:$0xff]  ;;  %v611_v23 = vsel %vm7728_vm3, %v608_v21, %v610_v20  ;;  %v785_v61 = vld [vmem:[%s7717_s1 + $0x150] sm:$0xff]  ;;  %v215_v19 = vrot.slane %v4588_v62, 4  ;;  %v68_v30 = vrot.slane %v4588_v62, 1  ;;  %s4374_s12 = smov 122  }
  0x3a   :  { %415 = vrot.lane.b32.xlu0 %v403_v40, %s4370_s18  ;;  %1069 = vmatpush1.msra.mxu1 %v815_v26  ;;  %231 = vst.msk [vmem:[#allocation2 + $0x88] sm:$0xff] %vm7729_vm4, %v214_v39  ;;  %v810_v35 = vld [vmem:[%s7717_s1 + $0x218] sm:$0xff]  ;;  %v489_v36 = vsel %vm57_vm0, %v486_v18, %v488_v27  ;;  %v809_v37 = vld [vmem:[%s7717_s1 + $0x210] sm:$0xff]  ;;  %v784_v21 = vld [vmem:[%s7717_s1 + $0x148] sm:$0xff]  ;;  %v67_v54 = vsel %vm57_vm0, %v65_v22, %v66_v45  ;;  %vm96_vm6 = vcmask 523520   ;;  %vm145_vm7 = vcmask 785920  }
  0x3b   :  { %987 = vmatprep.subr.mxu0 %v790_v53  ;;  %1070 = vmatprep.subr.mxu1 %v814_v11  ;;  %v808_v38 = vld [vmem:[%s7717_s1 + $0x208] sm:$0xff]  ;;  %v807_v18 = vld [vmem:[%s7717_s1 + $0x200] sm:$0xff]  ;;  %v782_v41 = vld [vmem:[%s7717_s1 + $0x138] sm:$0xff]  ;;  %vm194_vm8 = vcmask 1048320   ;;  %vm924_vm9 = vcmask 785408   ;;  %vm100_vm10 = vcmask 519424  }
  0x3c   :  { %988 = vmatpush2.msra.mxu0 %v789_v4  ;;  %1071 = vmatpush1.msra.mxu1 %v813_v14  ;;  %v5025_v0 = vld [vmem:[%s7716_s0 + $0x80] sm:$0xff]  ;;  %v862_v5 = vld [vmem:[%s7717_s1 + $0x3b8] sm:$0xff]  ;;  %v5035_v47 = vld [vmem:[%s7716_s0 + $0x88] sm:$0xff]  ;;  %v69_v4 = vsel %vm57_vm0, %v66_v45, %v68_v30  ;;  %v114_v14 = vrot.slane %v4555_v52, 2  ;;  %vm149_vm11 = vcmask 781824   ;;  %vm198_vm12 = vcmask 1044224  }
  0x3d   :  { %577 = vrot.lane.b32.xlu1 %v565_v15, %s4370_s18  ;;  %989 = vmatprep.subr.mxu0 %v788_v25  ;;  %v781_v48 = vld [vmem:[%s7717_s1 + $0x130] sm:$0xff]  ;;  %v780_v50 = vld [vmem:[%s7717_s1 + $0x128] sm:$0xff]  ;;  %v779_v51 = vld [vmem:[%s7717_s1 + $0x120] sm:$0xff]  ;;  %v282_v57 = vrot.slane %v5025_v0, 1  ;;  %v283_v58 = vrot.slane %v5035_v47, 1  ;;  %v115_v15 = vrot.slane %v4568_v55, 2 }
  0x3e   :  { %455 = vrot.lane.b32.xlu0 %v4659_v9, %s4371_s21  ;;  %1072 = vmatprep.subr.mxu1 %v812_v28  ;;  %v783_v9 = vld [vmem:[%s7717_s1 + $0x140] sm:$0xff]  ;;  %v861_v46 = vld [vmem:[%s7717_s1 + $0x3b0] sm:$0xff]  ;;  %v860_v49 = vld [vmem:[%s7717_s1 + $0x3a8] sm:$0xff]  ;;  %vm1559_vm13 = vcmask 998400   ;;  %vm1824_vm14 = vcmask 1041409   ;;  %vm1826_vm15 = vcmask 1042434  }
  0x3f   :  { %990 = vmatpush2.msra.mxu0 %v787_v12  ;;  %1073 = vmatpush1.msra.mxu1 %v811_v29  ;;  %v859_v7 = vld [vmem:[%s7717_s1 + $0x3a0] sm:$0xff]  ;;  %v778_v60 = vld [vmem:[%s7717_s1 + $0x118] sm:$0xff]  ;;  %v777_v3 = vld [vmem:[%s7717_s1 + $0x110] sm:$0xff]  ;;  %v284_v26 = vsel %vm57_vm0, %v282_v57, %v283_v58  ;;  %v116_v55 = vsel %vm106_vm1, %v114_v14, %v115_v15  ;;  %v328_v12 = vrot.slane %v5025_v0, 2  ;;  %v329_v29 = vrot.slane %v5035_v47, 2  ;;  %s4375_s27 = smov 34  }
  0x40   :  { %991 = vmatprep.subr.mxu0 %v786_v32  ;;  %1074 = vmatprep.subr.mxu1 %v810_v35  ;;  %v858_v63 = vld [vmem:[%s7717_s1 + $0x398] sm:$0xff]  ;;  %v857_v6 = vld [vmem:[%s7717_s1 + $0x390] sm:$0xff]  ;;  %v776_v40 = vld [vmem:[%s7717_s1 + $0x108] sm:$0xff]  ;;  %s4376_s24 = smov 68   ;;  %s4377_s25 = smov 102  }
  0x41   :  { %623 = vrot.lane.b32.xlu1 %v611_v23, %s4371_s21  ;;  %992 = vmatpush2.msra.mxu0 %v785_v61  ;;  %v856_v53 = vld [vmem:[%s7717_s1 + $0x388] sm:$0xff]  ;;  %v775_v11 = vld [vmem:[%s7717_s1 + $0x100] sm:$0xff]  ;;  %v850_v52 = vld [vmem:[%s7717_s1 + $0x358] sm:$0xff]  ;;  %v117_v23 = vrot.slane %v4588_v62, 2  ;;  %s4378_s7 = smov 8   ;;  %s4380_s8 = smov 112  }
  0x42   :  { %501 = vrot.lane.b32.xlu0 %v489_v36, %s4372_s11  ;;  %1075 = vmatpush1.msra.mxu1 %v809_v37  ;;  %v855_v42 = vld [vmem:[%s7717_s1 + $0x380] sm:$0xff]  ;;  %v852_v25 = vld [vmem:[%s7717_s1 + $0x368] sm:$0xff]  ;;  %v849_v28 = vld [vmem:[%s7717_s1 + $0x350] sm:$0xff]  ;;  %v330_v36 = vsel %vm106_vm1, %v328_v12, %v329_v29  ;;  %s4382_s4 = smov 48  }
  0x43   :  { %993 = vmatprep.subr.mxu0 %v784_v21  ;;  %1076 = vmatprep.subr.mxu1 %v808_v38  ;;  %v851_v39 = vld [vmem:[%s7717_s1 + $0x360] sm:$0xff]  ;;  %v848_v32 = vld [vmem:[%s7717_s1 + $0x348] sm:$0xff]  ;;  %v846_v35 = vld [vmem:[%s7717_s1 + $0x338] sm:$0xff]  ;;  %v118_v22 = vsel %vm106_vm1, %v115_v15, %v117_v23 }
  0x44   :  { %994 = vmatpush2.msra.mxu0 %v783_v9  ;;  %1077 = vmatpush1.msra.mxu1 %v807_v18  ;;  %v845_v61 = vld [vmem:[%s7717_s1 + $0x330] sm:$0xff]  ;;  %v844_v37 = vld [vmem:[%s7717_s1 + $0x328] sm:$0xff]  ;;  %v843_v38 = vld [vmem:[%s7717_s1 + $0x320] sm:$0xff]  ;;  %v374_v9 = vrot.slane %v5025_v0, 3  ;;  %v375_v18 = vrot.slane %v5035_v47, 3 }
  0x45   :  { %249 = vrot.lane.b32.xlu1 %v4786_v24, %s4370_s18  ;;  %995 = vmatprep.subr.mxu0 %v782_v41  ;;  %v5160_v21 = vld [vmem:[%s7716_s0 + $0x90] sm:$0xff]  ;;  %v842_v41 = vld [vmem:[%s7717_s1 + $0x318] sm:$0xff] }
  0x46   :  { %251 = vrot.lane.b32.xlu0 %v5025_v0, %s4370_s18  ;;  %1086 = vmatprep.subr.mxu1 %v862_v5  ;;  %v841_v45 = vld [vmem:[%s7717_s1 + $0x310] sm:$0xff]  ;;  %v376_v5 = vsel %vm155_vm2, %v374_v9, %v375_v18 }
  0x47   :  { %996 = vmatpush2.msra.mxu0 %v781_v48  ;;  %1087 = vmatpush2.msra.mxu1 %v861_v46  ;;  %v5185_v48 = vld [vmem:[%s7716_s0 + $0xa0] sm:$0xff]  ;;  %v5190_v46 = vld [vmem:[%s7716_s0 + $0xa8] sm:$0xff]  ;;  %393 = vst.msk [vmem:[#allocation2 + $0x90] sm:$0xff] %vm7729_vm4, %v376_v5  ;;  %v168_v5 = vrot.slane %v4912_v1, 3 }
  0x48   :  { %997 = vmatprep.subr.mxu0 %v780_v50  ;;  %1088 = vmatprep.subr.mxu1 %v860_v49  ;;  %v840_v50 = vld [vmem:[%s7717_s1 + $0x308] sm:$0xff]  ;;  %v839_v49 = vld [vmem:[%s7717_s1 + $0x300] sm:$0xff]  ;;  %v490_v14 = vrot.slane %v5185_v48, 1  ;;  %v491_v15 = vrot.slane %v5190_v46, 1 }
  0x49   :  { %78 = vrot.lane.b32.xlu1 %v63_v2, %s4370_s18  ;;  %998 = vmatpush2.msra.mxu0 %v779_v51  ;;  %v216_v2 = vsel %vm7728_vm3, %v213_v31, %v215_v19  ;;  %v854_v31 = vld [vmem:[%s7717_s1 + $0x378] sm:$0xff]  ;;  %v536_v51 = vrot.slane %v5185_v48, 2 }
  0x4a   :  { %80 = vrot.lane.b32.xlu0 %v67_v54, %s4370_s18  ;;  %1089 = vmatpush2.msra.mxu1 %v859_v7  ;;  %232 = vst.msk [vmem:[#allocation2 + $0xa8] sm:$0xff] %vm7729_vm4, %v216_v2  ;;  %v537_v54 = vrot.slane %v5190_v46, 2 }
  0x4b   :  { %999 = vmatprep.subr.mxu0 %v778_v60  ;;  %1090 = vmatprep.subr.mxu1 %v858_v63  ;;  %v404_v60 = vrot.slane %v5025_v0, 4  ;;  %v405_v63 = vrot.slane %v5035_v47, 4  ;;  %v566_v0 = vrot.slane %v5185_v48, 3 }
  0x4c   :  { %1000 = vmatpush2.msra.mxu0 %v777_v3  ;;  %1091 = vmatpush2.msra.mxu1 %v857_v6  ;;  %v538_v57 = vsel %vm106_vm1, %v536_v51, %v537_v54  ;;  %v377_v3 = vrot.slane %v5160_v21, 3  ;;  %v331_v6 = vrot.slane %v5160_v21, 2 }
  0x4d   :  { %295 = vrot.lane.b32.xlu1 %v280_v33, %s4371_s21  ;;  %1001 = vmatprep.subr.mxu0 %v776_v40  ;;  %v853_v33 = vld [vmem:[%s7717_s1 + $0x370] sm:$0xff]  ;;  %555 = vst.msk [vmem:[#allocation2 + $0x98] sm:$0xff] %vm7729_vm4, %v538_v57  ;;  %v407_v40 = vrot.slane %v5160_v21, 4  ;;  %v169_v57 = vsel %vm155_vm2, %v166_v10, %v168_v5 }
  0x4e   :  { %297 = vrot.lane.b32.xlu0 %v284_v26, %s4371_s21  ;;  %1092 = vmatprep.subr.mxu1 %v856_v53  ;;  %v378_v44 = vsel %vm155_vm2, %v375_v18, %v377_v3  ;;  %v332_v24 = vsel %vm106_vm1, %v329_v29, %v331_v6 }
  0x4f   :  { %1002 = vmatpush2.msra.mxu0 %v775_v11  ;;  %1093 = vmatpush2.msra.mxu1 %v855_v42  ;;  %394 = vst.msk [vmem:[#allocation2 + $0xb0] sm:$0xff] %vm7729_vm4, %v378_v44  ;;  %v217_v11 = vrot.slane %v4912_v1, 4 }
  0x50   :  { %1094 = vmatprep.subr.mxu1 %v854_v31 }
  0x51   :  { %82 = vrot.lane.b32.xlu1 %v69_v4, %s4370_s18  ;;  %1095 = vmatpush2.msra.mxu1 %v853_v33  ;;  %v218_v31 = vsel %vm7728_vm3, %v215_v19, %v217_v11  ;;  %234 = vst.msk [vmem:[#allocation2 + $0xe8] sm:$0xf] %vm43_vm5, %v217_v11 }
  0x52   :  { %127 = vrot.lane.b32.xlu0 %v112_v43, %s4371_s21  ;;  %1096 = vmatprep.subr.mxu1 %v852_v25  ;;  %v847_v43 = vld [vmem:[%s7717_s1 + $0x340] sm:$0xff]  ;;  %233 = vst.msk [vmem:[#allocation2 + $0xc8] sm:$0xff] %vm7729_vm4, %v218_v31  ;;  %v492_v25 = vsel %vm57_vm0, %v490_v14, %v491_v15 }
  0x53   :  { %1097 = vmatpush2.msra.mxu1 %v851_v39  ;;  %v70_v39 = vrot.slane %v4912_v1, 1 }
  0x54   :  { %1098 = vmatprep.subr.mxu1 %v850_v52 }
  0x55   :  { %129 = vrot.lane.b32.xlu1 %v116_v55, %s4371_s21  ;;  %1099 = vmatpush2.msra.mxu1 %v849_v28  ;;  %v71_v12 = vsel %vm57_vm0, %v68_v30, %v70_v39 }
  0x56   :  { %253 = vrot.lane.b32.xlu0 %v5035_v47, %s4370_s18  ;;  %1100 = vmatprep.subr.mxu1 %v848_v32  ;;  %v613_v47 = vrot.slane %v5190_v46, 4 }
  0x57   :  { %1101 = vmatpush2.msra.mxu1 %v847_v43 }
  0x58   :  { %1102 = vmatprep.subr.mxu1 %v846_v35  ;;  %v119_v35 = vrot.slane %v4912_v1, 2 }
  0x59   :  { %341 = vrot.lane.b32.xlu1 %v326_v16, %s4372_s11  ;;  %1103 = vmatpush2.msra.mxu1 %v845_v61  ;;  %v285_v16 = vrot.slane %v5160_v21, 1 }
  0x5a   :  { %343 = vrot.lane.b32.xlu0 %v330_v36, %s4372_s11  ;;  %1104 = vmatprep.subr.mxu1 %v844_v37 }
  0x5b   :  { %1105 = vmatpush2.msra.mxu1 %v843_v38  ;;  %v286_v7 = vsel %vm57_vm0, %v283_v58, %v285_v16  ;;  %v567_v58 = vrot.slane %v5190_v46, 3 }
  0x5c   :  { %1106 = vmatprep.subr.mxu1 %v842_v41 }
  0x5d   :  { %131 = vrot.lane.b32.xlu1 %v118_v22, %s4371_s21  ;;  %1107 = vmatpush2.msra.mxu1 %v841_v45  ;;  %v120_v45 = vsel %vm106_vm1, %v117_v23, %v119_v35 }
  0x5e   :  { %176 = vrot.lane.b32.xlu0 %v161_v56, %s4372_s11  ;;  %1108 = vmatprep.subr.mxu1 %v840_v50  ;;  %v406_v56 = vsel %vm7728_vm3, %v404_v60, %v405_v63 }
  0x5f   :  { %1109 = vmatpush2.msra.mxu1 %v839_v49 }
  0x61   :  { %178 = vrot.lane.b32.xlu1 %v4608_v13, %s4372_s11  ;;  %v568_v13 = vsel %vm155_vm2, %v566_v0, %v567_v58 }
  0x62   :  { %299 = vrot.lane.b32.xlu0 %v286_v7, %s4371_s21 }
  0x65   :  { %417 = vrot.lane.b32.xlu1 %v402_v59, %s4370_s18  ;;  %v408_v59 = vsel %vm7728_vm3, %v405_v63, %v407_v40 }
  0x66   :  { %419 = vrot.lane.b32.xlu0 %v406_v56, %s4370_s18 }
  0x69   :  { %579 = vrot.lane.b32.xlu1 %v564_v8, %s4370_s18  ;;  %v5250_v8 = vld [vmem:[%s7716_s0 + $0xb0] sm:$0xff] }
  0x6a   :  { %581 = vrot.lane.b32.xlu0 %v568_v13, %s4370_s18  ;;  %v539_v2 = vrot.slane %v5250_v8, 2  ;;  %v493_v29 = vrot.slane %v5250_v8, 1 }
  0x6c   :  { %v540_v26 = vsel %vm106_vm1, %v537_v54, %v539_v2  ;;  %v494_v30 = vsel %vm57_vm0, %v491_v15, %v493_v29 }
  0x6d   :  { %180 = vrot.lane.b32.xlu1 %v4623_v17, %s4372_s11  ;;  %v612_v17 = vrot.slane %v5185_v48, 4  ;;  %556 = vst.msk [vmem:[#allocation2 + $0xb8] sm:$0xff] %vm7729_vm4, %v540_v26 }
  0x6e   :  { %345 = vrot.lane.b32.xlu0 %v332_v24, %s4372_s11 }
  0x6f   :  { %v614_v42 = vsel %vm7728_vm3, %v612_v17, %v613_v47 }
  0x71   :  { %421 = vrot.lane.b32.xlu1 %v408_v59, %s4370_s18 }
  0x72   :  { %457 = vrot.lane.b32.xlu0 %v4816_v34, %s4371_s21  ;;  %v615_v34 = vrot.slane %v5250_v8, 4 }
  0x74   :  { %v244_v53 = vpop.permute.xlu0 %243  ;;  %v616_v9 = vsel %vm7728_vm3, %v613_v47, %v615_v34 }
  0x75   :  { %267 = vst.msk [vmem:[#allocation2 + $0x8] sm:$0xff] %vm96_vm6, %v244_v53  ;;  %459 = vrot.lane.b32.xlu1 %v5185_v48, %s4371_s21  ;;  %v5338_v48 = vld [vmem:[%s7716_s0 + $0xb8] sm:$0xff] }
  0x76   :  { %625 = vrot.lane.b32.xlu0 %v610_v20, %s4371_s21  ;;  %v569_v20 = vrot.slane %v5250_v8, 3  ;;  %v541_v50 = vrot.slane %v5338_v48, 2  ;;  %v571_v63 = vrot.slane %v5338_v48, 3  ;;  %v495_v56 = vrot.slane %v5338_v48, 1 }
  0x77   :  { %v290_v4 = vpop.permute.xlu1 %289 }
  0x78   :  { %313 = vst.msk [vmem:[#allocation2 + $0x8] sm:$0xff] %vm145_vm7, %v290_v4  ;;  %v73_v33 = vpop.permute.xlu0 %72  ;;  %v570_v55 = vsel %vm155_vm2, %v567_v58, %v569_v20  ;;  %v542_v51 = vsel %vm106_vm1, %v539_v2, %v541_v50  ;;  %v617_v58 = vrot.slane %v5338_v48, 4 }
  0x79   :  { %97 = vst.msk [vmem:[#allocation2] sm:$0xff] %vm96_vm6, %v73_v33  ;;  %627 = vrot.lane.b32.xlu1 %v614_v42, %s4371_s21 }
  0x7a   :  { %461 = vrot.lane.b32.xlu0 %v5190_v46, %s4371_s21  ;;  %558 = vst.msk [vmem:[#allocation2 + $0xf8] sm:$0xf] %vm43_vm5, %v541_v50  ;;  %v618_v59 = vsel %vm7728_vm3, %v615_v34, %v617_v58 }
  0x7b   :  { %v122_v19 = vpop.permute.xlu1 %121  ;;  %557 = vst.msk [vmem:[#allocation2 + $0xd8] sm:$0xff] %vm7729_vm4, %v542_v51 }
  0x7c   :  { %146 = vst.msk [vmem:[#allocation2] sm:$0xff] %vm145_vm7, %v122_v19  ;;  %v336_v52 = vpop.permute.xlu0 %335 }
  0x7d   :  { %359 = vst.msk [vmem:[#allocation2 + $0x8] sm:$0xff] %vm194_vm8, %v336_v52  ;;  %503 = vrot.lane.b32.xlu1 %v488_v27, %s4372_s11  ;;  %v5308_v27 = vld [vmem:[%s7716_s0 + $0x98] sm:$0xff]  ;;  %s4381_s0 = smov 16  }
  0x7e   :  { %505 = vrot.lane.b32.xlu0 %v492_v25, %s4372_s11  ;;  %v379_v61 = vrot.slane %v5308_v27, 3  ;;  %v287_v18 = vrot.slane %v5308_v27, 1  ;;  %v333_v49 = vrot.slane %v5308_v27, 2  ;;  %v409_v7 = vrot.slane %v5308_v27, 4 }
  0x7f   :  { %v171_v28 = vpop.permute.xlu1 %170 }
  0x80   :  { %195 = vst.msk [vmem:[#allocation2] sm:$0xff] %vm194_vm8, %v171_v28  ;;  %v412_v32 = vpop.permute.xlu0 %411  ;;  %v380_v38 = vsel %vm155_vm2, %v377_v3, %v379_v61  ;;  %v288_v23 = vsel %vm57_vm0, %v285_v16, %v287_v18  ;;  %v334_v62 = vsel %vm106_vm1, %v331_v6, %v333_v49  ;;  %v410_v60 = vsel %vm7728_vm3, %v407_v40, %v409_v7 }
  0x81   :  { %435 = vst.msk [vmem:[#allocation2 + $0x10] sm:$0xff] %vm96_vm6, %v412_v32  ;;  %583 = vrot.lane.b32.xlu1 %v570_v55, %s4370_s18  ;;  %v496_v6 = vsel %vm57_vm0, %v493_v29, %v495_v56  ;;  %vm1828_vm0 = vcmask 1043459   ;;  %vm1830_vm1 = vcmask 1044484   ;;  %vm2151_vm3 = vcmask 58368  }
  0x82   :  { %84 = vrot.lane.b32.xlu0 %v71_v12, %s4370_s18  ;;  %396 = vst.msk [vmem:[#allocation2 + $0xf0] sm:$0xf] %vm43_vm5, %v379_v61  ;;  %vm1834_vm5 = vcmask 1046534  }
  0x83   :  { %v574_v43 = vpop.permute.xlu1 %573  ;;  %395 = vst.msk [vmem:[#allocation2 + $0xd0] sm:$0xff] %vm7729_vm4, %v380_v38  ;;  %vm2241_vm4 = vcmask 1041472  }
  0x84   :  { %597 = vst.msk [vmem:[#allocation2 + $0x18] sm:$0xff] %vm96_vm6, %v574_v43  ;;  %v246_v36 = vpop.permute.xlu0 %245  ;;  %v652_v37 = vld [vmem:[#allocation2 + $0x8] sm:$0xff] }
  0x85   :  { %268 = vst.msk [vmem:[#allocation2 + $0x28] sm:$0xff] %vm96_vm6, %v246_v36  ;;  %255 = vrot.lane.b32.xlu1 %v5160_v21, %s4370_s18  ;;  %1003 = vmatprep.mubr.f32.mxu0 %v652_v37  ;;  %v572_v21 = vsel %vm155_vm2, %v569_v20, %v571_v63  ;;  %vm1832_vm2 = vcmask 1045509  }
  0x86   :  { %507 = vrot.lane.b32.xlu0 %v494_v30, %s4372_s11 }
  0x87   :  { %v452_v41 = vpop.permute.xlu1 %451  ;;  %v651_v22 = vld [vmem:[#allocation2] sm:$0xff] }
  0x88   :  { %475 = vst.msk [vmem:[#allocation2 + $0x10] sm:$0xff] %vm145_vm7, %v452_v41  ;;  %v620_v46 = vpop.permute.xlu0 %619  ;;  %1004 = vmatmul.mubr.f32.vlgmr.msra.gmra.mxu0 %v651_v22 }
  0x89   :  { %643 = vst.msk [vmem:[#allocation2 + $0x18] sm:$0xff] %vm145_vm7, %v620_v46  ;;  %629 = vrot.lane.b32.xlu1 %v616_v9, %s4371_s21 }
  0x8a   :  { %133 = vrot.lane.b32.xlu0 %v120_v45, %s4371_s21 }
  0x8b   :  { %v75_v54 = vpop.permute.xlu1 %74 }
  0x8c   :  { %98 = vst.msk [vmem:[#allocation2 + $0x20] sm:$0xff] %vm96_vm6, %v75_v54  ;;  %v292_v16 = vpop.permute.xlu0 %291 }
  0x8d   :  { %314 = vst.msk [vmem:[#allocation2 + $0x28] sm:$0xff] %vm145_vm7, %v292_v16  ;;  %301 = vrot.lane.b32.xlu1 %v288_v23, %s4371_s21 }
  0x8e   :  { %182 = vrot.lane.b32.xlu0 %v169_v57, %s4372_s11 }
  0x8f   :  { %v498_v10 = vpop.permute.xlu1 %497 }
  0x90   :  { %521 = vst.msk [vmem:[#allocation2 + $0x10] sm:$0xff] %vm194_vm8, %v498_v10  ;;  %v124_v3 = vpop.permute.xlu0 %123  ;;  %v654_v44 = vld [vmem:[#allocation2 + $0x18] sm:$0xff] }
  0x91   :  { %147 = vst.msk [vmem:[#allocation2 + $0x20] sm:$0xff] %vm145_vm7, %v124_v3  ;;  %347 = vrot.lane.b32.xlu1 %v334_v62, %s4372_s11  ;;  %4087 = vmatprep.mubr.msk.f32.mxu1 %vm924_vm9, %v654_v44 }
  0x92   :  { %423 = vrot.lane.b32.xlu0 %v410_v60, %s4370_s18 }
  0x93   :  { %v338_v0 = vpop.permute.xlu1 %337 }
  0x94   :  { %360 = vst.msk [vmem:[#allocation2 + $0x28] sm:$0xff] %vm194_vm8, %v338_v0  ;;  %v173_v13 = vpop.permute.xlu0 %172 }
  0x95   :  { %196 = vst.msk [vmem:[#allocation2 + $0x20] sm:$0xff] %vm194_vm8, %v173_v13  ;;  %463 = vrot.lane.b32.xlu1 %v5250_v8, %s4371_s21 }
  0x96   :  { %585 = vrot.lane.b32.xlu0 %v572_v21, %s4370_s18 }
  0x97   :  { %v414_v40 = vpop.permute.xlu1 %413  ;;  %v653_v24 = vld [vmem:[#allocation2 + $0x10] sm:$0xff] }
  0x98   :  { %436 = vst.msk [vmem:[#allocation2 + $0x30] sm:$0xff] %vm96_vm6, %v414_v40  ;;  %1111 = vmatmul.mubr.f32.vlgmr.msra.gmra.mxu1 %v653_v24  ;;  %v576_v2 = vpop.permute.xlu0 %575 }
  0x99   :  { %598 = vst.msk [vmem:[#allocation2 + $0x38] sm:$0xff] %vm96_vm6, %v576_v2  ;;  %509 = vrot.lane.b32.xlu1 %v496_v6, %s4372_s11 }
  0x9a   :  { %631 = vrot.lane.b32.xlu0 %v618_v59, %s4371_s21 }
  0x9b   :  { %v454_v17 = vpop.permute.xlu1 %453  ;;  %v656_v47 = vld [vmem:[#allocation2 + $0x28] sm:$0xff] }
  0x9c   :  { %476 = vst.msk [vmem:[#allocation2 + $0x30] sm:$0xff] %vm145_vm7, %v454_v17  ;;  %v622_v26 = vpop.permute.xlu0 %621  ;;  %1009 = vmatprep.mubr.f32.mxu0 %v656_v47  ;;  %v655_v53 = vld [vmem:[#allocation2 + $0x20] sm:$0xff] }
  0x9d   :  { %644 = vst.msk [vmem:[#allocation2 + $0x38] sm:$0xff] %vm145_vm7, %v622_v26  ;;  %86 = vrot.lane.b32.xlu1 %v70_v39, %s4370_s18  ;;  %1010 = vmatmul.mubr.f32.gmra.mxu0 %v655_v53 }
  0x9e   :  { %257 = vrot.lane.b32.xlu0 %v5308_v27, %s4370_s18 }
  0x9f   :  { %v248_v8 = vpop.permute.xlu1 %247 }
  0xa0   :  { %269 = vst.msk [vmem:[#allocation2 + $0x48] sm:$0xff] %vm96_vm6, %v248_v8  ;;  %v500_v11 = vpop.permute.xlu0 %499 }
  0xa1   :  { %522 = vst.msk [vmem:[#allocation2 + $0x30] sm:$0xff] %vm194_vm8, %v500_v11  ;;  %135 = vrot.lane.b32.xlu1 %v119_v35, %s4371_s21 }
  0xa2   :  { %303 = vrot.lane.b32.xlu0 %v287_v18, %s4371_s21 }
  0xa3   :  { %v77_v42 = vpop.permute.xlu1 %76 }
  0xa4   :  { %99 = vst.msk [vmem:[#allocation2 + $0x40] sm:$0xff] %vm96_vm6, %v77_v42  ;;  %v294_v31 = vpop.permute.xlu0 %293  ;;  %v658_v4 = vld [vmem:[#allocation2 + $0x38] sm:$0xff] }
  0xa5   :  { %315 = vst.msk [vmem:[#allocation2 + $0x48] sm:$0xff] %vm145_vm7, %v294_v31  ;;  %184 = vrot.lane.b32.xlu1 %v168_v5, %s4372_s11  ;;  %4088 = vmatprep.mubr.msk.f32.mxu1 %vm924_vm9, %v658_v4 }
  0xa6   :  { %349 = vrot.lane.b32.xlu0 %v333_v49, %s4372_s11 }
  0xa7   :  { %v126_v14 = vpop.permute.xlu1 %125 }
  0xa8   :  { %148 = vst.msk [vmem:[#allocation2 + $0x40] sm:$0xff] %vm145_vm7, %v126_v14  ;;  %v340_v15 = vpop.permute.xlu0 %339  ;;  %v657_v33 = vld [vmem:[#allocation2 + $0x30] sm:$0xff] }
  0xa9   :  { %361 = vst.msk [vmem:[#allocation2 + $0x48] sm:$0xff] %vm194_vm8, %v340_v15  ;;  %425 = vrot.lane.b32.xlu1 %v409_v7, %s4370_s18  ;;  %1117 = vmatmul.mubr.f32.gmra.mxu1 %v657_v33 }
  0xaa   :  { %465 = vrot.lane.b32.xlu0 %v5338_v48, %s4371_s21 }
  0xab   :  { %v175_v1 = vpop.permute.xlu1 %174 }
  0xac   :  { %197 = vst.msk [vmem:[#allocation2 + $0x40] sm:$0xff] %vm194_vm8, %v175_v1  ;;  %v416_v20 = vpop.permute.xlu0 %415 }
  0xad   :  { %437 = vst.msk [vmem:[#allocation2 + $0x50] sm:$0xff] %vm96_vm6, %v416_v20  ;;  %587 = vrot.lane.b32.xlu1 %v571_v63, %s4370_s18 }
  0xae   :  { %511 = vrot.lane.b32.xlu0 %v495_v56, %s4372_s11 }
  0xaf   :  { %v578_v19 = vpop.permute.xlu1 %577 }
  0xb0   :  { %599 = vst.msk [vmem:[#allocation2 + $0x58] sm:$0xff] %vm96_vm6, %v578_v19  ;;  %v456_v25 = vpop.permute.xlu0 %455  ;;  %v660_v39 = vld [vmem:[#allocation2 + $0x48] sm:$0xff] }
  0xb1   :  { %477 = vst.msk [vmem:[#allocation2 + $0x50] sm:$0xff] %vm145_vm7, %v456_v25  ;;  %633 = vrot.lane.b32.xlu1 %v617_v58, %s4371_s21  ;;  %1015 = vmatprep.mubr.f32.mxu0 %v660_v39 }
  0xb3   :  { %v624_v52 = vpop.permute.xlu1 %623  ;;  %v659_v55 = vld [vmem:[#allocation2 + $0x40] sm:$0xff] }
  0xb4   :  { %645 = vst.msk [vmem:[#allocation2 + $0x58] sm:$0xff] %vm145_vm7, %v624_v52  ;;  %v502_v28 = vpop.permute.xlu0 %501  ;;  %1016 = vmatmul.mubr.f32.gmra.mxu0 %v659_v55 }
  0xb5   :  { %523 = vst.msk [vmem:[#allocation2 + $0x50] sm:$0xff] %vm194_vm8, %v502_v28 }
  0xb7   :  { %v250_v12 = vpop.permute.xlu1 %249 }
  0xb8   :  { %270 = vst.msk [vmem:[#allocation2 + $0x68] sm:$0xf] %vm100_vm10, %v250_v12  ;;  %v252_v29 = vpop.permute.xlu0 %251 }
  0xb9   :  { %271 = vst.msk [vmem:[#allocation2 + $0x88] sm:$0xff] %vm96_vm6, %v252_v29 }
  0xbb   :  { %v79_v32 = vpop.permute.xlu1 %78  ;;  %v662_v34 = vld [vmem:[#allocation2 + $0x58] sm:$0xff] }
  0xbc   :  { %101 = vst.msk [vmem:[#allocation2 + $0x60] sm:$0xf] %vm100_vm10, %v79_v32  ;;  %4089 = vmatprep.mubr.msk.f32.mxu1 %vm924_vm9, %v662_v34  ;;  %v81_v27 = vpop.permute.xlu0 %80  ;;  %v661_v43 = vld [vmem:[#allocation2 + $0x50] sm:$0xff] }
  0xbd   :  { %102 = vst.msk [vmem:[#allocation2 + $0x80] sm:$0xff] %vm96_vm6, %v81_v27  ;;  %1123 = vmatmul.mubr.f32.gmra.mxu1 %v661_v43 }
  0xbf   :  { %v296_v30 = vpop.permute.xlu1 %295 }
  0xc0   :  { %316 = vst.msk [vmem:[#allocation2 + $0x68] sm:$0xf] %vm149_vm11, %v296_v30  ;;  %v298_v35 = vpop.permute.xlu0 %297 }
  0xc1   :  { %317 = vst.msk [vmem:[#allocation2 + $0x88] sm:$0xff] %vm145_vm7, %v298_v35 }
  0xc3   :  { %v83_v61 = vpop.permute.xlu1 %82 }
  0xc4   :  { %103 = vst.msk [vmem:[#allocation2 + $0xa0] sm:$0xff] %vm96_vm6, %v83_v61  ;;  %v128_v36 = vpop.permute.xlu0 %127 }
  0xc5   :  { %150 = vst.msk [vmem:[#allocation2 + $0x60] sm:$0xf] %vm149_vm11, %v128_v36 }
  0xc7   :  { %v130_v37 = vpop.permute.xlu1 %129 }
  0xc8   :  { %151 = vst.msk [vmem:[#allocation2 + $0x80] sm:$0xff] %vm145_vm7, %v130_v37  ;;  %v254_v38 = vpop.permute.xlu0 %253 }
  0xc9   :  { %272 = vst.msk [vmem:[#allocation2 + $0xa8] sm:$0xff] %vm96_vm6, %v254_v38 }
  0xcb   :  { %v342_v9 = vpop.permute.xlu1 %341 }
  0xcc   :  { %362 = vst.msk [vmem:[#allocation2 + $0x68] sm:$0xf] %vm198_vm12, %v342_v9  ;;  %v344_v18 = vpop.permute.xlu0 %343 }
  0xcd   :  { %363 = vst.msk [vmem:[#allocation2 + $0x88] sm:$0xff] %vm194_vm8, %v344_v18 }
  0xcf   :  { %v132_v41 = vpop.permute.xlu1 %131 }
  0xd0   :  { %152 = vst.msk [vmem:[#allocation2 + $0xa0] sm:$0xff] %vm145_vm7, %v132_v41  ;;  %v177_v22 = vpop.permute.xlu0 %176 }
  0xd1   :  { %199 = vst.msk [vmem:[#allocation2 + $0x60] sm:$0xf] %vm198_vm12, %v177_v22 }
  0xd3   :  { %v179_v45 = vpop.permute.xlu1 %178  ;;  %v664_v5 = vld [vmem:[#allocation2 + $0x68] sm:$0xf] }
  0xd4   :  { %200 = vst.msk [vmem:[#allocation2 + $0x80] sm:$0xff] %vm194_vm8, %v179_v45  ;;  %v300_v48 = vpop.permute.xlu0 %299  ;;  %v668_v46 = vld [vmem:[#allocation2 + $0x88] sm:$0xff] }
  0xd5   :  { %318 = vst.msk [vmem:[#allocation2 + $0xa8] sm:$0xff] %vm145_vm7, %v300_v48  ;;  %v4072_v50 = vcombine.low %v664_v5, %v668_v46 }
  0xd7   :  { %v418_v23 = vpop.permute.xlu1 %417  ;;  %1021 = vmatprep.mubr.f32.mxu0 %v4072_v50 }
  0xd8   :  { %438 = vst.msk [vmem:[#allocation2 + $0x70] sm:$0xf] %vm100_vm10, %v418_v23  ;;  %v420_v49 = vpop.permute.xlu0 %419  ;;  %v663_v51 = vld [vmem:[#allocation2 + $0x60] sm:$0xf] }
  0xd9   :  { %439 = vst.msk [vmem:[#allocation2 + $0x90] sm:$0xff] %vm96_vm6, %v420_v49 }
  0xdb   :  { %v580_v54 = vpop.permute.xlu1 %579  ;;  %v667_v57 = vld [vmem:[#allocation2 + $0x80] sm:$0xff] }
  0xdc   :  { %600 = vst.msk [vmem:[#allocation2 + $0x78] sm:$0xf] %vm100_vm10, %v580_v54  ;;  %v582_v7 = vpop.permute.xlu0 %581  ;;  %v4071_v16 = vcombine.low %v663_v51, %v667_v57  ;;  %v730_v58 = vcombine.high %v667_v57, %v668_v46 }
  0xdd   :  { %601 = vst.msk [vmem:[#allocation2 + $0x98] sm:$0xff] %vm96_vm6, %v582_v7 }
  0xde   :  { %1022 = vmatmul.mubr.f32.gmra.mxu0 %v4071_v16 }
  0xdf   :  { %v181_v62 = vpop.permute.xlu1 %180 }
  0xe0   :  { %201 = vst.msk [vmem:[#allocation2 + $0xa0] sm:$0xff] %vm194_vm8, %v181_v62  ;;  %v346_v10 = vpop.permute.xlu0 %345 }
  0xe1   :  { %364 = vst.msk [vmem:[#allocation2 + $0xa8] sm:$0xff] %vm194_vm8, %v346_v10 }
  0xe3   :  { %v422_v60 = vpop.permute.xlu1 %421 }
  0xe4   :  { %440 = vst.msk [vmem:[#allocation2 + $0xb0] sm:$0xff] %vm96_vm6, %v422_v60  ;;  %v458_v63 = vpop.permute.xlu0 %457 }
  0xe5   :  { %478 = vst.msk [vmem:[#allocation2 + $0x70] sm:$0xf] %vm149_vm11, %v458_v63 }
  0xe7   :  { %v460_v3 = vpop.permute.xlu1 %459  ;;  %v5471_v44 = vld [vmem:[#allocation2 + $0xa0] sm:$0xff] }
  0xe8   :  { %479 = vst.msk [vmem:[#allocation2 + $0x90] sm:$0xff] %vm145_vm7, %v460_v3  ;;  %v626_v56 = vpop.permute.xlu0 %625  ;;  %v5474_v0 = vld [vmem:[#allocation2 + $0xa8] sm:$0xff]  ;;  %v4075_v24 = vcombine.low %v730_v58, %v5471_v44 }
  0xe9   :  { %646 = vst.msk [vmem:[#allocation2 + $0x78] sm:$0xf] %vm149_vm11, %v626_v56  ;;  %v733_v21 = vcombine.low %v5471_v44, %v5474_v0  ;;  %v734_v36 = vcombine.high %v5471_v44, %v5474_v0 }
  0xeb   :  { %v628_v13 = vpop.permute.xlu1 %627  ;;  %v4076_v6 = vcombine.high %v668_v46, %v733_v21 }
  0xec   :  { %647 = vst.msk [vmem:[#allocation2 + $0x98] sm:$0xff] %vm145_vm7, %v628_v13  ;;  %v462_v40 = vpop.permute.xlu0 %461 }
  0xed   :  { %480 = vst.msk [vmem:[#allocation2 + $0xb0] sm:$0xff] %vm145_vm7, %v462_v40  ;;  %1027 = vmatprep.mubr.f32.mxu0 %v4076_v6 }
  0xee   :  { %1028 = vmatmul.mubr.f32.gmra.mxu0 %v4075_v24  ;;  %v865_v24 = vlaneseq }
  0xef   :  { %v504_v59 = vpop.permute.xlu1 %503 }
  0xf0   :  { %524 = vst.msk [vmem:[#allocation2 + $0x70] sm:$0xf] %vm198_vm12, %v504_v59  ;;  %v506_v2 = vpop.permute.xlu0 %505  ;;  %v666_v17 = vld [vmem:[#allocation2 + $0x78] sm:$0xf]  ;;  %v5516_v59 = vshrl.u32 %v865_v24, 7 }
  0xf1   :  { %525 = vst.msk [vmem:[#allocation2 + $0x90] sm:$0xff] %vm194_vm8, %v506_v2 }
  0xf2   :  { %7731 = vst [vmem:[#allocation8_spill] sm:$0xff] %v5516_v59  ;;  %v5519_v2 = vsub.s32 0, %v5516_v59 }
  0xf3   :  { %v584_v47 = vpop.permute.xlu1 %583  ;;  %v670_v26 = vld [vmem:[#allocation2 + $0x98] sm:$0xff] }
  0xf4   :  { %602 = vst.msk [vmem:[#allocation2 + $0xb8] sm:$0xff] %vm96_vm6, %v584_v47  ;;  %v85_v53 = vpop.permute.xlu0 %84  ;;  %v4074_v8 = vcombine.low %v666_v17, %v670_v26  ;;  %v863_v17 = vld [vmem:[%s7718_s2] ss:$8 sm:$0x3]  ;;  %v7720_v47 = vsub.s32 1, %v5516_v59 }
  0xf5   :  { %104 = vst.msk [vmem:[#allocation2 + $0xc0] sm:$0xff] %vm96_vm6, %v85_v53  ;;  %v5526_v53 = vrot.slane %v863_v17, %v5519_v2 }
  0xf6   :  { %4090 = vmatprep.mubr.msk.f32.mxu1 %vm924_vm9, %v4074_v8  ;;  %v5530_v8 = vrot.slane %v863_v17, %v7720_v47  ;;  %v2580_v47 = vld [vmem:[%s7717_s1 + $0x5d8] sm:$0xff] }
  0xf7   :  { %v256_v11 = vpop.permute.xlu1 %255  ;;  %v665_v42 = vld [vmem:[#allocation2 + $0x70] sm:$0xf] }
  0xf8   :  { %273 = vst.msk [vmem:[#allocation2 + $0xc8] sm:$0xff] %vm96_vm6, %v256_v11  ;;  %v508_v31 = vpop.permute.xlu0 %507  ;;  %v669_v4 = vld [vmem:[#allocation2 + $0x90] sm:$0xff]  ;;  %v4373_v11 = vmov 1983009808  }
  0xf9   :  { %526 = vst.msk [vmem:[#allocation2 + $0xb0] sm:$0xff] %vm194_vm8, %v508_v31  ;;  %v4073_v14 = vcombine.low %v665_v42, %v669_v4  ;;  %v732_v28 = vcombine.high %v669_v4, %v670_v26  ;;  %v1184_v42 = vunpack.c.l.s4 %v4373_v11 }
  0xfb   :  { %v630_v15 = vpop.permute.xlu1 %629  ;;  %1129 = vmatmul.mubr.f32.gmra.mxu1 %v4073_v14 }
  0xfc   :  { %648 = vst.msk [vmem:[#allocation2 + $0xb8] sm:$0xff] %vm145_vm7, %v630_v15  ;;  %v134_v33 = vpop.permute.xlu0 %133 }
  0xfd   :  { %153 = vst.msk [vmem:[#allocation2 + $0xc0] sm:$0xff] %vm145_vm7, %v134_v33  ;;  %v1185_v33 = vunpack.c.0.s8 %v1184_v42 }
  0xff   :  { %v302_v1 = vpop.permute.xlu1 %301 }
 0x100   :  { %319 = vst.msk [vmem:[#allocation2 + $0xc8] sm:$0xff] %vm145_vm7, %v302_v1  ;;  %v183_v20 = vpop.permute.xlu0 %182  ;;  %v673_v25 = vld [vmem:[#allocation2 + $0xb0] sm:$0xff] }
 0x101   :  { %202 = vst.msk [vmem:[#allocation2 + $0xc0] sm:$0xff] %vm194_vm8, %v183_v20  ;;  %v4077_v32 = vcombine.low %v732_v28, %v673_v25 }
 0x103   :  { %v348_v19 = vpop.permute.xlu1 %347  ;;  %v674_v39 = vld [vmem:[#allocation2 + $0xb8] sm:$0xff] }
 0x104   :  { %365 = vst.msk [vmem:[#allocation2 + $0xc8] sm:$0xff] %vm194_vm8, %v348_v19  ;;  %v424_v52 = vpop.permute.xlu0 %423  ;;  %v735_v55 = vcombine.low %v673_v25, %v674_v39  ;;  %v736_v46 = vcombine.high %v673_v25, %v674_v39  ;;  %v5535_v25 = vsub.s32 %v1185_v33, %v5516_v59 }
 0x105   :  { %441 = vst.msk [vmem:[#allocation2 + $0xd0] sm:$0xff] %vm96_vm6, %v424_v52 }
 0x106   :  { %v4078_v12 = vcombine.high %v670_v26, %v735_v55 }
 0x107   :  { %v464_v29 = vpop.permute.xlu1 %463 }
 0x108   :  { %481 = vst.msk [vmem:[#allocation2 + $0xd0] sm:$0xff] %vm145_vm7, %v464_v29  ;;  %4091 = vmatprep.mubr.msk.f32.mxu1 %vm924_vm9, %v4078_v12  ;;  %v586_v34 = vpop.permute.xlu0 %585  ;;  %v675_v43 = vld [vmem:[#allocation2 + $0xc0] sm:$0xff] }
 0x109   :  { %603 = vst.msk [vmem:[#allocation2 + $0xd8] sm:$0xff] %vm96_vm6, %v586_v34  ;;  %1135 = vmatmul.mubr.f32.gmra.mxu1 %v4077_v32  ;;  %v4079_v9 = vcombine.low %v734_v36, %v675_v43  ;;  %vm7730_vm6 = vcmask 1047559  }
 0x10b   :  { %v510_v27 = vpop.permute.xlu1 %509  ;;  %v676_v30 = vld [vmem:[#allocation2 + $0xc8] sm:$0xff] }
 0x10c   :  { %527 = vst.msk [vmem:[#allocation2 + $0xd0] sm:$0xff] %vm194_vm8, %v510_v27  ;;  %v632_v35 = vpop.permute.xlu0 %631  ;;  %v737_v61 = vcombine.low %v675_v43, %v676_v30  ;;  %v738_v63 = vcombine.high %v675_v43, %v676_v30  ;;  %vm1959_vm8 = vcmask 1047824  }
 0x10d   :  { %649 = vst.msk [vmem:[#allocation2 + $0xd8] sm:$0xff] %vm145_vm7, %v632_v35  ;;  %vm1872_vm7 = vcmask 277504  }
 0x10e   :  { %v4080_v37 = vcombine.high %v5474_v0, %v737_v61 }
 0x10f   :  { %v87_v38 = vpop.permute.xlu1 %86 }
 0x110   :  { %105 = vst.msk [vmem:[#allocation2 + $0xe0] sm:$0xf] %vm100_vm10, %v87_v38  ;;  %v258_v18 = vpop.permute.xlu0 %257  ;;  %1033 = vmatprep.mubr.f32.mxu0 %v4080_v37 }
 0x111   :  { %274 = vst.msk [vmem:[#allocation2 + $0xe8] sm:$0xf] %vm100_vm10, %v258_v18  ;;  %1034 = vmatmul.mubr.f32.gmra.mxu0 %v4079_v9 }
 0x113   :  { %v136_v41 = vpop.permute.xlu1 %135  ;;  %v677_v22 = vld [vmem:[#allocation2 + $0xd0] sm:$0xff] }
 0x114   :  { %154 = vst.msk [vmem:[#allocation2 + $0xe0] sm:$0xf] %vm149_vm11, %v136_v41  ;;  %v304_v45 = vpop.permute.xlu0 %303  ;;  %v678_v5 = vld [vmem:[#allocation2 + $0xd8] sm:$0xff]  ;;  %v4081_v51 = vcombine.low %v736_v46, %v677_v22 }
 0x115   :  { %320 = vst.msk [vmem:[#allocation2 + $0xe8] sm:$0xf] %vm149_vm11, %v304_v45  ;;  %v739_v48 = vcombine.low %v677_v22, %v678_v5  ;;  %v740_v13 = vcombine.high %v677_v22, %v678_v5 }
 0x117   :  { %v185_v50 = vpop.permute.xlu1 %184  ;;  %v4082_v23 = vcombine.high %v674_v39, %v739_v48 }
 0x118   :  { %203 = vst.msk [vmem:[#allocation2 + $0xe0] sm:$0xf] %vm198_vm12, %v185_v50  ;;  %v350_v49 = vpop.permute.xlu0 %349 }
 0x119   :  { %366 = vst.msk [vmem:[#allocation2 + $0xe8] sm:$0xf] %vm198_vm12, %v350_v49  ;;  %4092 = vmatprep.mubr.msk.f32.mxu1 %vm924_vm9, %v4082_v23 }
 0x11a   :  { %1141 = vmatmul.mubr.f32.gmra.mxu1 %v4081_v51 }
 0x11b   :  { %v426_v54 = vpop.permute.xlu1 %425 }
 0x11c   :  { %442 = vst.msk [vmem:[#allocation2 + $0xf0] sm:$0xf] %vm100_vm10, %v426_v54  ;;  %v466_v57 = vpop.permute.xlu0 %465 }
 0x11d   :  { %482 = vst.msk [vmem:[#allocation2 + $0xf0] sm:$0xf] %vm149_vm11, %v466_v57 }
 0x11f   :  { %v588_v7 = vpop.permute.xlu1 %587  ;;  %v679_v16 = vld [vmem:[#allocation2 + $0xe0] sm:$0xf] }
 0x120   :  { %604 = vst.msk [vmem:[#allocation2 + $0xf8] sm:$0xf] %vm100_vm10, %v588_v7  ;;  %v512_v62 = vpop.permute.xlu0 %511  ;;  %v680_v10 = vld [vmem:[#allocation2 + $0xe8] sm:$0xf]  ;;  %v4083_v56 = vcombine.low %v738_v63, %v679_v16  ;;  %vm1961_vm10 = vcmask 556032  }
 0x121   :  { %528 = vst.msk [vmem:[#allocation2 + $0xf0] sm:$0xf] %vm198_vm12, %v512_v62  ;;  %v741_v60 = vcombine.low %v679_v16, %v680_v10  ;;  %vm2146_vm12 = vcmask 64512  }
 0x123   :  { %v634_v3 = vpop.permute.xlu1 %633  ;;  %v4084_v44 = vcombine.high %v676_v30, %v741_v60 }
 0x124   :  { %650 = vst.msk [vmem:[#allocation2 + $0xf8] sm:$0xf] %vm149_vm11, %v634_v3  ;;  %vm2931_vm11 = vcmask 1041408  }
 0x125   :  { %1039 = vmatprep.mubr.f32.mxu0 %v4084_v44 }
 0x126   :  { %1040 = vmatmul.mubr.f32.gmra.mxu0 %v4083_v56 }
 0x128   :  { %v681_v0 = vld [vmem:[#allocation2 + $0xf0] sm:$0xf] }
 0x129   :  { %v4085_v40 = vcombine.low %v740_v13, %v681_v0 }
 0x12b   :  { %v682_v21 = vld [vmem:[#allocation2 + $0xf8] sm:$0xf] }
 0x12c   :  { %v742_v58 = vcombine.low %v681_v0, %v682_v21 }
 0x12e   :  { %v4086_v6 = vcombine.high %v678_v5, %v742_v58 }
 0x130   :  { %4093 = vmatprep.mubr.msk.f32.mxu1 %vm924_vm9, %v4086_v6  ;;  %vm1875_vm9 = vcmask 271360  }
 0x131   :  { %1147 = vmatmul.mubr.f32.gmra.mxu1 %v4085_v40 }
 0x148   :  { %v1005_v26 = vpop.f32.mrf.mxu0 }
 0x149   :  { %v1006_v4 = vadd.f32 %v1005_v26, %v5526_v53 }
 0x14a   :  { %v1007_v31 = vpop.f32.mrf.mxu0 }
 0x14b   :  { %v1008_v15 = vadd.f32 %v1007_v31, %v5530_v8 }
 0x158   :  { %v1112_v14 = vpop.f32.mrf.mxu1 }
 0x159   :  { %v1113_v1 = vadd.f32 %v1112_v14, %v1006_v4 }
 0x15a   :  { %v1114_v20 = vpop.f32.mrf.mxu1 }
 0x15b   :  { %v1115_v19 = vadd.f32 %v1114_v20, %v1008_v15  ;;  %v1153_v39 = vmax.f32 %v1113_v1, 0.0 }
 0x15d   :  { %v1154_v52 = vmax.f32 %v1115_v19, 0.0  ;;  %v1011_v32 = vpop.f32.mrf.mxu0 }
 0x15e   :  { %v1012_v38 = vadd.f32 %v1011_v32, %v5526_v53 }
 0x15f   :  { %v1181_v55 = vcombine.low %v1153_v39, %v1154_v52  ;;  %v1182_v28 = vcombine.high %v1153_v39, %v1154_v52  ;;  %v1013_v61 = vpop.f32.mrf.mxu0 }
 0x160   :  { %v1014_v18 = vadd.f32 %v1013_v61, %v5530_v8 }
 0x161   :  { %v5538_v12 = vrot.slane %v1181_v55, %v5535_v25  ;;  %v1196_v29 = vrot.slane %v1182_v28, %v5535_v25 }
 0x163   :  { %v4096_v34 = vrot.slane %v1196_v29, 9  ;;  %v1197_v27 = vcombine.high %v5538_v12, %v5538_v12  ;;  %v1198_v43 = vcombine.high %v1196_v29, %v1196_v29 }
 0x165   :  { %v5543_v30 = vmax.f32 %v1196_v29, %v4096_v34  ;;  %v4095_v35 = vrot.slane %v1197_v27, 9  ;;  %v4097_v37 = vrot.slane %v1198_v43, 9 }
 0x167   :  { %1479 = vrot.lane.b32.xlu1 %v5543_v30, %s4374_s12  ;;  %v5547_v36 = vmax.f32 %v1197_v27, %v4095_v35  ;;  %v5553_v45 = vmax.f32 %v1198_v43, %v4097_v37 }
 0x169   :  { %v1118_v9 = vpop.f32.mrf.mxu1  ;;  %1477 = vrot.lane.b32.xlu0 %v5547_v36, %s4374_s12 }
 0x16a   :  { %v1119_v41 = vadd.f32 %v1118_v9, %v1012_v38 }
 0x16b   :  { %v1120_v22 = vpop.f32.mrf.mxu1 }
 0x16c   :  { %v1121_v5 = vadd.f32 %v1120_v22, %v1014_v18  ;;  %v1155_v48 = vmax.f32 %v1119_v41, 0.0 }
 0x16d   :  { %1481 = vrot.lane.b32.xlu0 %v5553_v45, %s4374_s12 }
 0x16e   :  { %v1156_v46 = vmax.f32 %v1121_v5, 0.0 }
 0x170   :  { %v1199_v50 = vcombine.low %v1155_v48, %v1156_v46  ;;  %v1200_v23 = vcombine.high %v1155_v48, %v1156_v46  ;;  %v2544_v48 = vld [vmem:[%s7717_s1 + $0x4b8] sm:$0xff]  ;;  %v2543_v46 = vld [vmem:[%s7717_s1 + $0x4b0] sm:$0xff] }
 0x171   :  { %2938 = vmatprep.subr.mxu1 %v2544_v48  ;;  %v2527_v48 = vld [vmem:[%s7717_s1 + $0x430] sm:$0xff] }
 0x172   :  { %v1207_v49 = vrot.slane %v1199_v50, %v5535_v25  ;;  %v1214_v51 = vrot.slane %v1200_v23, %v5535_v25  ;;  %2939 = vmatpush1.msra.mxu1 %v2543_v46  ;;  %v2526_v46 = vld [vmem:[%s7717_s1 + $0x428] sm:$0xff] }
 0x174   :  { %v4098_v54 = vrot.slane %v1207_v49, 9  ;;  %v1215_v57 = vcombine.high %v1207_v49, %v1207_v49  ;;  %v1216_v7 = vcombine.high %v1214_v51, %v1214_v51  ;;  %v4100_v10 = vrot.slane %v1214_v51, 9  ;;  %v1017_v60 = vpop.f32.mrf.mxu0 }
 0x175   :  { %v1018_v0 = vadd.f32 %v1017_v60, %v5526_v53 }
 0x176   :  { %v5559_v16 = vmax.f32 %v1207_v49, %v4098_v54  ;;  %v4099_v62 = vrot.slane %v1215_v57, 9  ;;  %v4101_v3 = vrot.slane %v1216_v7, 9  ;;  %v5567_v44 = vmax.f32 %v1214_v51, %v4100_v10  ;;  %v1019_v56 = vpop.f32.mrf.mxu0  ;;  %v2542_v49 = vld [vmem:[%s7717_s1 + $0x4a8] sm:$0xff]  ;;  %v2541_v51 = vld [vmem:[%s7717_s1 + $0x4a0] sm:$0xff] }
 0x177   :  { %v1020_v13 = vadd.f32 %v1019_v56, %v5530_v8  ;;  %2940 = vmatprep.subr.mxu1 %v2542_v49  ;;  %v2537_v56 = vld [vmem:[%s7717_s1 + $0x480] sm:$0xff] }
 0x178   :  { %1483 = vrot.lane.b32.xlu1 %v5559_v16, %s4374_s12  ;;  %v5563_v63 = vmax.f32 %v1215_v57, %v4099_v62  ;;  %v5572_v21 = vmax.f32 %v1216_v7, %v4101_v3  ;;  %2941 = vmatpush1.msra.mxu1 %v2541_v51  ;;  %v2540_v7 = vld [vmem:[%s7717_s1 + $0x498] sm:$0xff]  ;;  %v2539_v62 = vld [vmem:[%s7717_s1 + $0x490] sm:$0xff]  ;;  %v2538_v3 = vld [vmem:[%s7717_s1 + $0x488] sm:$0xff] }
 0x179   :  { %2942 = vmatprep.subr.mxu1 %v2540_v7  ;;  %v2525_v49 = vld [vmem:[%s7717_s1 + $0x420] sm:$0xff]  ;;  %v2524_v51 = vld [vmem:[%s7717_s1 + $0x418] sm:$0xff]  ;;  %v2523_v7 = vld [vmem:[%s7717_s1 + $0x410] sm:$0xff] }
 0x17a   :  { %1485 = vrot.lane.b32.xlu0 %v5563_v63, %s4374_s12  ;;  %2943 = vmatpush1.msra.mxu1 %v2539_v62 }
 0x17b   :  { %2944 = vmatprep.subr.mxu1 %v2538_v3 }
 0x17c   :  { %1487 = vrot.lane.b32.xlu1 %v5567_v44, %s4374_s12  ;;  %2945 = vmatpush1.msra.mxu1 %v2537_v56  ;;  %v2521_v56 = vld [vmem:[%s7717_s1 + $0x400] sm:$0xff] }
 0x17d   :  { %v1124_v58 = vpop.f32.mrf.mxu1 }
 0x17e   :  { %v1125_v6 = vadd.f32 %v1124_v58, %v1018_v0  ;;  %1489 = vrot.lane.b32.xlu0 %v5572_v21, %s4374_s12 }
 0x17f   :  { %v1126_v40 = vpop.f32.mrf.mxu1 }
 0x180   :  { %v1127_v24 = vadd.f32 %v1126_v40, %v1020_v13  ;;  %v1157_v17 = vmax.f32 %v1125_v6, 0.0  ;;  %v2536_v6 = vld [vmem:[%s7717_s1 + $0x478] sm:$0xff] }
 0x181   :  { %2946 = vmatprep.subr.mxu1 %v2536_v6 }
 0x182   :  { %v1158_v26 = vmax.f32 %v1127_v24, 0.0  ;;  %v2535_v24 = vld [vmem:[%s7717_s1 + $0x470] sm:$0xff] }
 0x183   :  { %2947 = vmatpush1.msra.mxu1 %v2535_v24 }
 0x184   :  { %v1217_v11 = vcombine.low %v1157_v17, %v1158_v26  ;;  %v5577_v42 = vcombine.high %v1157_v17, %v1158_v26 }
 0x186   :  { %v5580_v31 = vrot.slane %v1217_v11, %v5535_v25 }
 0x188   :  { %v4102_v4 = vrot.slane %v5580_v31, 9 }
 0x18a   :  { %v5584_v14 = vmax.f32 %v5580_v31, %v4102_v4  ;;  %v2534_v4 = vld [vmem:[%s7717_s1 + $0x468] sm:$0xff] }
 0x18b   :  { %2948 = vmatprep.subr.mxu1 %v2534_v4 }
 0x18c   :  { %1491 = vrot.lane.b32.xlu1 %v5584_v14, %s4374_s12 }
 0x19e   :  { %v1023_v15 = vpop.f32.mrf.mxu0 }
 0x19f   :  { %v1024_v1 = vadd.f32 %v1023_v15, %v5526_v53  ;;  %v2533_v15 = vld [vmem:[%s7717_s1 + $0x460] sm:$0xff] }
 0x1a0   :  { %v1025_v33 = vpop.f32.mrf.mxu0  ;;  %2949 = vmatpush1.msra.mxu1 %v2533_v15 }
 0x1a1   :  { %v1026_v19 = vadd.f32 %v1025_v33, %v5530_v8  ;;  %v2532_v33 = vld [vmem:[%s7717_s1 + $0x458] sm:$0xff] }
 0x1a2   :  { %2950 = vmatprep.subr.mxu1 %v2532_v33  ;;  %v2517_v33 = vld [vmem:[%s7717_s1 + $0x3e0] sm:$0xff] }
 0x1ae   :  { %v1029_v34 = vpop.f32.mrf.mxu0 }
 0x1af   :  { %v1030_v61 = vadd.f32 %v1029_v34, %v5526_v53 }
 0x1b0   :  { %v1031_v35 = vpop.f32.mrf.mxu0 }
 0x1b1   :  { %v1032_v9 = vadd.f32 %v1031_v35, %v5530_v8 }
 0x1bb   :  { %v1130_v20 = vpop.f32.mrf.mxu1 }
 0x1bc   :  { %v5590_v39 = vadd.f32 %v1130_v20, %v1024_v1  ;;  %v2531_v1 = vld [vmem:[%s7717_s1 + $0x450] sm:$0xff] }
 0x1bd   :  { %v1132_v52 = vpop.f32.mrf.mxu1  ;;  %2951 = vmatpush1.msra.mxu1 %v2531_v1 }
 0x1be   :  { %v5592_v55 = vadd.f32 %v1132_v52, %v1026_v19  ;;  %v1159_v28 = vmax.f32 %v5590_v39, 0.0  ;;  %v2573_v39 = vld [vmem:[%s7717_s1 + $0x5a0] sm:$0xff] }
 0x1c0   :  { %v1160_v29 = vmax.f32 %v5592_v55, 0.0 }
 0x1c2   :  { %v1236_v32 = vcombine.high %v1159_v28, %v1160_v29 }
 0x1c4   :  { %v5601_v27 = vrot.slane %v1236_v32, %v5535_v25  ;;  %v2530_v32 = vld [vmem:[%s7717_s1 + $0x448] sm:$0xff] }
 0x1c5   :  { %2952 = vmatprep.subr.mxu1 %v2530_v32 }
 0x1c6   :  { %v1252_v43 = vcombine.high %v5601_v27, %v5601_v27 }
 0x1c8   :  { %v4109_v37 = vrot.slane %v1252_v43, 9 }
 0x1c9   :  { %v1136_v38 = vpop.f32.mrf.mxu1 }
 0x1ca   :  { %v1137_v18 = vadd.f32 %v1136_v38, %v1030_v61  ;;  %v5607_v41 = vmax.f32 %v1252_v43, %v4109_v37  ;;  %v2529_v43 = vld [vmem:[%s7717_s1 + $0x440] sm:$0xff]  ;;  %v2528_v37 = vld [vmem:[%s7717_s1 + $0x438] sm:$0xff] }
 0x1cb   :  { %v1138_v22 = vpop.f32.mrf.mxu1  ;;  %2953 = vmatpush1.msra.mxu1 %v2529_v43  ;;  %v2515_v43 = vld [vmem:[%s7717_s1 + $0x3d0] sm:$0xff] }
 0x1cc   :  { %v1139_v5 = vadd.f32 %v1138_v22, %v1032_v9  ;;  %1505 = vrot.lane.b32.xlu0 %v5607_v41, %s4374_s12  ;;  %v1161_v50 = vmax.f32 %v1137_v18, 0.0  ;;  %2954 = vmatprep.subr.mxu1 %v2528_v37  ;;  %v4094_v37 = vrot.slane %v5538_v12, 9 }
 0x1cd   :  { %2955 = vmatpush1.msra.mxu1 %v2527_v48  ;;  %v2513_v48 = vld [vmem:[%s7717_s1 + $0x3c0] sm:$0xff] }
 0x1ce   :  { %v1162_v23 = vmax.f32 %v1139_v5, 0.0  ;;  %2956 = vmatprep.subr.mxu1 %v2526_v46 }
 0x1cf   :  { %2957 = vmatpush1.msra.mxu1 %v2525_v49 }
 0x1d0   :  { %v1253_v54 = vcombine.low %v1161_v50, %v1162_v23  ;;  %v1254_v57 = vcombine.high %v1161_v50, %v1162_v23  ;;  %2958 = vmatprep.subr.mxu1 %v2524_v51 }
 0x1d1   :  { %v1035_v0 = vpop.f32.mrf.mxu0  ;;  %2959 = vmatpush1.msra.mxu1 %v2523_v7  ;;  %v1235_v7 = vcombine.low %v1159_v28, %v1160_v29 }
 0x1d2   :  { %v1261_v10 = vrot.slane %v1253_v54, %v5535_v25  ;;  %v1268_v60 = vrot.slane %v1254_v57, %v5535_v25  ;;  %v1036_v34 = vadd.f32 %v1035_v0, %v5526_v53  ;;  %v2520_v0 = vld [vmem:[%s7717_s1 + $0x3f8] sm:$0xff] }
 0x1d3   :  { %v1037_v20 = vpop.f32.mrf.mxu0 }
 0x1d4   :  { %v4110_v58 = vrot.slane %v1261_v10, 9  ;;  %v1269_v13 = vcombine.high %v1261_v10, %v1261_v10  ;;  %v1270_v40 = vcombine.high %v1268_v60, %v1268_v60  ;;  %v4112_v11 = vrot.slane %v1268_v60, 9 }
 0x1d5   :  { %v1038_v38 = vadd.f32 %v1037_v20, %v5530_v8  ;;  %v2516_v20 = vld [vmem:[%s7717_s1 + $0x3d8] sm:$0xff] }
 0x1d6   :  { %v5643_v17 = vmax.f32 %v1261_v10, %v4110_v58  ;;  %v4111_v26 = vrot.slane %v1269_v13, 9  ;;  %v4113_v52 = vrot.slane %v1270_v40, 9  ;;  %v5670_v61 = vmax.f32 %v1268_v60, %v4112_v11  ;;  %v2522_v10 = vld [vmem:[%s7717_s1 + $0x408] sm:$0xff] }
 0x1d7   :  { %2960 = vmatprep.subr.mxu1 %v2522_v10  ;;  %v2574_v10 = vld [vmem:[%s7717_s1 + $0x5a8] sm:$0xff] }
 0x1d8   :  { %1507 = vrot.lane.b32.xlu1 %v5643_v17, %s4374_s12  ;;  %v5659_v19 = vmax.f32 %v1269_v13, %v4111_v26  ;;  %v5678_v22 = vmax.f32 %v1270_v40, %v4113_v52  ;;  %2961 = vmatpush1.msra.mxu1 %v2521_v56  ;;  %v2519_v40 = vld [vmem:[%s7717_s1 + $0x3f0] sm:$0xff]  ;;  %v2518_v26 = vld [vmem:[%s7717_s1 + $0x3e8] sm:$0xff]  ;;  %v5724_v52 = vrot.slane %v5577_v42, %v5535_v25 }
 0x1d9   :  { %2962 = vmatprep.subr.mxu1 %v2520_v0  ;;  %v1480_v24 = vpop.permute.xlu1 %1479  ;;  %v2514_v42 = vld [vmem:[%s7717_s1 + $0x3c8] sm:$0xff]  ;;  %v5770_v56 = vmax.f32 %v5538_v12, %v4094_v37 }
 0x1da   :  { %v1142_v35 = vpop.f32.mrf.mxu1  ;;  %1509 = vrot.lane.b32.xlu0 %v5659_v19, %s4374_s12  ;;  %2963 = vmatpush1.msra.mxu1 %v2519_v40 }
 0x1db   :  { %v1143_v9 = vadd.f32 %v1142_v35, %v1036_v34  ;;  %v1478_v62 = vpop.permute.xlu0 %1477  ;;  %2964 = vmatprep.subr.mxu1 %v2518_v26  ;;  %v2571_v26 = vld [vmem:[%s7717_s1 + $0x590] sm:$0xff] }
 0x1dc   :  { %v1144_v18 = vpop.f32.mrf.mxu1  ;;  %1511 = vrot.lane.b32.xlu1 %v5670_v61, %s4374_s12  ;;  %2965 = vmatpush1.msra.mxu1 %v2517_v33 }
 0x1dd   :  { %v1145_v5 = vadd.f32 %v1144_v18, %v1038_v38  ;;  %v1163_v50 = vmax.f32 %v1143_v9, 0.0  ;;  %2966 = vmatprep.subr.mxu1 %v2516_v20  ;;  %v1532_v38 = vrot.slane %v1478_v62, 2 }
 0x1de   :  { %1513 = vrot.lane.b32.xlu0 %v5678_v22, %s4374_s12  ;;  %2967 = vmatpush1.msra.mxu1 %v2515_v43 }
 0x1df   :  { %v1164_v23 = vmax.f32 %v1145_v5, 0.0  ;;  %v1482_v1 = vpop.permute.xlu0 %1481  ;;  %v1233_v5 = vcombine.high %v5580_v31, %v5580_v31  ;;  %2968 = vmatprep.subr.mxu1 %v2514_v42  ;;  %v1234_v31 = vcombine.high %v5724_v52, %v5724_v52 }
 0x1e0   :  { %v1534_v9 = vrot.slane %v1482_v1, 2  ;;  %2969 = vmatpush1.msra.mxu1 %v2513_v48 }
 0x1e1   :  { %v1271_v54 = vcombine.low %v1163_v50, %v1164_v23  ;;  %v1272_v57 = vcombine.high %v1163_v50, %v1164_v23  ;;  %v2576_v50 = vld [vmem:[%s7717_s1 + $0x5b8] sm:$0xff]  ;;  %v1533_v23 = vrot.slane %v1480_v24, 2  ;;  %v4103_v55 = vrot.slane %v1233_v5, 9 }
 0x1e2   :  { %2970 = vmatprep.subr.mxu1 %v2576_v50  ;;  %v4105_v40 = vrot.slane %v1234_v31, 9  ;;  %v2566_v50 = vld [vmem:[%s7717_s1 + $0x568] sm:$0xff] }
 0x1e3   :  { %v1279_v60 = vrot.slane %v1271_v54, %v5535_v25  ;;  %v1286_v3 = vrot.slane %v1272_v57, %v5535_v25  ;;  %v2575_v57 = vld [vmem:[%s7717_s1 + $0x5b0] sm:$0xff] }
 0x1e4   :  { %2971 = vmatpush2.msra.mxu1 %v2575_v57  ;;  %v2565_v57 = vld [vmem:[%s7717_s1 + $0x560] sm:$0xff] }
 0x1e5   :  { %v4114_v58 = vrot.slane %v1279_v60, 9  ;;  %v1287_v13 = vcombine.high %v1279_v60, %v1279_v60  ;;  %v1288_v6 = vcombine.high %v1286_v3, %v1286_v3  ;;  %v4116_v15 = vrot.slane %v1286_v3, 9  ;;  %2972 = vmatprep.subr.mxu1 %v2574_v10 }
 0x1e6   :  { %v1041_v46 = vpop.f32.mrf.mxu0  ;;  %2973 = vmatpush2.msra.mxu1 %v2573_v39 }
 0x1e7   :  { %v5714_v11 = vmax.f32 %v1279_v60, %v4114_v58  ;;  %v4115_v4 = vrot.slane %v1287_v13, 9  ;;  %v4117_v34 = vrot.slane %v1288_v6, 9  ;;  %v5739_v18 = vmax.f32 %v1286_v3, %v4116_v15 }
 0x1e8   :  { %v1561_v60 = vsel %vm1559_vm13, %v1478_v62, %v1532_v38  ;;  %v1563_v3 = vsel %vm1559_vm13, %v1482_v1, %v1534_v9  ;;  %v1043_v28 = vpop.f32.mrf.mxu0  ;;  %v2572_v62 = vld [vmem:[%s7717_s1 + $0x598] sm:$0xff]  ;;  %v1562_v58 = vsel %vm1559_vm13, %v1480_v24, %v1533_v23  ;;  %v2570_v24 = vld [vmem:[%s7717_s1 + $0x588] sm:$0xff]  ;;  %v5816_v9 = vmax.f32 %v1234_v31, %v4105_v40 }
 0x1e9   :  { %1515 = vrot.lane.b32.xlu1 %v5714_v11, %s4374_s12  ;;  %v5728_v32 = vmax.f32 %v1287_v13, %v4115_v4  ;;  %v5751_v54 = vmax.f32 %v1288_v6, %v4117_v34  ;;  %v1042_v13 = vadd.f32 %v1041_v46, %v5526_v53  ;;  %2974 = vmatprep.subr.mxu1 %v2572_v62 }
 0x1ea   :  { %v1484_v35 = vpop.permute.xlu1 %1483  ;;  %v5787_v4 = vrot.slane %v1235_v7, %v5535_v25  ;;  %v5790_v15 = vmax.f32 %v5547_v36, %v1561_v60  ;;  %v5793_v53 = vmax.f32 %v5553_v45, %v1563_v3  ;;  %2975 = vmatpush2.msra.mxu1 %v2571_v26  ;;  %v1044_v33 = vadd.f32 %v1043_v28, %v5530_v8  ;;  %v2569_v36 = vld [vmem:[%s7717_s1 + $0x580] sm:$0xff]  ;;  %v2568_v8 = vld [vmem:[%s7717_s1 + $0x578] sm:$0xff] }
 0x1eb   :  { %1517 = vrot.lane.b32.xlu0 %v5728_v32, %s4374_s12  ;;  %v1535_v49 = vrot.slane %v1484_v35, 2  ;;  %2976 = vmatprep.subr.mxu1 %v2570_v24  ;;  %v5805_v45 = vmax.f32 %v5543_v30, %v1562_v58  ;;  %v2567_v30 = vld [vmem:[%s7717_s1 + $0x570] sm:$0xff]  ;;  %v2560_v26 = vld [vmem:[%s7717_s1 + $0x538] sm:$0xff] }
 0x1ec   :  { %v1486_v51 = vpop.permute.xlu0 %1485  ;;  %2977 = vmatpush2.msra.mxu1 %v2569_v36  ;;  %v4106_v46 = vrot.slane %v5787_v4, 9 }
 0x1ed   :  { %1519 = vrot.lane.b32.xlu1 %v5739_v18, %s4374_s12  ;;  %v1536_v29 = vrot.slane %v1486_v51, 2  ;;  %v1564_v12 = vsel %vm1559_vm13, %v1484_v35, %v1535_v49  ;;  %v5799_v35 = vmax.f32 %v1233_v5, %v4103_v55  ;;  %v5827_v5 = vrot.slane %v5793_v53, %v5519_v2  ;;  %2978 = vmatprep.subr.mxu1 %v2568_v8  ;;  %v2563_v55 = vld [vmem:[%s7717_s1 + $0x550] sm:$0xff]  ;;  %v2558_v8 = vld [vmem:[%s7717_s1 + $0x528] sm:$0xff] }
 0x1ee   :  { %v1488_v0 = vpop.permute.xlu1 %1487  ;;  %v5808_v37 = vmax.f32 %v5559_v16, %v1564_v12  ;;  %v5823_v16 = vrot.slane %v5790_v15, %v5519_v2  ;;  %2979 = vmatpush2.msra.mxu1 %v2567_v30  ;;  %v5842_v7 = vrot.slane %v5805_v45, %v5519_v2  ;;  %v5874_v12 = vmax.f32 %v5787_v4, %v4106_v46 }
 0x1ef   :  { %1521 = vrot.lane.b32.xlu0 %v5751_v54, %s4374_s12  ;;  %v1537_v1 = vrot.slane %v1488_v0, 2  ;;  %v1565_v42 = vsel %vm1559_vm13, %v1486_v51, %v1536_v29  ;;  %2980 = vmatprep.subr.mxu1 %v2566_v50 }
 0x1f0   :  { %v1490_v20 = vpop.permute.xlu0 %1489  ;;  %v5834_v23 = vmax.f32 %v5563_v63, %v1565_v42  ;;  %v5846_v10 = vrot.slane %v5808_v37, %v5519_v2  ;;  %v2564_v63 = vld [vmem:[%s7717_s1 + $0x558] sm:$0xff]  ;;  %2981 = vmatpush2.msra.mxu1 %v2565_v57  ;;  %v1899_v39 = vsel %vm1824_vm14, %v5842_v7, %v5823_v16  ;;  %v4104_v42 = vrot.slane %v5724_v52, 9 }
 0x1f1   :  { %v1148_v6 = vpop.f32.mrf.mxu1  ;;  %1475 = vrot.lane.b32.xlu1 %v5770_v56, %s4374_s12  ;;  %v1538_v48 = vrot.slane %v1490_v20, 2  ;;  %v1566_v49 = vsel %vm1559_vm13, %v1488_v0, %v1537_v1  ;;  %2982 = vmatprep.subr.mxu1 %v2564_v63  ;;  %v2562_v0 = vld [vmem:[%s7717_s1 + $0x548] sm:$0xff]  ;;  %v1900_v62 = vsel %vm1826_vm15, %v5827_v5, %v1899_v39 }
 0x1f2   :  { %v1149_v34 = vadd.f32 %v1148_v6, %v1042_v13  ;;  %v5860_v28 = vmax.f32 %v5567_v44, %v1566_v49  ;;  %v5870_v58 = vrot.slane %v5834_v23, %v5519_v2  ;;  %2983 = vmatpush2.msra.mxu1 %v2563_v55  ;;  %v2561_v44 = vld [vmem:[%s7717_s1 + $0x540] sm:$0xff]  ;;  %v5880_v6 = vsub.s32 2, %v5516_v59  ;;  %v2556_v49 = vld [vmem:[%s7717_s1 + $0x518] sm:$0xff] }
 0x1f3   :  { %v1150_v43 = vpop.f32.mrf.mxu1  ;;  %v1567_v29 = vsel %vm1559_vm13, %v1490_v20, %v1538_v48  ;;  %v1901_v40 = vsel %vm1828_vm0, %v5846_v10, %v1900_v62  ;;  %2984 = vmatprep.subr.mxu1 %v2562_v0  ;;  %v2559_v20 = vld [vmem:[%s7717_s1 + $0x530] sm:$0xff]  ;;  %v2557_v48 = vld [vmem:[%s7717_s1 + $0x520] sm:$0xff]  ;;  %v5943_v63 = vmax.f32 %v5724_v52, %v4104_v42 }
 0x1f4   :  { %v1151_v38 = vadd.f32 %v1150_v43, %v1044_v33  ;;  %v1165_v51 = vmax.f32 %v1149_v34, 0.0  ;;  %v1623_v24 = vmax.f32 %v5572_v21, %v1567_v29  ;;  %2985 = vmatpush2.msra.mxu1 %v2561_v44  ;;  %v5898_v34 = vrot.slane %v5790_v15, %v5880_v6  ;;  %v2555_v0 = vld [vmem:[%s7717_s1 + $0x510] sm:$0xff] }
 0x1f5   :  { %1493 = vrot.lane.b32.xlu1 %v5799_v35, %s4374_s12  ;;  %v5902_v21 = vrot.slane %v5793_v53, %v5880_v6  ;;  %v5906_v43 = vrot.slane %v5860_v28, %v5519_v2  ;;  %2986 = vmatprep.subr.mxu1 %v2560_v26  ;;  %v1902_v15 = vsel %vm1830_vm1, %v5870_v58, %v1901_v40 }
 0x1f6   :  { %v1166_v31 = vmax.f32 %v1151_v38, 0.0  ;;  %2987 = vmatpush2.msra.mxu1 %v2559_v20  ;;  %v5921_v46 = vrot.slane %v5805_v45, %v5880_v6  ;;  %v5925_v50 = vrot.slane %v5808_v37, %v5880_v6  ;;  %v5951_v55 = vrot.slane %v5834_v23, %v5880_v6 }
 0x1f7   :  { %2988 = vmatprep.subr.mxu1 %v2558_v8  ;;  %v1251_v29 = vcombine.high %v5787_v4, %v5787_v4  ;;  %v2554_v4 = vld [vmem:[%s7717_s1 + $0x508] sm:$0xff]  ;;  %v5975_v44 = vrot.slane %v5860_v28, %v5880_v6  ;;  %v5988_v28 = vrot.slane %v1623_v24, %v5880_v6  ;;  %v2551_v8 = vld [vmem:[%s7717_s1 + $0x4f0] sm:$0xff] }
 0x1f8   :  { %v1289_v60 = vcombine.low %v1165_v51, %v1166_v31  ;;  %v1290_v3 = vcombine.high %v1165_v51, %v1166_v31  ;;  %v5931_v51 = vrot.slane %v1623_v24, %v5519_v2  ;;  %2989 = vmatpush2.msra.mxu1 %v2557_v48  ;;  %v1906_v37 = vsel %vm1824_vm14, %v5921_v46, %v5898_v34 }
 0x1f9   :  { %1497 = vrot.lane.b32.xlu1 %v5816_v9, %s4374_s12  ;;  %2990 = vmatprep.subr.mxu1 %v2556_v49 }
 0x1fa   :  { %v1297_v13 = vrot.slane %v1289_v60, %v5535_v25  ;;  %v5889_v33 = vrot.slane %v1290_v3, %v5535_v25  ;;  %v1903_v60 = vsel %vm1832_vm2, %v5906_v43, %v1902_v15  ;;  %v1907_v3 = vsel %vm1826_vm15, %v5902_v21, %v1906_v37  ;;  %2991 = vmatpush2.msra.mxu1 %v2555_v0  ;;  %v2549_v15 = vld [vmem:[%s7717_s1 + $0x4e0] sm:$0xff]  ;;  %v2548_v37 = vld [vmem:[%s7717_s1 + $0x4d8] sm:$0xff]  ;;  %v2607_v0 = vld [vmem:[%s7717_s1 + $0x6b0] sm:$0xff] }
 0x1fb   :  { %v1908_v52 = vsel %vm1828_vm0, %v5925_v50, %v1907_v3  ;;  %v1904_v23 = vsel %vm1834_vm5, %v5931_v51, %v1903_v60  ;;  %2992 = vmatprep.subr.mxu1 %v2554_v4  ;;  %v4108_v60 = vrot.slane %v5601_v27, 9  ;;  %v2547_v3 = vld [vmem:[%s7717_s1 + $0x4d0] sm:$0xff] }
 0x1fc   :  { %v4118_v1 = vrot.slane %v1297_v13, 9  ;;  %v1305_v53 = vcombine.high %v1297_v13, %v1297_v13  ;;  %v1306_v45 = vcombine.high %v5889_v33, %v5889_v33  ;;  %v1909_v20 = vsel %vm1830_vm1, %v5951_v55, %v1908_v52  ;;  %v2608_v52 = vld [vmem:[%s7717_s1 + $0x6b8] sm:$0xff]  ;;  %v2603_v4 = vld [vmem:[%s7717_s1 + $0x690] sm:$0xff] }
 0x1fd   :  { %1499 = vrot.lane.b32.xlu1 %v5874_v12, %s4374_s12  ;;  %v4120_v49 = vrot.slane %v5889_v33, 9  ;;  %3021 = vmatprep.subr.mxu0 %v2608_v52  ;;  %v2585_v52 = vld [vmem:[%s7717_s1 + $0x600] sm:$0xff] }
 0x1fe   :  { %v1492_v36 = vpop.permute.xlu1 %1491  ;;  %v5912_v30 = vmax.f32 %v1297_v13, %v4118_v1  ;;  %v4119_v39 = vrot.slane %v1305_v53, 9  ;;  %v4121_v62 = vrot.slane %v1306_v45, 9  ;;  %v2553_v13 = vld [vmem:[%s7717_s1 + $0x500] sm:$0xff]  ;;  %v4107_v1 = vrot.slane %v1251_v29, 9  ;;  %3022 = vmatpush1.msra.mxu0 %v2607_v0 }
 0x1ff   :  { %v1539_v38 = vrot.slane %v1492_v36, 2  ;;  %2993 = vmatpush2.msra.mxu1 %v2553_v13  ;;  %v2602_v13 = vld [vmem:[%s7717_s1 + $0x688] sm:$0xff] }
 0x200   :  { %1523 = vrot.lane.b32.xlu0 %v5912_v30, %s4374_s12  ;;  %v5980_v26 = vmax.f32 %v1305_v53, %v4119_v39  ;;  %v5992_v42 = vmax.f32 %v1306_v45, %v4121_v62  ;;  %v1910_v53 = vsel %vm1832_vm2, %v5975_v44, %v1909_v20  ;;  %v6010_v48 = vmax.f32 %v1251_v29, %v4107_v1  ;;  %v2546_v39 = vld [vmem:[%s7717_s1 + $0x4c8] sm:$0xff]  ;;  %v2604_v62 = vld [vmem:[%s7717_s1 + $0x698] sm:$0xff]  ;;  %v2599_v20 = vld [vmem:[%s7717_s1 + $0x670] sm:$0xff] }
 0x201   :  { %v1568_v31 = vsel %vm1559_vm13, %v1492_v36, %v1539_v38  ;;  %v2552_v36 = vld [vmem:[%s7717_s1 + $0x4f8] sm:$0xff]  ;;  %v2550_v38 = vld [vmem:[%s7717_s1 + $0x4e8] sm:$0xff]  ;;  %v6039_v29 = vmax.f32 %v5601_v27, %v4108_v60  ;;  %v2605_v27 = vld [vmem:[%s7717_s1 + $0x6a0] sm:$0xff] }
 0x202   :  { %v1624_v57 = vmax.f32 %v5584_v14, %v1568_v31  ;;  %7732 = vst [vmem:[#allocation9_spill] sm:$0xff] %v5980_v26  ;;  %2994 = vmatprep.subr.mxu1 %v2552_v36  ;;  %7733 = vst [vmem:[#allocation10_spill] sm:$0xff] %v5992_v42  ;;  %v1911_v31 = vsel %vm1834_vm5, %v5988_v28, %v1910_v53  ;;  %v2600_v1 = vld [vmem:[%s7717_s1 + $0x678] sm:$0xff]  ;;  %v2598_v36 = vld [vmem:[%s7717_s1 + $0x668] sm:$0xff] }
 0x203   :  { %2995 = vmatpush2.msra.mxu1 %v2551_v8  ;;  %7735 = vst [vmem:[#allocation12_spill] sm:$0xff] %v6039_v29  ;;  %v2597_v8 = vld [vmem:[%s7717_s1 + $0x660] sm:$0xff]  ;;  %v2594_v53 = vld [vmem:[%s7717_s1 + $0x648] sm:$0xff] }
 0x204   :  { %v5956_v14 = vrot.slane %v1624_v57, %v5519_v2  ;;  %1495 = vrot.lane.b32.xlu0 %v5943_v63, %s4374_s12  ;;  %v6004_v24 = vrot.slane %v1624_v57, %v5880_v6  ;;  %2996 = vmatprep.subr.mxu1 %v2550_v38  ;;  %v6024_v57 = vmax.f32 %v5889_v33, %v4120_v49  ;;  %v2545_v33 = vld [vmem:[%s7717_s1 + $0x4c0] sm:$0xff]  ;;  %v2596_v38 = vld [vmem:[%s7717_s1 + $0x658] sm:$0xff] }
 0x205   :  { %2997 = vmatpush2.msra.mxu1 %v2549_v15  ;;  %v2595_v15 = vld [vmem:[%s7717_s1 + $0x650] sm:$0xff]  ;;  %v2593_v49 = vld [vmem:[%s7717_s1 + $0x640] sm:$0xff] }
 0x206   :  { %v1905_v40 = vsel %vm7730_vm6, %v5956_v14, %v1904_v23  ;;  %v1912_v45 = vsel %vm7730_vm6, %v6004_v24, %v1911_v31  ;;  %7734 = vst [vmem:[#allocation11_spill] sm:$0xff] %v6024_v57  ;;  %2998 = vmatprep.subr.mxu1 %v2548_v37  ;;  %v2606_v23 = vld [vmem:[%s7717_s1 + $0x6a8] sm:$0xff]  ;;  %v2592_v31 = vld [vmem:[%s7717_s1 + $0x638] sm:$0xff]  ;;  %v2589_v60 = vld [vmem:[%s7717_s1 + $0x620] sm:$0xff] }
 0x207   :  { %1931 = vrot.lane.b32.xlu1 %v1905_v40, %s4375_s27  ;;  %2999 = vmatpush2.msra.mxu1 %v2547_v3  ;;  %v2601_v40 = vld [vmem:[%s7717_s1 + $0x680] sm:$0xff]  ;;  %v2590_v37 = vld [vmem:[%s7717_s1 + $0x628] sm:$0xff]  ;;  %v2588_v3 = vld [vmem:[%s7717_s1 + $0x618] sm:$0xff] }
 0x208   :  { %1525 = vrot.lane.b32.xlu0 %v5980_v26, %s4374_s12  ;;  %3000 = vmatprep.subr.mxu1 %v2546_v39  ;;  %v2587_v39 = vld [vmem:[%s7717_s1 + $0x610] sm:$0xff] }
 0x209   :  { %3001 = vmatpush2.msra.mxu1 %v2545_v33  ;;  %3023 = vmatprep.subr.mxu0 %v2606_v23  ;;  %v2586_v33 = vld [vmem:[%s7717_s1 + $0x608] sm:$0xff] }
 0x20a   :  { %3024 = vmatpush1.msra.mxu0 %v2605_v27 }
 0x20b   :  { %1529 = vrot.lane.b32.xlu1 %v5992_v42, %s4374_s12  ;;  %3025 = vmatprep.subr.mxu0 %v2604_v62 }
 0x20c   :  { %1501 = vrot.lane.b32.xlu0 %v6010_v48, %s4374_s12  ;;  %3026 = vmatpush1.msra.mxu0 %v2603_v4 }
 0x20d   :  { %3027 = vmatprep.subr.mxu0 %v2602_v13  ;;  %v1996_v13 = vsel %vm1824_vm14, %v5902_v21, %v5921_v46 }
 0x20e   :  { %3028 = vmatpush1.msra.mxu0 %v2601_v40 }
 0x20f   :  { %1933 = vrot.lane.b32.xlu1 %v1912_v45, %s4375_s27  ;;  %3029 = vmatprep.subr.mxu0 %v2600_v1  ;;  %v2591_v45 = vld [vmem:[%s7717_s1 + $0x630] sm:$0xff]  ;;  %v1997_v1 = vsel %vm1826_vm15, %v5925_v50, %v1996_v13 }
 0x210   :  { %1527 = vrot.lane.b32.xlu0 %v6024_v57, %s4374_s12  ;;  %3030 = vmatpush1.msra.mxu0 %v2599_v20 }
 0x211   :  { %3031 = vmatprep.subr.mxu0 %v2598_v36  ;;  %v1998_v36 = vsel %vm1828_vm0, %v5951_v55, %v1997_v1 }
 0x212   :  { %3032 = vmatpush1.msra.mxu0 %v2597_v8 }
 0x213   :  { %3033 = vmatprep.subr.mxu0 %v2596_v38  ;;  %v2086_v38 = vsel %vm1824_vm14, %v5925_v50, %v5902_v21 }
 0x214   :  { %1503 = vrot.lane.b32.xlu0 %v6039_v29, %s4374_s12  ;;  %3034 = vmatpush1.msra.mxu0 %v2595_v15 }
 0x215   :  { %3035 = vmatprep.subr.mxu0 %v2594_v53 }
 0x216   :  { %3036 = vmatpush1.msra.mxu0 %v2593_v49  ;;  %v1999_v49 = vsel %vm1830_vm1, %v5975_v44, %v1998_v36  ;;  %v2581_v36 = vld [vmem:[%s7717_s1 + $0x5e0] sm:$0xff] }
 0x217   :  { %3037 = vmatprep.subr.mxu0 %v2592_v31 }
 0x218   :  { %3038 = vmatpush1.msra.mxu0 %v2591_v45 }
 0x219   :  { %3039 = vmatprep.subr.mxu0 %v2590_v37  ;;  %v2087_v37 = vsel %vm1826_vm15, %v5951_v55, %v2086_v38 }
 0x21a   :  { %3040 = vmatpush1.msra.mxu0 %v2589_v60  ;;  %v2177_v60 = vsel %vm1824_vm14, %v5870_v58, %v5846_v10 }
 0x21b   :  { %3041 = vmatprep.subr.mxu0 %v2588_v3  ;;  %v2584_v3 = vld [vmem:[%s7717_s1 + $0x5f8] sm:$0xff]  ;;  %v2178_v59 = vsel %vm1826_vm15, %v5906_v43, %v2177_v60  ;;  %v2578_v60 = vld [vmem:[%s7717_s1 + $0x5c8] sm:$0xff] }
 0x21c   :  { %3042 = vmatpush1.msra.mxu0 %v2587_v39  ;;  %v2583_v39 = vld [vmem:[%s7717_s1 + $0x5f0] sm:$0xff] }
 0x21d   :  { %3043 = vmatprep.subr.mxu0 %v2586_v33  ;;  %v2582_v33 = vld [vmem:[%s7717_s1 + $0x5e8] sm:$0xff] }
 0x21e   :  { %3044 = vmatpush1.msra.mxu0 %v2585_v52 }
 0x21f   :  { %3045 = vmatprep.subr.mxu0 %v2584_v3  ;;  %v2088_v3 = vsel %vm1828_vm0, %v5975_v44, %v2087_v37  ;;  %v2079_v37 = vsel %vm1824_vm14, %v5846_v10, %v5827_v5 }
 0x220   :  { %3046 = vmatpush1.msra.mxu0 %v2583_v39  ;;  %v2080_v29 = vsel %vm1826_vm15, %v5870_v58, %v2079_v37 }
 0x221   :  { %3047 = vmatprep.subr.mxu0 %v2582_v33 }
 0x222   :  { %3048 = vmatpush1.msra.mxu0 %v2581_v36  ;;  %v2577_v36 = vld [vmem:[%s7717_s1 + $0x5c0] sm:$0xff] }
 0x223   :  { %3049 = vmatprep.subr.mxu0 %v2580_v47  ;;  %v2640_v47 = vld [vmem:[%s7717_s1 + $0x7b8] sm:$0xff] }
 0x23e   :  { %v6115_v0 = vpop.permute.xlu0 %1505 }
 0x24a   :  { %v1508_v23 = vpop.permute.xlu1 %1507 }
 0x24b   :  { %v1547_v52 = vrot.slane %v1508_v23, 2 }
 0x24c   :  { %v6117_v27 = vpop.permute.xlu0 %1509 }
 0x24d   :  { %v1576_v33 = vsel %vm1559_vm13, %v1508_v23, %v1547_v52  ;;  %v1548_v42 = vrot.slane %v6117_v27, 2  ;;  %v6208_v23 = vsel %vm1830_vm1, %v5988_v28, %v2088_v3  ;;  %v6212_v52 = vsel %vm1828_vm0, %v5931_v51, %v2178_v59  ;;  %v2639_v59 = vld [vmem:[%s7717_s1 + $0x7b0] sm:$0xff] }
 0x24e   :  { %v6119_v62 = vpop.permute.xlu1 %1511 }
 0x24f   :  { %v1577_v37 = vsel %vm1559_vm13, %v6117_v27, %v1548_v42 }
 0x250   :  { %v6121_v4 = vpop.permute.xlu0 %1513 }
 0x25b   :  { %v6126_v40 = vpop.permute.xlu1 %1515 }
 0x25d   :  { %v6130_v20 = vpop.permute.xlu0 %1517 }
 0x25f   :  { %v1520_v8 = vpop.permute.xlu1 %1519 }
 0x260   :  { %v1553_v15 = vrot.slane %v1520_v8, 2 }
 0x261   :  { %v1522_v53 = vpop.permute.xlu0 %1521 }
 0x262   :  { %v1582_v31 = vsel %vm1559_vm13, %v1520_v8, %v1553_v15  ;;  %v1554_v45 = vrot.slane %v1522_v53, 2  ;;  %v1989_v8 = vsel %vm1824_vm14, %v5827_v5, %v5842_v7 }
 0x263   :  { %v6155_v13 = vmax.f32 %v5739_v18, %v1582_v31  ;;  %v1476_v1 = vpop.permute.xlu1 %1475  ;;  %v2000_v31 = vsel %vm1832_vm2, %v5988_v28, %v1999_v49  ;;  %v1990_v49 = vsel %vm1826_vm15, %v5846_v10, %v1989_v8 }
 0x264   :  { %v1583_v38 = vsel %vm1559_vm13, %v1522_v53, %v1554_v45  ;;  %v1531_v15 = vrot.slane %v1476_v1, 2  ;;  %v2579_v53 = vld [vmem:[%s7717_s1 + $0x5d0] sm:$0xff]  ;;  %v2672_v45 = vld [vmem:[%s7717_s1 + $0x8b8] sm:$0xff]  ;;  %v1991_v3 = vsel %vm1828_vm0, %v5870_v58, %v1990_v49  ;;  %v2638_v49 = vld [vmem:[%s7717_s1 + $0x7a8] sm:$0xff] }
 0x265   :  { %v6168_v18 = vmax.f32 %v5751_v54, %v1583_v38  ;;  %v1546_v54 = vrot.slane %v6115_v0, 2  ;;  %v6195_v38 = vrot.slane %v6155_v13, %v5519_v2  ;;  %3050 = vmatpush1.msra.mxu0 %v2579_v53  ;;  %3104 = vmatprep.subr.mxu1 %v2672_v45  ;;  %v1632_v53 = vmax.f32 %v5643_v17, %v1576_v33 }
 0x266   :  { %v1560_v39 = vsel %vm1559_vm13, %v1476_v1, %v1531_v15  ;;  %3051 = vmatprep.subr.mxu0 %v2578_v60 }
 0x267   :  { %v6199_v1 = vrot.slane %v6168_v18, %v5519_v2  ;;  %v1616_v8 = vmax.f32 %v5770_v56, %v1560_v39  ;;  %v1494_v15 = vpop.permute.xlu1 %1493  ;;  %3052 = vmatpush1.msra.mxu0 %v2577_v36  ;;  %v1575_v60 = vsel %vm1559_vm13, %v6115_v0, %v1546_v54  ;;  %v6271_v54 = vrot.slane %v1632_v53, %v5519_v2 }
 0x268   :  { %v1540_v57 = vrot.slane %v1494_v15, 2  ;;  %3053 = vmatprep.subr.mxu0 %v2640_v47  ;;  %v1633_v36 = vmax.f32 %v5659_v19, %v1577_v37 }
 0x269   :  { %7736 = vst [vmem:[#allocation13_spill] sm:$0xff] %v6199_v1  ;;  %v1861_v56 = vsel %vm1824_vm14, %v6199_v1, %v6195_v38  ;;  %v1667_v39 = vrot.slane %v1616_v8, %v5519_v2  ;;  %v1671_v26 = vrot.slane %v1616_v8, %v5880_v6  ;;  %v2001_v1 = vsel %vm1834_vm5, %v6004_v24, %v2000_v31  ;;  %v2637_v31 = vld [vmem:[%s7717_s1 + $0x7a0] sm:$0xff] }
 0x26a   :  { %1879 = vst [vmem:[#allocation3 + $0xa8] sm:$0x3] %v1861_v56  ;;  %v1569_v45 = vsel %vm1559_vm13, %v1494_v15, %v1540_v57  ;;  %v1549_v8 = vrot.slane %v6119_v62, 2  ;;  %3054 = vmatpush2.msra.mxu0 %v2639_v59  ;;  %v2634_v15 = vld [vmem:[%s7717_s1 + $0x788] sm:$0xff]  ;;  %v1550_v59 = vrot.slane %v6121_v4, 2 }
 0x26b   :  { %v1825_v17 = vsel %vm1824_vm14, %v5823_v16, %v1667_v39  ;;  %v1838_v57 = vsel %vm1824_vm14, %v5898_v34, %v1671_v26  ;;  %v1625_v33 = vmax.f32 %v5799_v35, %v1569_v45  ;;  %v2636_v35 = vld [vmem:[%s7717_s1 + $0x798] sm:$0xff]  ;;  %3055 = vmatprep.subr.mxu0 %v2638_v49  ;;  %v6286_v56 = vpop.permute.xlu1 %1497  ;;  %v6291_v39 = vrot.slane %v1632_v53, %v5880_v6 }
 0x26c   :  { %v1827_v0 = vsel %vm1826_vm15, %v5842_v7, %v1825_v17  ;;  %v1839_v16 = vsel %vm1826_vm15, %v5921_v46, %v1838_v57  ;;  %v2635_v7 = vld [vmem:[%s7717_s1 + $0x790] sm:$0xff]  ;;  %v1631_v46 = vmax.f32 %v5607_v41, %v1575_v60  ;;  %3056 = vmatpush2.msra.mxu0 %v2637_v31  ;;  %v1992_v49 = vsel %vm1830_vm1, %v5906_v43, %v1991_v3 }
 0x26d   :  { %v1829_v34 = vsel %vm1828_vm0, %v5827_v5, %v1827_v0  ;;  %v1840_v26 = vsel %vm1828_vm0, %v5902_v21, %v1839_v16  ;;  %v6261_v42 = vrot.slane %v1625_v33, %v5519_v2  ;;  %v6264_v27 = vrot.slane %v1625_v33, %v5880_v6  ;;  %3057 = vmatprep.subr.mxu0 %v2636_v35 }
 0x26e   :  { %v1831_v5 = vsel %vm1830_vm1, %v5846_v10, %v1829_v34  ;;  %v1841_v21 = vsel %vm1830_vm1, %v5925_v50, %v1840_v26  ;;  %3058 = vmatpush2.msra.mxu0 %v2635_v7  ;;  %v6310_v60 = vrot.slane %v1631_v46, %v5519_v2  ;;  %v6313_v17 = vrot.slane %v1631_v46, %v5880_v6  ;;  %v2631_v34 = vld [vmem:[%s7717_s1 + $0x770] sm:$0xff] }
 0x26f   :  { %v1833_v47 = vsel %vm1832_vm2, %v5870_v58, %v1831_v5  ;;  %v1845_v41 = vsel %vm1824_vm14, %v6261_v42, %v5956_v14  ;;  %v2002_v10 = vsel %vm7730_vm6, %v6264_v27, %v2001_v1  ;;  %v1842_v58 = vsel %vm1832_vm2, %v5951_v55, %v1841_v21  ;;  %3059 = vmatprep.subr.mxu0 %v2634_v15  ;;  %v1500_v7 = vpop.permute.xlu1 %1499 }
 0x270   :  { %v1835_v19 = vsel %vm1834_vm5, %v5906_v43, %v1833_v47  ;;  %1874 = vst [vmem:[#allocation3 + $0x38] sm:$0x3] %v1845_v41  ;;  %2023 = vrot.lane.b32.xlu1 %v2002_v10, %s4376_s24  ;;  %v1578_v1 = vsel %vm1559_vm13, %v6119_v62, %v1549_v8  ;;  %v1843_v45 = vsel %vm1834_vm5, %v5975_v44, %v1842_v58  ;;  %v1551_v3 = vrot.slane %v6126_v40, 2  ;;  %v2633_v8 = vld [vmem:[%s7717_s1 + $0x780] sm:$0xff] }
 0x271   :  { %v6303_v53 = vsel %vm7730_vm6, %v5931_v51, %v1835_v19  ;;  %v1844_v62 = vsel %vm7730_vm6, %v5988_v28, %v1843_v45  ;;  %v2081_v57 = vsel %vm1828_vm0, %v5906_v43, %v2080_v29  ;;  %v6320_v33 = vrot.slane %v1633_v36, %v5519_v2  ;;  %v2632_v43 = vld [vmem:[%s7717_s1 + $0x778] sm:$0xff]  ;;  %3060 = vmatpush2.msra.mxu0 %v2633_v8 }
 0x272   :  { %v6323_v31 = vrot.slane %v1633_v36, %v5880_v6  ;;  %v6326_v37 = vpop.permute.xlu0 %1523  ;;  %1873 = vst.msk [vmem:[#allocation3 + $0x8] sm:$0xff] %vm1872_vm7, %v1844_v62  ;;  %v1915_v29 = vsel %vm1824_vm14, %v6271_v54, %v6310_v60  ;;  %v1922_v0 = vsel %vm1824_vm14, %v6291_v39, %v6313_v17  ;;  %v1634_v16 = vmax.f32 %v5670_v61, %v1578_v1  ;;  %v2629_v1 = vld [vmem:[%s7717_s1 + $0x760] sm:$0xff] }
 0x273   :  { %v1579_v35 = vsel %vm1559_vm13, %v6121_v4, %v1550_v59  ;;  %v1552_v26 = vrot.slane %v6130_v20, 2  ;;  %v2090_v46 = vsel %vm1832_vm2, %v6004_v24, %v6208_v23  ;;  %v1993_v5 = vsel %vm1832_vm2, %v5931_v51, %v1992_v49  ;;  %3061 = vmatprep.subr.mxu0 %v2632_v43  ;;  %v2630_v4 = vld [vmem:[%s7717_s1 + $0x768] sm:$0xff] }
 0x274   :  { %v2082_v61 = vsel %vm1830_vm1, %v5931_v51, %v2081_v57  ;;  %v1542_v21 = vrot.slane %v6286_v56, 2  ;;  %v6362_v15 = vsel %vm1830_vm1, %v5956_v14, %v6212_v52  ;;  %v6366_v23 = vsel %vm1834_vm5, %v5956_v14, %v1993_v5  ;;  %3062 = vmatpush2.msra.mxu0 %v2631_v34 }
 0x275   :  { %v6370_v36 = vsel %vm1832_vm2, %v5956_v14, %v2082_v61  ;;  %v1916_v51 = vsel %vm1826_vm15, %v6320_v33, %v1915_v29  ;;  %v1923_v47 = vsel %vm1826_vm15, %v6323_v31, %v1922_v0  ;;  %v1635_v41 = vmax.f32 %v5678_v22, %v1579_v35  ;;  %3063 = vmatprep.subr.mxu0 %v2630_v4  ;;  %v2628_v22 = vld [vmem:[%s7717_s1 + $0x758] sm:$0xff]  ;;  %v2626_v29 = vld [vmem:[%s7717_s1 + $0x748] sm:$0xff] }
 0x276   :  { %v1580_v52 = vsel %vm1559_vm13, %v6126_v40, %v1551_v3  ;;  %v1496_v10 = vpop.permute.xlu0 %1495  ;;  %v6380_v59 = vrot.slane %v1634_v16, %v5519_v2  ;;  %v1543_v19 = vrot.slane %v1500_v7, 2  ;;  %v1846_v58 = vsel %vm1824_vm14, %v6264_v27, %v6004_v24  ;;  %3064 = vmatpush2.msra.mxu0 %v2629_v1  ;;  %v2627_v3 = vld [vmem:[%s7717_s1 + $0x750] sm:$0xff] }
 0x277   :  { %v1541_v14 = vrot.slane %v1496_v10, 2  ;;  %v2005_v40 = vsel %vm1824_vm14, %v6320_v33, %v6271_v54  ;;  %v6397_v45 = vsel %vm1824_vm14, %v6323_v31, %v6291_v39  ;;  %v1581_v49 = vsel %vm1559_vm13, %v6130_v20, %v1552_v26  ;;  %1876 = vst.msk [vmem:[#allocation3 + $0x40] sm:$0x3] %vm1875_vm9, %v1846_v58  ;;  %3065 = vmatprep.subr.mxu0 %v2628_v22 }
 0x278   :  { %v6403_v62 = vrot.slane %v6168_v18, %v5880_v6  ;;  %v6410_v8 = vrot.slane %v1634_v16, %v5880_v6  ;;  %v6413_v43 = vmax.f32 %v5714_v11, %v1580_v52  ;;  %v1571_v20 = vsel %vm1559_vm13, %v6286_v56, %v1542_v21  ;;  %3066 = vmatpush2.msra.mxu0 %v2627_v3 }
 0x279   :  { %v1932_v57 = vpop.permute.xlu1 %1931  ;;  %v1570_v18 = vsel %vm1559_vm13, %v1496_v10, %v1541_v14  ;;  %v6423_v0 = vrot.slane %v1635_v41, %v5519_v2  ;;  %v6426_v16 = vrot.slane %v1635_v41, %v5880_v6  ;;  %v6430_v11 = vrot.slane %v6155_v13, %v5880_v6  ;;  %3067 = vmatprep.subr.mxu0 %v2626_v29  ;;  %v2625_v13 = vld [vmem:[%s7717_s1 + $0x740] sm:$0xff]  ;;  %v2622_v14 = vld [vmem:[%s7717_s1 + $0x728] sm:$0xff] }
 0x27a   :  { %1960 = vst.msk [vmem:[#allocation3 + $0x8] sm:$0xff] %vm1959_vm8, %v1932_v57  ;;  %v1626_v56 = vmax.f32 %v5943_v63, %v1570_v18  ;;  %v6433_v35 = vpop.permute.xlu0 %1525  ;;  %v6436_v34 = vmax.f32 %v5728_v32, %v1581_v49  ;;  %v1572_v26 = vsel %vm1559_vm13, %v1500_v7, %v1543_v19  ;;  %v1917_v5 = vsel %vm1828_vm0, %v6380_v59, %v1916_v51  ;;  %v2624_v63 = vld [vmem:[%s7717_s1 + $0x738] sm:$0xff]  ;;  %v2623_v51 = vld [vmem:[%s7717_s1 + $0x730] sm:$0xff] }
 0x27b   :  { %v2006_v61 = vsel %vm1826_vm15, %v6380_v59, %v2005_v40  ;;  %v6450_v32 = vmax.f32 %v5816_v9, %v1571_v20  ;;  %3068 = vmatpush2.msra.mxu0 %v2625_v13  ;;  %v1862_v41 = vsel %vm1824_vm14, %v6403_v62, %v6430_v11  ;;  %v6468_v9 = vrot.slane %v6413_v43, %v5519_v2 }
 0x27c   :  { %v6453_v7 = vrot.slane %v1626_v56, %v5519_v2  ;;  %v6456_v4 = vrot.slane %v1626_v56, %v5880_v6  ;;  %v2091_v52 = vsel %vm1834_vm5, %v6264_v27, %v2090_v46  ;;  %v1924_v10 = vsel %vm1828_vm0, %v6410_v8, %v1923_v47  ;;  %3069 = vmatprep.subr.mxu0 %v2624_v63 }
 0x27d   :  { %v6458_v21 = vpop.permute.xlu1 %1529  ;;  %v2095_v19 = vsel %vm1824_vm14, %v6380_v59, %v6320_v33  ;;  %1880 = vst.msk [vmem:[#allocation3 + $0xb0] sm:$0x3] %vm1875_vm9, %v1862_v41  ;;  %v1628_v58 = vmax.f32 %v5874_v12, %v1572_v26  ;;  %v2181_v22 = vsel %vm1832_vm2, %v6261_v42, %v6362_v15  ;;  %3070 = vmatpush2.msra.mxu0 %v2623_v51  ;;  %v2621_v15 = vld [vmem:[%s7717_s1 + $0x720] sm:$0xff]  ;;  %vm2143_vm9 = vcmask 1048368  }
 0x27e   :  { %v1502_v1 = vpop.permute.xlu0 %1501  ;;  %v2092_v46 = vsel %vm7730_vm6, %v6456_v4, %v2091_v52  ;;  %v1913_v47 = vsel %vm1824_vm14, %v6453_v7, %v6261_v42  ;;  %v2182_v12 = vsel %vm1834_vm5, %v6453_v7, %v2181_v22  ;;  %v1918_v49 = vsel %vm1830_vm1, %v6423_v0, %v1917_v5  ;;  %3071 = vmatprep.subr.mxu0 %v2622_v14  ;;  %v2619_v52 = vld [vmem:[%s7717_s1 + $0x710] sm:$0xff] }
 0x27f   :  { %v1544_v40 = vrot.slane %v1502_v1, 2  ;;  %2113 = vrot.lane.b32.xlu1 %v2092_v46, %s4377_s25  ;;  %1935 = vrot.lane.b32.xlu0 %v1913_v47, %s4375_s27  ;;  %v2007_v3 = vsel %vm1828_vm0, %v6423_v0, %v2006_v61  ;;  %v6503_v20 = vrot.slane %v6436_v34, %v5519_v2  ;;  %v6507_v18 = vrot.slane %v6450_v32, %v5519_v2  ;;  %v2620_v61 = vld [vmem:[%s7717_s1 + $0x718] sm:$0xff]  ;;  %v2618_v46 = vld [vmem:[%s7717_s1 + $0x708] sm:$0xff] }
 0x280   :  { %v1925_v26 = vsel %vm1830_vm1, %v6426_v16, %v1924_v10  ;;  %v2096_v5 = vsel %vm1826_vm15, %v6423_v0, %v2095_v19  ;;  %v1919_v41 = vsel %vm1832_vm2, %v6468_v9, %v1918_v49  ;;  %3072 = vmatpush2.msra.mxu0 %v2621_v15  ;;  %v6525_v10 = vrot.slane %v1628_v58, %v5519_v2 }
 0x281   :  { %v1934_v29 = vpop.permute.xlu1 %1933  ;;  %v2250_v56 = vld [vmem:[#allocation3 + $0x8] sm:$0xff]  ;;  %v1555_v19 = vrot.slane %v6326_v37, 2  ;;  %v1995_v14 = vsel %vm7730_vm6, %v6261_v42, %v6366_v23  ;;  %3073 = vmatprep.subr.mxu0 %v2620_v61  ;;  %v1573_v47 = vsel %vm1559_vm13, %v1502_v1, %v1544_v40  ;;  %v2617_v23 = vld [vmem:[%s7717_s1 + $0x700] sm:$0xff]  ;;  %v6549_v49 = vrot.slane %v6413_v43, %v5880_v6 }
 0x282   :  { %v1947_v13 = vsel %vm1872_vm7, %v1932_v57, %v1934_v29  ;;  %v2305_v63 = vcombine.low %v6303_v53, %v2250_v56  ;;  %v2306_v51 = vcombine.high %v6303_v53, %v2250_v56  ;;  %v6529_v57 = vpop.permute.xlu0 %1527  ;;  %v2183_v53 = vsel %vm7730_vm6, %v6507_v18, %v2182_v12  ;;  %3074 = vmatpush2.msra.mxu0 %v2619_v52 }
 0x283   :  { %1962 = vst.msk [vmem:[#allocation3 + $0x10] sm:$0xff] %vm1961_vm10, %v1947_v13  ;;  %2209 = vrot.lane.b32.xlu1 %v2183_v53, %s4378_s7  ;;  %2021 = vrot.lane.b32.xlu0 %v1995_v14, %s4376_s24  ;;  %v6553_v1 = vrot.slane %v6436_v34, %v5880_v6  ;;  %v1920_v40 = vsel %vm1834_vm5, %v6503_v20, %v1919_v41  ;;  %v2616_v34 = vld [vmem:[%s7717_s1 + $0x6f8] sm:$0xff] }
 0x284   :  { %v2315_v22 = vrot.slane %v2305_v63, %v5535_v25  ;;  %v2322_v12 = vrot.slane %v2306_v51, %v5535_v25  ;;  %v2008_v15 = vsel %vm1830_vm1, %v6468_v9, %v2007_v3  ;;  %v6560_v29 = vrot.slane %v1628_v58, %v5880_v6  ;;  %3075 = vmatprep.subr.mxu0 %v2618_v46  ;;  %v2615_v63 = vld [vmem:[%s7717_s1 + $0x6f0] sm:$0xff] }
 0x285   :  { %v2084_v56 = vsel %vm1834_vm5, %v6261_v42, %v6370_v36  ;;  %v1584_v3 = vsel %vm1559_vm13, %v6326_v37, %v1555_v19  ;;  %v6573_v13 = vmax.f32 %v6010_v48, %v1573_v47  ;;  %v2093_v42 = vsel %vm1824_vm14, %v6525_v10, %v6507_v18  ;;  %3076 = vmatpush2.msra.mxu0 %v2617_v23 }
 0x286   :  { %v2740_v43 = vrot.slane %v2315_v22, %v5535_v25  ;;  %v2754_v61 = vrot.slane %v2322_v12, %v5535_v25  ;;  %v1504_v58 = vpop.permute.xlu0 %1503  ;;  %v2085_v36 = vsel %vm7730_vm6, %v6453_v7, %v2084_v56  ;;  %v2009_v41 = vsel %vm1832_vm2, %v6503_v20, %v2008_v15  ;;  %3077 = vmatprep.subr.mxu0 %v2616_v34  ;;  %v2613_v15 = vld [vmem:[%s7717_s1 + $0x6e0] sm:$0xff] }
 0x287   :  { %v1545_v51 = vrot.slane %v1504_v58, 2  ;;  %2115 = vrot.lane.b32.xlu1 %v2093_v42, %s4377_s25  ;;  %2111 = vrot.lane.b32.xlu0 %v2085_v36, %s4377_s25  ;;  %v6589_v52 = vrot.slane %v6450_v32, %v5880_v6  ;;  %v1926_v19 = vsel %vm1832_vm2, %v6549_v49, %v1925_v26  ;;  %v2097_v53 = vsel %vm1828_vm0, %v6468_v9, %v2096_v5  ;;  %v2671_v26 = vld [vmem:[%s7717_s1 + $0x8b0] sm:$0xff]  ;;  %v2614_v5 = vld [vmem:[%s7717_s1 + $0x6e8] sm:$0xff] }
 0x288   :  { %v2762_v48 = vcombine.low %v2740_v43, %v2754_v61  ;;  %v2763_v37 = vcombine.high %v2740_v43, %v2754_v61  ;;  %v2013_v14 = vsel %vm1826_vm15, %v6410_v8, %v6397_v45  ;;  %v6599_v46 = vmax.f32 %v5912_v30, %v1584_v3  ;;  %3078 = vmatpush2.msra.mxu0 %v2615_v63  ;;  %v7737_v30 = vld [vmem:[#allocation12_spill] sm:$0xff]  ;;  %v2669_v34 = vld [vmem:[%s7717_s1 + $0x8a0] sm:$0xff]  ;;  %v2612_v3 = vld [vmem:[%s7717_s1 + $0x6d8] sm:$0xff] }
 0x289   :  { %v1574_v47 = vsel %vm1559_vm13, %v1504_v58, %v1545_v51  ;;  %v1921_v32 = vsel %vm7730_vm6, %v6195_v38, %v1920_v40  ;;  %v2164_v45 = vrot.slane %v6573_v13, %v5519_v2  ;;  %v2094_v12 = vsel %vm1824_vm14, %v6560_v29, %v6589_v52  ;;  %v2670_v40 = vld [vmem:[%s7717_s1 + $0x8a8] sm:$0xff]  ;;  %3079 = vmatprep.subr.mxu0 %v2614_v5  ;;  %v7738_v51 = vld [vmem:[#allocation13_spill] sm:$0xff] }
 0x28a   :  { %3002 = vmatprep.mubr.f32.mxu1 %v2763_v37  ;;  %v1630_v22 = vmax.f32 %v7737_v30, %v1574_v47  ;;  %v2010_v23 = vsel %vm1834_vm5, %v6195_v38, %v2009_v41  ;;  %v1927_v56 = vsel %vm1834_vm5, %v6553_v1, %v1926_v19  ;;  %v2014_v43 = vsel %vm1828_vm0, %v6426_v16, %v2013_v14  ;;  %v2668_v41 = vld [vmem:[%s7717_s1 + $0x898] sm:$0xff]  ;;  %v2611_v19 = vld [vmem:[%s7717_s1 + $0x6d0] sm:$0xff] }
 0x28b   :  { %3003 = vmatmul.mubr.f32.vlgmr.msra.gmra.mxu1 %v2762_v48  ;;  %1939 = vrot.lane.b32.xlu1 %v1921_v32, %s4375_s27  ;;  %v2102_v61 = vsel %vm1824_vm14, %v6410_v8, %v6323_v31  ;;  %v2098_v36 = vsel %vm1830_vm1, %v6503_v20, %v2097_v53  ;;  %v6645_v63 = vrot.slane %v6599_v46, %v5519_v2  ;;  %v2667_v32 = vld [vmem:[%s7717_s1 + $0x890] sm:$0xff] }
 0x28c   :  { %2117 = vrot.lane.b32.xlu0 %v2094_v12, %s4377_s25  ;;  %v1747_v58 = vrot.slane %v1630_v22, %v5519_v2  ;;  %v1751_v42 = vrot.slane %v1630_v22, %v5880_v6  ;;  %3105 = vmatpush1.msra.mxu1 %v2671_v26  ;;  %v2011_v48 = vsel %vm7730_vm6, %v7738_v51, %v2010_v23  ;;  %v2610_v26 = vld [vmem:[%s7717_s1 + $0x6c8] sm:$0xff]  ;;  %v2665_v23 = vld [vmem:[%s7717_s1 + $0x880] sm:$0xff] }
 0x28d   :  { %v2015_v37 = vsel %vm1830_vm1, %v6549_v49, %v2014_v43  ;;  %3106 = vmatprep.subr.mxu1 %v2670_v40  ;;  %3080 = vmatpush2.msra.mxu0 %v2613_v15  ;;  %v2191_v47 = vsel %vm1824_vm14, %v2164_v45, %v6525_v10  ;;  %v2666_v10 = vld [vmem:[%s7717_s1 + $0x888] sm:$0xff]  ;;  %v2609_v45 = vld [vmem:[%s7717_s1 + $0x6c0] sm:$0xff]  ;;  %v2099_v12 = vsel %vm1832_vm2, %v6195_v38, %v2098_v36  ;;  %v2664_v15 = vld [vmem:[%s7717_s1 + $0x878] sm:$0xff]  ;;  %v1556_v43 = vrot.slane %v6433_v35, 2 }
 0x28e   :  { %v1847_v53 = vsel %vm1824_vm14, %v6310_v60, %v1747_v58  ;;  %v1854_v14 = vsel %vm1824_vm14, %v6313_v17, %v1751_v42  ;;  %3107 = vmatpush1.msra.mxu1 %v2669_v34  ;;  %3081 = vmatprep.subr.mxu0 %v2612_v3  ;;  %v1928_v17 = vsel %vm7730_vm6, %v6430_v11, %v1927_v56  ;;  %v2663_v58 = vld [vmem:[%s7717_s1 + $0x870] sm:$0xff] }
 0x28f   :  { %v1848_v5 = vsel %vm1826_vm15, %v6271_v54, %v1847_v53  ;;  %v1855_v60 = vsel %vm1826_vm15, %v6291_v39, %v1854_v14  ;;  %2029 = vrot.lane.b32.xlu1 %v2011_v48, %s4376_s24  ;;  %v2016_v30 = vsel %vm1832_vm2, %v6553_v1, %v2015_v37  ;;  %3108 = vmatprep.subr.mxu1 %v2668_v41  ;;  %v2662_v53 = vld [vmem:[%s7717_s1 + $0x868] sm:$0xff] }
 0x290   :  { %2213 = vrot.lane.b32.xlu0 %v2191_v47, %s4378_s7  ;;  %v1849_v54 = vsel %vm1828_vm0, %v6320_v33, %v1848_v5  ;;  %v1856_v39 = vsel %vm1828_vm0, %v6323_v31, %v1855_v60  ;;  %3082 = vmatpush2.msra.mxu0 %v2611_v19  ;;  %v1929_v40 = vsel %vm1824_vm14, %v6645_v63, %v7738_v51  ;;  %v2660_v5 = vld [vmem:[%s7717_s1 + $0x858] sm:$0xff] }
 0x291   :  { %v1850_v22 = vsel %vm1830_vm1, %v6380_v59, %v1849_v54  ;;  %3109 = vmatpush1.msra.mxu1 %v2667_v32  ;;  %v1857_v33 = vsel %vm1830_vm1, %v6410_v8, %v1856_v39  ;;  %3083 = vmatprep.subr.mxu0 %v2610_v26  ;;  %v2017_v3 = vsel %vm1834_vm5, %v6430_v11, %v2016_v30  ;;  %v1557_v26 = vrot.slane %v6529_v57, 2 }
 0x292   :  { %v1851_v31 = vsel %vm1832_vm2, %v6423_v0, %v1850_v22  ;;  %3110 = vmatprep.subr.mxu1 %v2666_v10  ;;  %v1858_v56 = vsel %vm1832_vm2, %v6426_v16, %v1857_v33  ;;  %3084 = vmatpush2.msra.mxu0 %v2609_v45  ;;  %v2100_v37 = vsel %vm1834_vm5, %v7738_v51, %v2099_v12  ;;  %v2659_v10 = vld [vmem:[%s7717_s1 + $0x850] sm:$0xff]  ;;  %v7740_v12 = vld [vmem:[#allocation11_spill] sm:$0xff] }
 0x293   :  { %v1852_v34 = vsel %vm1834_vm5, %v6468_v9, %v1851_v31  ;;  %1943 = vrot.lane.b32.xlu1 %v1929_v40, %s4375_s27  ;;  %v1859_v42 = vsel %vm1834_vm5, %v6549_v49, %v1858_v56  ;;  %3111 = vmatpush1.msra.mxu1 %v2665_v23  ;;  %v2200_v41 = vsel %vm1824_vm14, %v6426_v16, %v6410_v8  ;;  %v2654_v31 = vld [vmem:[%s7717_s1 + $0x828] sm:$0xff]  ;;  %v1558_v56 = vrot.slane %v6458_v21, 2 }
 0x294   :  { %1941 = vrot.lane.b32.xlu0 %v1928_v17, %s4375_s27  ;;  %v6722_v36 = vsel %vm7730_vm6, %v6503_v20, %v1852_v34  ;;  %v1860_v48 = vsel %vm7730_vm6, %v6553_v1, %v1859_v42  ;;  %v2103_v19 = vsel %vm1826_vm15, %v6426_v16, %v2102_v61  ;;  %3112 = vmatprep.subr.mxu1 %v2664_v15  ;;  %v2661_v16 = vld [vmem:[%s7717_s1 + $0x860] sm:$0xff] }
 0x295   :  { %1878 = vst.msk [vmem:[#allocation3 + $0x78] sm:$0xff] %vm1872_vm7, %v1860_v48  ;;  %v2101_v14 = vsel %vm7730_vm6, %v6645_v63, %v2100_v37  ;;  %v2018_v47 = vsel %vm7730_vm6, %v6403_v62, %v2017_v3  ;;  %v2201_v32 = vsel %vm1826_vm15, %v6549_v49, %v2200_v41  ;;  %v2104_v8 = vsel %vm1828_vm0, %v6549_v49, %v2103_v19 }
 0x296   :  { %3113 = vmatpush1.msra.mxu1 %v2663_v58  ;;  %v1585_v61 = vsel %vm1559_vm13, %v6433_v35, %v1556_v43  ;;  %v2193_v49 = vsel %vm1824_vm14, %v6423_v0, %v6380_v59  ;;  %v2202_v60 = vsel %vm1828_vm0, %v6553_v1, %v2201_v32  ;;  %v2105_v35 = vsel %vm1830_vm1, %v6553_v1, %v2104_v8  ;;  %v7739_v59 = vld [vmem:[#allocation9_spill] sm:$0xff]  ;;  %v2653_v58 = vld [vmem:[%s7717_s1 + $0x820] sm:$0xff] }
 0x297   :  { %2119 = vrot.lane.b32.xlu1 %v2101_v14, %s4377_s25  ;;  %3114 = vmatprep.subr.mxu1 %v2662_v53  ;;  %v2194_v17 = vsel %vm1826_vm15, %v6468_v9, %v2193_v49  ;;  %v6770_v45 = vrot.slane %v6599_v46, %v5880_v6  ;;  %v1641_v0 = vmax.f32 %v7739_v59, %v1585_v61  ;;  %v2658_v9 = vld [vmem:[%s7717_s1 + $0x848] sm:$0xff]  ;;  %v2657_v46 = vld [vmem:[%s7717_s1 + $0x840] sm:$0xff] }
 0x298   :  { %2031 = vrot.lane.b32.xlu0 %v2018_v47, %s4376_s24  ;;  %3115 = vmatpush1.msra.mxu1 %v2661_v16  ;;  %v1914_v54 = vsel %vm1824_vm14, %v6456_v4, %v6264_v27  ;;  %v2003_v1 = vsel %vm1824_vm14, %v6507_v18, %v6453_v7  ;;  %v1586_v39 = vsel %vm1559_vm13, %v6529_v57, %v1557_v26  ;;  %v2656_v57 = vld [vmem:[%s7717_s1 + $0x838] sm:$0xff]  ;;  %v2650_v14 = vld [vmem:[%s7717_s1 + $0x808] sm:$0xff] }
 0x299   :  { %3116 = vmatprep.subr.mxu1 %v2660_v5  ;;  %v2203_v7 = vsel %vm1830_vm1, %v6430_v11, %v2202_v60  ;;  %v2106_v18 = vsel %vm1832_vm2, %v6430_v11, %v2105_v35  ;;  %v2195_v30 = vsel %vm1828_vm0, %v6503_v20, %v2194_v17  ;;  %v6799_v22 = vrot.slane %v1641_v0, %v5880_v6  ;;  %v2655_v20 = vld [vmem:[%s7717_s1 + $0x830] sm:$0xff]  ;;  %v7741_v8 = vld [vmem:[#allocation10_spill] sm:$0xff] }
 0x29a   :  { %3117 = vmatpush1.msra.mxu1 %v2659_v10  ;;  %v1642_v23 = vmax.f32 %v7740_v12, %v1586_v39  ;;  %v2004_v33 = vsel %vm1824_vm14, %v6589_v52, %v6456_v4  ;;  %v1930_v11 = vsel %vm1824_vm14, %v6770_v45, %v6403_v62  ;;  %v2204_v40 = vsel %vm1832_vm2, %v6403_v62, %v2203_v7  ;;  %v2647_v5 = vld [vmem:[%s7717_s1 + $0x7f0] sm:$0xff]  ;;  %v2645_v17 = vld [vmem:[%s7717_s1 + $0x7e0] sm:$0xff] }
 0x29b   :  { %1937 = vrot.lane.b32.xlu1 %v1914_v54, %s4375_s27  ;;  %3118 = vmatprep.subr.mxu1 %v2658_v9  ;;  %v2184_v15 = vsel %vm1824_vm14, %v5951_v55, %v5925_v50  ;;  %v2205_v43 = vsel %vm1834_vm5, %v6770_v45, %v2204_v40  ;;  %v2107_v34 = vsel %vm1834_vm5, %v6403_v62, %v2106_v18  ;;  %v2651_v62 = vld [vmem:[%s7717_s1 + $0x810] sm:$0xff]  ;;  %v2700_v18 = vld [vmem:[%s7717_s1 + $0x998] sm:$0xff]  ;;  %v2689_v40 = vld [vmem:[%s7717_s1 + $0x940] sm:$0xff] }
 0x29c   :  { %2025 = vrot.lane.b32.xlu0 %v2003_v1, %s4376_s24  ;;  %3119 = vmatpush1.msra.mxu1 %v2657_v46  ;;  %v2196_v3 = vsel %vm1830_vm1, %v6195_v38, %v2195_v30  ;;  %v1984_v42 = vrot.slane %v1641_v0, %v5519_v2  ;;  %v2074_v50 = vrot.slane %v1642_v23, %v5519_v2  ;;  %v2652_v38 = vld [vmem:[%s7717_s1 + $0x818] sm:$0xff]  ;;  %v2642_v0 = vld [vmem:[%s7717_s1 + $0x7c8] sm:$0xff]  ;;  %v2703_v7 = vld [vmem:[%s7717_s1 + $0x9b0] sm:$0xff] }
 0x29d   :  { %3120 = vmatprep.subr.mxu1 %v2656_v57  ;;  %v2206_v55 = vsel %vm7730_vm6, %v6799_v22, %v2205_v43  ;;  %v2108_v48 = vsel %vm7730_vm6, %v6770_v45, %v2107_v34  ;;  %v2197_v37 = vsel %vm1832_vm2, %v7738_v51, %v2196_v3  ;;  %v1587_v41 = vsel %vm1559_vm13, %v6458_v21, %v1558_v56  ;;  %v2649_v21 = vld [vmem:[%s7717_s1 + $0x800] sm:$0xff]  ;;  %v2704_v46 = vld [vmem:[%s7717_s1 + $0x9b8] sm:$0xff]  ;;  %v2699_v30 = vld [vmem:[%s7717_s1 + $0x990] sm:$0xff] }
 0x29e   :  { %3121 = vmatpush1.msra.mxu1 %v2655_v20  ;;  %v2198_v19 = vsel %vm1834_vm5, %v6645_v63, %v2197_v37  ;;  %v2185_v53 = vsel %vm1826_vm15, %v5975_v44, %v2184_v15  ;;  %v2078_v47 = vrot.slane %v1642_v23, %v5880_v6  ;;  %v2109_v51 = vsel %vm1824_vm14, %v2074_v50, %v1984_v42  ;;  %v2648_v44 = vld [vmem:[%s7717_s1 + $0x7f8] sm:$0xff]  ;;  %v2698_v57 = vld [vmem:[%s7717_s1 + $0x988] sm:$0xff]  ;;  %v2695_v12 = vld [vmem:[%s7717_s1 + $0x970] sm:$0xff] }
 0x29f   :  { %2027 = vrot.lane.b32.xlu1 %v2004_v33, %s4376_s24  ;;  %3122 = vmatprep.subr.mxu1 %v2654_v31  ;;  %v2199_v32 = vsel %vm7730_vm6, %v1984_v42, %v2198_v19  ;;  %v1643_v16 = vmax.f32 %v7741_v8, %v1587_v41  ;;  %v2186_v61 = vsel %vm1828_vm0, %v5988_v28, %v2185_v53  ;;  %v2646_v28 = vld [vmem:[%s7717_s1 + $0x7e8] sm:$0xff]  ;;  %v2693_v33 = vld [vmem:[%s7717_s1 + $0x960] sm:$0xff]  ;;  %v2691_v20 = vld [vmem:[%s7717_s1 + $0x950] sm:$0xff]  ;;  %vm1963_vm13 = vcmask 1041680  }
 0x2a0   :  { %1945 = vrot.lane.b32.xlu0 %v1930_v11, %s4375_s27  ;;  %3123 = vmatpush1.msra.mxu1 %v2653_v58  ;;  %v2187_v26 = vsel %vm1830_vm1, %v6004_v24, %v2186_v61  ;;  %v2110_v49 = vsel %vm1824_vm14, %v2078_v47, %v6799_v22  ;;  %v2019_v60 = vsel %vm1824_vm14, %v1984_v42, %v6645_v63  ;;  %v2694_v23 = vld [vmem:[%s7717_s1 + $0x968] sm:$0xff]  ;;  %v2692_v11 = vld [vmem:[%s7717_s1 + $0x958] sm:$0xff]  ;;  %v2687_v56 = vld [vmem:[%s7717_s1 + $0x930] sm:$0xff]  ;;  %vm2237_vm15 = vcmask 1047616  }
 0x2a1   :  { %3124 = vmatprep.subr.mxu1 %v2652_v38  ;;  %v2188_v35 = vsel %vm1832_vm2, %v6264_v27, %v2187_v26  ;;  %v2172_v63 = vrot.slane %v1643_v16, %v5519_v2  ;;  %v2644_v27 = vld [vmem:[%s7717_s1 + $0x7d8] sm:$0xff]  ;;  %v2176_v54 = vrot.slane %v1643_v16, %v5880_v6  ;;  %v2168_v1 = vrot.slane %v6573_v13, %v5880_v6  ;;  %v2702_v6 = vld [vmem:[%s7717_s1 + $0x9a8] sm:$0xff]  ;;  %v2701_v13 = vld [vmem:[%s7717_s1 + $0x9a0] sm:$0xff] }
 0x2a2   :  { %3125 = vmatpush1.msra.mxu1 %v2651_v62  ;;  %v2189_v24 = vsel %vm1834_vm5, %v6456_v4, %v2188_v35  ;;  %v2643_v4 = vld [vmem:[%s7717_s1 + $0x7d0] sm:$0xff]  ;;  %v2020_v9 = vsel %vm1824_vm14, %v6799_v22, %v6770_v45  ;;  %v2696_v22 = vld [vmem:[%s7717_s1 + $0x978] sm:$0xff]  ;;  %v2690_v31 = vld [vmem:[%s7717_s1 + $0x948] sm:$0xff]  ;;  %vm2049_vm1 = vcmask 1048096   ;;  %vm2051_vm5 = vcmask 834560  }
 0x2a3   :  { %2219 = vrot.lane.b32.xlu1 %v2206_v55, %s4378_s7  ;;  %3126 = vmatprep.subr.mxu1 %v2650_v14  ;;  %v2207_v10 = vsel %vm1824_vm14, %v2172_v63, %v2074_v50  ;;  %v2190_v59 = vsel %vm7730_vm6, %v6589_v52, %v2189_v24  ;;  %v2641_v52 = vld [vmem:[%s7717_s1 + $0x7c0] sm:$0xff]  ;;  %v2208_v39 = vsel %vm1824_vm14, %v2176_v54, %v2078_v47  ;;  %v2688_v15 = vld [vmem:[%s7717_s1 + $0x938] sm:$0xff]  ;;  %v2686_v43 = vld [vmem:[%s7717_s1 + $0x928] sm:$0xff]  ;;  %vm2148_vm6 = vcmask 1042224  }
 0x2a4   :  { %2121 = vrot.lane.b32.xlu0 %v2108_v48, %s4377_s25  ;;  %3127 = vmatpush1.msra.mxu1 %v2649_v21  ;;  %v2192_v45 = vsel %vm1824_vm14, %v2168_v1, %v6560_v29  ;;  %v2697_v29 = vld [vmem:[%s7717_s1 + $0x980] sm:$0xff]  ;;  %v2684_v3 = vld [vmem:[%s7717_s1 + $0x918] sm:$0xff]  ;;  %v2683_v58 = vld [vmem:[%s7717_s1 + $0x910] sm:$0xff] }
 0x2a5   :  { %3128 = vmatprep.subr.mxu1 %v2648_v44  ;;  %v2685_v34 = vld [vmem:[%s7717_s1 + $0x920] sm:$0xff]  ;;  %v2682_v42 = vld [vmem:[%s7717_s1 + $0x908] sm:$0xff]  ;;  %v2680_v55 = vld [vmem:[%s7717_s1 + $0x8f8] sm:$0xff] }
 0x2a6   :  { %3129 = vmatpush1.msra.mxu1 %v2647_v5  ;;  %v2681_v50 = vld [vmem:[%s7717_s1 + $0x900] sm:$0xff]  ;;  %v2679_v48 = vld [vmem:[%s7717_s1 + $0x8f0] sm:$0xff]  ;;  %v2678_v38 = vld [vmem:[%s7717_s1 + $0x8e8] sm:$0xff] }
 0x2a7   :  { %2123 = vrot.lane.b32.xlu1 %v2109_v51, %s4377_s25  ;;  %3130 = vmatprep.subr.mxu1 %v2646_v28  ;;  %v2677_v62 = vld [vmem:[%s7717_s1 + $0x8e0] sm:$0xff]  ;;  %v2676_v37 = vld [vmem:[%s7717_s1 + $0x8d8] sm:$0xff]  ;;  %v2675_v41 = vld [vmem:[%s7717_s1 + $0x8d0] sm:$0xff] }
 0x2a8   :  { %2217 = vrot.lane.b32.xlu0 %v2199_v32, %s4378_s7  ;;  %3131 = vmatpush1.msra.mxu1 %v2645_v17  ;;  %v2674_v19 = vld [vmem:[%s7717_s1 + $0x8c8] sm:$0xff]  ;;  %v2673_v53 = vld [vmem:[%s7717_s1 + $0x8c0] sm:$0xff]  ;;  %v2716_v14 = vld [vmem:[%s7717_s1 + $0xa18] sm:$0x3] }
 0x2a9   :  { %3132 = vmatprep.subr.mxu1 %v2644_v27 }
 0x2aa   :  { %3133 = vmatpush1.msra.mxu1 %v2643_v4 }
 0x2ab   :  { %2033 = vrot.lane.b32.xlu1 %v2019_v60, %s4376_s24  ;;  %3134 = vmatprep.subr.mxu1 %v2642_v0 }
 0x2ac   :  { %2125 = vrot.lane.b32.xlu0 %v2110_v49, %s4377_s25  ;;  %3135 = vmatpush1.msra.mxu1 %v2641_v52 }
 0x2ad   :  { %3136 = vmatprep.subr.mxu1 %v2704_v46 }
 0x2ae   :  { %3137 = vmatpush2.msra.mxu1 %v2703_v7 }
 0x2af   :  { %2211 = vrot.lane.b32.xlu1 %v2190_v59, %s4378_s7  ;;  %3138 = vmatprep.subr.mxu1 %v2702_v6 }
 0x2b0   :  { %2221 = vrot.lane.b32.xlu0 %v2207_v10, %s4378_s7  ;;  %3139 = vmatpush2.msra.mxu1 %v2701_v13 }
 0x2b1   :  { %3140 = vmatprep.subr.mxu1 %v2700_v18 }
 0x2b2   :  { %3141 = vmatpush2.msra.mxu1 %v2699_v30 }
 0x2b3   :  { %2223 = vrot.lane.b32.xlu1 %v2208_v39, %s4378_s7  ;;  %3142 = vmatprep.subr.mxu1 %v2698_v57 }
 0x2b4   :  { %2035 = vrot.lane.b32.xlu0 %v2020_v9, %s4376_s24  ;;  %3143 = vmatpush2.msra.mxu1 %v2697_v29  ;;  %s4384_s24 = smov [#allocation5]  }
 0x2b5   :  { %3144 = vmatprep.subr.mxu1 %v2696_v22 }
 0x2b6   :  { %3145 = vmatpush2.msra.mxu1 %v2695_v12 }
 0x2b7   :  { %3146 = vmatprep.subr.mxu1 %v2694_v23 }
 0x2b8   :  { %2215 = vrot.lane.b32.xlu0 %v2192_v45, %s4378_s7  ;;  %3147 = vmatpush2.msra.mxu1 %v2693_v33 }
 0x2b9   :  { %3148 = vmatprep.subr.mxu1 %v2692_v11 }
 0x2ba   :  { %3149 = vmatpush2.msra.mxu1 %v2691_v20 }
 0x2bb   :  { %3150 = vmatprep.subr.mxu1 %v2690_v31 }
 0x2bc   :  { %3151 = vmatpush2.msra.mxu1 %v2689_v40 }
 0x2bd   :  { %3152 = vmatprep.subr.mxu1 %v2688_v15 }
 0x2be   :  { %3153 = vmatpush2.msra.mxu1 %v2687_v56 }
 0x2bf   :  { %3154 = vmatprep.subr.mxu1 %v2686_v43 }
 0x2c0   :  { %3155 = vmatpush2.msra.mxu1 %v2685_v34 }
 0x2c1   :  { %3156 = vmatprep.subr.mxu1 %v2684_v3 }
 0x2c2   :  { %3157 = vmatpush2.msra.mxu1 %v2683_v58 }
 0x2c3   :  { %3158 = vmatprep.subr.mxu1 %v2682_v42 }
 0x2c4   :  { %3159 = vmatpush2.msra.mxu1 %v2681_v50 }
 0x2c5   :  { %3160 = vmatprep.subr.mxu1 %v2680_v55 }
 0x2c6   :  { %3161 = vmatpush2.msra.mxu1 %v2679_v48 }
 0x2c7   :  { %3162 = vmatprep.subr.mxu1 %v2678_v38 }
 0x2c8   :  { %3163 = vmatpush2.msra.mxu1 %v2677_v62 }
 0x2c9   :  { %3164 = vmatprep.subr.mxu1 %v2676_v37 }
 0x2ca   :  { %3165 = vmatpush2.msra.mxu1 %v2675_v41 }
 0x2cb   :  { %3166 = vmatprep.subr.mxu1 %v2674_v19 }
 0x2cc   :  { %3167 = vmatpush2.msra.mxu1 %v2673_v53 }
 0x2cd   :  { %4137 = vmatprep.subr.msk.mxu1 %vm2931_vm11, %v2716_v14 }
 0x2e2   :  { %v2024_v47 = vpop.permute.xlu1 %2023 }
 0x2f1   :  { %v2114_v32 = vpop.permute.xlu1 %2113  ;;  %v1936_v51 = vpop.permute.xlu0 %1935 }
 0x2f2   :  { %2147 = vst.msk [vmem:[#allocation3 + $0x28] sm:$0xff] %vm2146_vm12, %v2114_v32 }
 0x2f3   :  { %1964 = vst.msk [vmem:[#allocation3 + $0x40] sm:$0x3] %vm1963_vm13, %v1936_v51 }
 0x2f5   :  { %v7023_v21 = vpop.permute.xlu1 %2209  ;;  %v2022_v44 = vpop.permute.xlu0 %2021 }
 0x2f6   :  { %2238 = vst.msk [vmem:[#allocation3 + $0x28] sm:$0xff] %vm2237_vm15, %v7023_v21  ;;  %v2037_v8 = vsel %vm1961_vm10, %v2022_v44, %v2024_v47 }
 0x2f7   :  { %2050 = vst.msk [vmem:[#allocation3 + $0x10] sm:$0xff] %vm2049_vm1, %v2022_v44 }
 0x2f8   :  { %2052 = vst.msk [vmem:[#allocation3 + $0x18] sm:$0xff] %vm2051_vm5, %v2037_v8 }
 0x2f9   :  { %v2116_v16 = vpop.permute.xlu1 %2115  ;;  %v2112_v61 = vpop.permute.xlu0 %2111 }
 0x2fa   :  { %v7031_v26 = vsel %vm2051_vm5, %v2112_v61, %v2114_v32  ;;  %2144 = vst.msk [vmem:[#allocation3 + $0x18] sm:$0xff] %vm2143_vm9, %v2112_v61  ;;  %v4337_v29 = vld [vmem:[#allocation3 + $0x38] ss:$8 sps:$4 sm:$0x33]  }
 0x2fb   :  { %v2384_v3 = vrot.slane %v4337_v29, %v5535_v25 }
 0x2fd   :  { %v1940_v5 = vpop.permute.xlu1 %1939  ;;  %v2254_v33 = vld [vmem:[#allocation3 + $0x28] sm:$0xff] }
 0x2fe   :  { %v2118_v49 = vpop.permute.xlu0 %2117  ;;  %1967 = vst.msk [vmem:[#allocation3 + $0x78] sm:$0xff] %vm1959_vm8, %v1940_v5  ;;  %vm1965_vm8 = vcmask 549888   ;;  %v2341_v58 = vcombine.low %v7031_v26, %v2254_v33  ;;  %v2342_v48 = vcombine.high %v7031_v26, %v2254_v33 }
 0x2ff   :  { %v2128_v60 = vsel %vm2051_vm5, %v2116_v16, %v2118_v49  ;;  %2152 = vst.msk [vmem:[#allocation3 + $0x60] sm:$0x3] %vm2151_vm3, %v2118_v49 }
 0x300   :  { %2150 = vst [vmem:[#allocation3 + $0x58] sm:$0x3] %v2128_v60  ;;  %v2350_v44 = vrot.slane %v2341_v58, %v5535_v25  ;;  %v2357_v8 = vrot.slane %v2342_v48, %v5535_v25  ;;  %v2713_v58 = vld [vmem:[%s7717_s1 + $0xa00] sm:$0xff] }
 0x301   :  { %v2030_v35 = vpop.permute.xlu1 %2029  ;;  %v4334_v24 = vld [vmem:[#allocation3 + $0x10] ss:$8 sps:$4 sm:$0xff]   ;;  %v4336_v17 = vld [vmem:[#allocation3 + $0x14] ss:$8 sps:$4 sm:$0xff]  }
 0x302   :  { %v7037_v28 = vpop.permute.xlu0 %2213  ;;  %v2329_v63 = vrot.slane %v4334_v24, %v5535_v25  ;;  %v2336_v27 = vrot.slane %v4336_v17, %v5535_v25 }
 0x303   :  { %2242 = vst.msk [vmem:[#allocation3 + $0x60] sm:$0x3] %vm2241_vm4, %v7037_v28 }
 0x304   :  { %v2747_v4 = vrot.slane %v2329_v63, %v5535_v25  ;;  %v2761_v0 = vrot.slane %v2336_v27, %v5535_v25 }
 0x305   :  { %v1944_v10 = vpop.permute.xlu1 %1943  ;;  %v2264_v7 = vld [vmem:[#allocation3 + $0x78] sm:$0xff] }
 0x306   :  { %v1942_v59 = vpop.permute.xlu0 %1941  ;;  %1969 = vst.msk [vmem:[#allocation3 + $0xb0] sm:$0x3] %vm1963_vm13, %v1944_v10  ;;  %v2764_v52 = vcombine.low %v2747_v4, %v2761_v0  ;;  %v2765_v1 = vcombine.high %v2747_v4, %v2761_v0  ;;  %vm2053_vm13 = vcmask 1041952   ;;  %v2409_v18 = vcombine.low %v6722_v36, %v2264_v7 }
 0x307   :  { %v1949_v54 = vsel %vm1872_vm7, %v1940_v5, %v1942_v59  ;;  %v2410_v23 = vcombine.high %v6722_v36, %v2264_v7  ;;  %v2776_v59 = vrot.slane %v2350_v44, %v5535_v25  ;;  %v2790_v4 = vrot.slane %v2357_v8, %v5535_v25  ;;  %v2709_v8 = vld [vmem:[%s7717_s1 + $0x9e0] sm:$0xff] }
 0x308   :  { %1968 = vst.msk [vmem:[#allocation3 + $0x80] sm:$0xff] %vm1961_vm10, %v1949_v54  ;;  %3085 = vmatprep.mubr.f32.mxu0 %v2765_v1  ;;  %v2419_v40 = vrot.slane %v2409_v18, %v5535_v25 }
 0x309   :  { %2057 = vst.msk [vmem:[#allocation3 + $0x80] sm:$0xff] %vm2049_vm1, %v2030_v35  ;;  %v2120_v9 = vpop.permute.xlu1 %2119  ;;  %3086 = vmatmul.mubr.f32.vlgmr.msra.gmra.mxu0 %v2764_v52  ;;  %vm2055_vm1 = vcmask 828416   ;;  %v2426_v50 = vrot.slane %v2410_v23, %v5535_v25 }
 0x30a   :  { %v2032_v39 = vpop.permute.xlu0 %2031  ;;  %v4125_v62 = vcombine.low %v2384_v3, %v2419_v40  ;;  %v4342_v54 = vld [vmem:[#allocation3 + $0x58] ss:$8 sps:$4 sm:$0x33]  }
 0x30b   :  { %v2039_v46 = vsel %vm1961_vm10, %v2030_v35, %v2032_v39 }
 0x30c   :  { %2058 = vst.msk [vmem:[#allocation3 + $0x88] sm:$0xff] %vm2051_vm5, %v2039_v46 }
 0x30d   :  { %2153 = vst.msk [vmem:[#allocation3 + $0x88] sm:$0xff] %vm2143_vm9, %v2120_v9  ;;  %v1938_v6 = vpop.permute.xlu1 %1937  ;;  %v4340_v56 = vld [vmem:[#allocation3 + $0xa8] ss:$8 sps:$4 sm:$0x33]  }
 0x30e   :  { %v2026_v13 = vpop.permute.xlu0 %2025  ;;  %v1948_v45 = vsel %vm1872_vm7, %v1936_v51, %v1938_v6  ;;  %v7077_v41 = vrot.slane %v4340_v56, %v5535_v25  ;;  %v2799_v6 = vcombine.high %v2776_v59, %v2790_v4 }
 0x30f   :  { %1966 = vst.msk [vmem:[#allocation3 + $0x48] sm:$0x3] %vm1965_vm8, %v1948_v45 }
 0x310   :  { %2054 = vst.msk [vmem:[#allocation3 + $0x48] sm:$0x3] %vm2053_vm13, %v2026_v13  ;;  %v2265_v11 = vld [vmem:[#allocation3 + $0x80] sm:$0xff] }
 0x311   :  { %v2028_v30 = vpop.permute.xlu1 %2027 }
 0x312   :  { %v1946_v57 = vpop.permute.xlu0 %1945  ;;  %v2038_v22 = vsel %vm1961_vm10, %v2026_v13, %v2028_v30 }
 0x313   :  { %v1950_v12 = vsel %vm1872_vm7, %v1944_v10, %v1946_v57  ;;  %2056 = vst.msk [vmem:[#allocation3 + $0x50] sm:$0x3] %vm2055_vm1, %v2038_v22  ;;  %vm2239_vm7 = vcmask 343040  }
 0x314   :  { %1970 = vst.msk [vmem:[#allocation3 + $0xb8] sm:$0x3] %vm1965_vm8, %v1950_v12  ;;  %v2266_v20 = vld [vmem:[#allocation3 + $0x88] sm:$0xff]  ;;  %vm3473_vm8 = vcmask 130048  }
 0x315   :  { %v4338_v31 = vld [vmem:[#allocation3 + $0x80] ss:$8 sps:$4 sm:$0xff]   ;;  %2149 = vst.msk [vmem:[#allocation3 + $0x50] sm:$0x3] %vm2148_vm6, %v2116_v16  ;;  %v2412_v15 = vcombine.high %v2265_v11, %v2266_v20  ;;  %v2220_v43 = vpop.permute.xlu1 %2219  ;;  %v2811_v16 = vrot.slane %v4125_v62, %v5535_v25  ;;  %v2798_v11 = vcombine.low %v2776_v59, %v2790_v4 }
 0x316   :  { %v2122_v34 = vpop.permute.xlu0 %2121  ;;  %v2433_v36 = vrot.slane %v4338_v31, %v5535_v25 }
 0x317   :  { %v7067_v42 = vsel %vm2051_vm5, %v2120_v9, %v2122_v34  ;;  %2155 = vst.msk [vmem:[#allocation3 + $0x98] sm:$0xff] %vm2146_vm12, %v2122_v34  ;;  %v7072_v55 = vrot.slane %v2412_v15, %v5535_v25  ;;  %v2715_v15 = vld [vmem:[%s7717_s1 + $0xa10] sm:$0x3]  ;;  %v2714_v34 = vld [vmem:[%s7717_s1 + $0xa08] sm:$0xff] }
 0x318   :  { %v2442_v38 = vcombine.high %v2419_v40, %v2433_v36 }
 0x319   :  { %v2444_v37 = vcombine.high %v2426_v50, %v7072_v55  ;;  %v7079_v19 = vpop.permute.xlu1 %2123  ;;  %v2443_v47 = vcombine.low %v2426_v50, %v7072_v55 }
 0x31a   :  { %v2218_v53 = vpop.permute.xlu0 %2217  ;;  %v4127_v14 = vcombine.low %v2442_v38, %v2426_v50  ;;  %v2712_v50 = vld [vmem:[%s7717_s1 + $0x9f8] sm:$0xff] }
 0x31b   :  { %v2227_v32 = vsel %vm2146_vm12, %v2218_v53, %v2220_v43  ;;  %2245 = vst.msk [vmem:[#allocation3 + $0x98] sm:$0xff] %vm2237_vm15, %v2218_v53  ;;  %v4133_v51 = vcombine.low %v2444_v37, %v7077_v41  ;;  %v4128_v63 = vcombine.high %v2433_v36, %v2443_v47  ;;  %vm3458_vm15 = vcmask 125954  }
 0x31c   :  { %2246 = vst.msk [vmem:[#allocation3 + $0xa0] sm:$0xff] %vm2239_vm7, %v2227_v32  ;;  %v2825_v61 = vrot.slane %v4127_v14, %v5535_v25  ;;  %v4341_v26 = vld [vmem:[#allocation3 + $0x48] ss:$8 sps:$4 sm:$0x33]   ;;  %vm3459_vm9 = vmor %vm3458_vm15, %vm2931_vm11  ;;  %vm3532_vm15 = vcmask 1041920  }
 0x31d   :  { %v2880_v5 = vrot.slane %v4133_v51, %v5535_v25  ;;  %v2034_v49 = vpop.permute.xlu1 %2033  ;;  %v2391_v17 = vrot.slane %v4341_v26, %v5535_v25  ;;  %v2832_v39 = vrot.slane %v4128_v63, %v5535_v25  ;;  %v2710_v14 = vld [vmem:[%s7717_s1 + $0x9e8] sm:$0xff] }
 0x31e   :  { %v2126_v60 = vpop.permute.xlu0 %2125  ;;  %v2834_v35 = vcombine.high %v2811_v16, %v2825_v61  ;;  %v2833_v24 = vcombine.low %v2811_v16, %v2825_v61  ;;  %2059 = vst.msk [vmem:[#allocation3 + $0xb8] sm:$0x3] %vm2053_vm13, %v2034_v49  ;;  %v2708_v61 = vld [vmem:[%s7717_s1 + $0x9d8] sm:$0xff]  ;;  %vm3495_vm13 = vcmask 388098  }
 0x31f   :  { %v2130_v27 = vsel %vm2051_vm5, %v7079_v19, %v2126_v60  ;;  %2158 = vst.msk [vmem:[#allocation3 + $0xd0] sm:$0x3] %vm2151_vm3, %v2126_v60  ;;  %v2888_v10 = vcombine.high %v2880_v5, %v2880_v5  ;;  %v4126_v0 = vcombine.low %v2391_v17, %v2433_v36  ;;  %vm2243_vm3 = vcmask 336896  }
 0x320   :  { %2157 = vst [vmem:[#allocation3 + $0xc8] sm:$0x3] %v2130_v27  ;;  %3008 = vmatprep.mubr.f32.mxu1 %v2834_v35  ;;  %v2706_v35 = vld [vmem:[%s7717_s1 + $0x9c8] sm:$0xff] }
 0x321   :  { %3009 = vmatmul.mubr.f32.gmra.mxu1 %v2833_v24  ;;  %v2212_v52 = vpop.permute.xlu1 %2211  ;;  %v2818_v9 = vrot.slane %v4126_v0, %v5535_v25 }
 0x322   :  { %v2222_v1 = vpop.permute.xlu0 %2221  ;;  %3014 = vmatprep.mubr.f32.mxu1 %v2888_v10  ;;  %v2268_v46 = vld [vmem:[#allocation3 + $0x98] sm:$0xff]  ;;  %v2225_v7 = vsel %vm2146_vm12, %v7023_v21, %v2212_v52  ;;  %v2400_v21 = vrot.slane %v4342_v54, %v5535_v25  ;;  %v2705_v10 = vld [vmem:[%s7717_s1 + $0x9c0] sm:$0xff] }
 0x323   :  { %2247 = vst.msk [vmem:[#allocation3 + $0xd0] sm:$0x3] %vm2241_vm4, %v2222_v1  ;;  %v2269_v13 = vld [vmem:[#allocation3 + $0xa0] sm:$0xff]  ;;  %v2445_v45 = vcombine.low %v7067_v42, %v2268_v46  ;;  %v2446_v18 = vcombine.high %v7067_v42, %v2268_v46  ;;  %v2836_v30 = vcombine.high %v2818_v9, %v2832_v39  ;;  %v2835_v57 = vcombine.low %v2818_v9, %v2832_v39 }
 0x324   :  { %2240 = vst.msk [vmem:[#allocation3 + $0x30] sm:$0xff] %vm2239_vm7, %v2225_v7  ;;  %v7107_v29 = vrot.slane %v2269_v13, %v5535_v25  ;;  %v2447_v22 = vcombine.high %v2269_v13, %v2269_v13  ;;  %v4379_v39 = vmov 0.0   ;;  %vm3417_vm4 = vcmask 916480  }
 0x325   :  { %3015 = vmatmul.mubr.f32.gmra.mxu1 %v2880_v5  ;;  %v2454_v12 = vrot.slane %v2445_v45, %v5535_v25  ;;  %v2224_v23 = vpop.permute.xlu1 %2223  ;;  %3091 = vmatprep.mubr.f32.mxu0 %v2836_v30  ;;  %v7112_v20 = vrot.slane %v2446_v18, %v5535_v25 }
 0x326   :  { %v2036_v33 = vpop.permute.xlu0 %2035  ;;  %3168 = vmatprep.mubr.f32.mxu1 %v2799_v6  ;;  %v2228_v31 = vsel %vm2146_vm12, %v2222_v1, %v2224_v23  ;;  %3092 = vmatmul.mubr.f32.gmra.mxu0 %v2835_v57  ;;  %v7126_v3 = vrot.slane %v2447_v22, %v5535_v25 }
 0x327   :  { %v2040_v40 = vsel %vm1961_vm10, %v2034_v49, %v2036_v33  ;;  %v2477_v56 = vcombine.high %v2454_v12, %v7107_v29  ;;  %v4129_v43 = vcombine.low %v2400_v21, %v2454_v12  ;;  %2248 = vst.msk [vmem:[#allocation3 + $0xd8] sm:$0x3] %vm2243_vm3, %v2228_v31  ;;  %v2707_v49 = vld [vmem:[%s7717_s1 + $0x9d0] sm:$0xff] }
 0x328   :  { %2060 = vst.msk [vmem:[#allocation3 + $0xc0] sm:$0x3] %vm2055_vm1, %v2040_v40  ;;  %v2478_v17 = vcombine.low %v7112_v20, %v7126_v3 }
 0x329   :  { %2156 = vst.msk [vmem:[#allocation3 + $0xc0] sm:$0x3] %vm2148_vm6, %v7079_v19  ;;  %3169 = vmatmul.mubr.f32.vlgmr.msra.gmra.mxu1 %v2798_v11  ;;  %v4131_v36 = vcombine.low %v2477_v56, %v7112_v20  ;;  %v2847_v62 = vrot.slane %v4129_v43, %v5535_v25  ;;  %v2711_v19 = vld [vmem:[%s7717_s1 + $0x9f0] sm:$0xff]  ;;  %vm7744_vm6 = vcmask 1047559  }
 0x32a   :  { %v2216_v42 = vpop.permute.xlu0 %2215  ;;  %4138 = vmatpush1.msk.msra.mxu1 %vm2931_vm11, %v2715_v15  ;;  %v4344_v48 = vld [vmem:[#allocation3 + $0xc8] ss:$8 sps:$4 sm:$0x33]   ;;  %v4132_v9 = vcombine.high %v7107_v29, %v2478_v17  ;;  %vm7745_vm10 = vmmov %vm7744_vm6  ;;  %vm3477_vm11 = vcmask 257026  }
 0x32b   :  { %v2226_v38 = vsel %vm2146_vm12, %v7037_v28, %v2216_v42  ;;  %v2861_v37 = vrot.slane %v4131_v36, %v5535_v25  ;;  %3209 = vmatprep.subr.mxu1 %v2714_v34  ;;  %v2255_v53 = vld [vmem:[#allocation3 + $0x30] sm:$0xff]  ;;  %v2479_v28 = vcombine.high %v7112_v20, %v7126_v3  ;;  %v2504_v47 = vrot.slane %v4344_v48, %v5535_v25  ;;  %v4124_v20 = vld [vmem:[%s7718_s2 + $0x1] ss:$8 sm:$0x3]  ;;  %vm7746_vm12 = vmmov %vm7744_vm6 }
 0x32c   :  { %2244 = vst.msk [vmem:[#allocation3 + $0x68] sm:$0x3] %vm2243_vm3, %v2226_v38  ;;  %3210 = vmatpush1.msra.mxu1 %v2713_v58  ;;  %v2343_v32 = vcombine.high %v2255_v53, %v2255_v53  ;;  %v2364_v24 = vrot.slane %v2255_v53, %v5535_v25  ;;  %v2868_v45 = vrot.slane %v4132_v9, %v5535_v25  ;;  %v7742_v43 = vld [vmem:[#allocation8_spill] sm:$0xff]  ;;  %vm7747_vm5 = vmmov %vm7744_vm6  ;;  %vm7749_vm3 = vcmask 261120  }
 0x32d   :  { %v2870_v51 = vcombine.high %v2847_v62, %v2861_v37  ;;  %v2869_v44 = vcombine.low %v2847_v62, %v2861_v37  ;;  %3211 = vmatprep.subr.mxu1 %v2712_v50  ;;  %v4135_v16 = vcombine.low %v2479_v28, %v2504_v47  ;;  %v2723_v40 = vrot.slane %v4124_v20, %v5519_v2 }
 0x32e   :  { %3212 = vmatpush1.msra.mxu1 %v2711_v19  ;;  %v2371_v26 = vrot.slane %v2343_v32, %v5535_v25  ;;  %v4123_v52 = vld.sshfl [vmem:[#allocation3 + $0xd8] sm:$0x3 pattern:$0x76325410]  ;;  %v2783_v1 = vrot.slane %v2364_v24, %v5535_v25  ;;  %v7743_v34 = vsub.s32 1, %v7742_v43 }
 0x32f   :  { %3174 = vmatprep.mubr.f32.mxu1 %v2870_v51  ;;  %3213 = vmatprep.subr.mxu1 %v2710_v14  ;;  %v2898_v5 = vrot.slane %v4135_v16, %v5535_v25  ;;  %v2512_v13 = vcombine.low %v2504_v47, %v4123_v52 }
 0x330   :  { %3175 = vmatmul.mubr.f32.gmra.mxu1 %v2869_v44  ;;  %v4346_v60 = vld [vmem:[#allocation3 + $0xb8] ss:$8 sps:$4 sm:$0x33]   ;;  %v2797_v59 = vrot.slane %v2371_v26, %v5535_v25 }
 0x331   :  { %3214 = vmatpush1.msra.mxu1 %v2709_v8  ;;  %v2906_v63 = vcombine.high %v2898_v5, %v2898_v5  ;;  %v2495_v27 = vrot.slane %v4346_v60, %v5535_v25  ;;  %v4136_v57 = vcombine.high %v7126_v3, %v2512_v13  ;;  %v2727_v3 = vrot.slane %v4124_v20, %v7743_v34 }
 0x332   :  { %3215 = vmatprep.subr.mxu1 %v2708_v61  ;;  %v2800_v7 = vcombine.low %v2783_v1, %v2797_v59 }
 0x333   :  { %3216 = vmatpush1.msra.mxu1 %v2707_v49  ;;  %v4122_v4 = vld.sshfl [vmem:[#allocation3 + $0x68] sm:$0x3 pattern:$0x76325410]  ;;  %3180 = vmatprep.mubr.f32.mxu1 %v2906_v63  ;;  %v2496_v0 = vcombine.low %v7077_v41, %v2495_v27 }
 0x334   :  { %3217 = vmatprep.subr.mxu1 %v2706_v35  ;;  %v4130_v54 = vcombine.low %v4122_v4, %v7107_v29  ;;  %3181 = vmatmul.mubr.f32.gmra.mxu1 %v2898_v5 }
 0x335   :  { %3218 = vmatpush1.msra.mxu1 %v2705_v10  ;;  %3251 = vmatprep.mubr.f32.mxu1 %v4379_v39  ;;  %v4134_v46 = vcombine.high %v7072_v55, %v2496_v0  ;;  %v2905_v55 = vrot.slane %v4136_v57, %v5535_v25 }
 0x336   :  { %v2854_v6 = vrot.slane %v4130_v54, %v5535_v25  ;;  %3804 = vmatprep.subr.mxu1 %v4379_v39 }
 0x337   :  { %v2887_v41 = vrot.slane %v4134_v46, %v5535_v25 }
 0x338   :  { %4139 = vmatmul.mubr.msk.f32.vlgmr.msra.gmra.mxu1 %vm2239_vm7, %v2800_v7  ;;  %v2871_v30 = vcombine.low %v2854_v6, %v2868_v45 }
 0x339   :  { %v2889_v18 = vcombine.high %v2887_v41, %v2887_v41  ;;  %3257 = vmatprep.mubr.f32.mxu1 %v4379_v39 }
 0x33b   :  { %3097 = vmatprep.mubr.f32.mxu0 %v2889_v18 }
 0x33c   :  { %3098 = vmatmul.mubr.f32.gmra.mxu0 %v2887_v41  ;;  %4140 = vmatmul.mubr.msk.f32.gmra.mxu1 %vm2239_vm7, %v2871_v30 }
 0x33d   :  { %3263 = vmatprep.mubr.f32.mxu1 %v4379_v39 }
 0x340   :  { %4141 = vmatmul.mubr.msk.f32.gmra.mxu1 %vm2239_vm7, %v2905_v55 }
 0x34b   :  { %v3004_v29 = vpop.f32.mrf.mxu1 }
 0x34c   :  { %v3005_v58 = vadd.f32 %v3004_v29, %v2723_v40 }
 0x34d   :  { %v3006_v22 = vpop.f32.mrf.mxu1 }
 0x34e   :  { %v3007_v48 = vadd.f32 %v3006_v22, %v2727_v3 }
 0x3c9   :  { %v3087_v15 = vpop.f32.mrf.mxu0 }
 0x3ca   :  { %v3088_v38 = vadd.f32 %v3087_v15, %v3005_v58 }
 0x3cb   :  { %v3089_v42 = vpop.f32.mrf.mxu0 }
 0x3cc   :  { %v3090_v19 = vadd.f32 %v3089_v42, %v3007_v48 }
 0x3e1   :  { %v3010_v21 = vpop.f32.mrf.mxu1 }
 0x3e2   :  { %v3011_v14 = vadd.f32 %v3010_v21, %v2723_v40 }
 0x3e3   :  { %v3012_v12 = vpop.f32.mrf.mxu1 }
 0x3e4   :  { %v3013_v51 = vadd.f32 %v3012_v12, %v2727_v3 }
 0x3e5   :  { %v3016_v23 = vpop.f32.mrf.mxu1 }
 0x3e6   :  { %v3093_v62 = vpop.f32.mrf.mxu0  ;;  %v3017_v16 = vadd.f32 %v3016_v23, %v2723_v40 }
 0x3e7   :  { %v3018_v33 = vpop.f32.mrf.mxu1  ;;  %v3094_v44 = vadd.f32 %v3093_v62, %v3011_v14 }
 0x3e8   :  { %v3095_v47 = vpop.f32.mrf.mxu0  ;;  %v3019_v35 = vadd.f32 %v3018_v33, %v2727_v3 }
 0x3e9   :  { %v3170_v11 = vpop.f32.mrf.mxu1  ;;  %v3096_v26 = vadd.f32 %v3095_v47, %v3013_v51  ;;  %v3616_v51 = vld [vmem:[%s7717_s1 + $0xf00] sm:$0xff] }
 0x3ea   :  { %v3171_v53 = vadd.f32 %v3170_v11, %v3088_v38 }
 0x3eb   :  { %v3172_v31 = vpop.f32.mrf.mxu1 }
 0x3ec   :  { %v3173_v32 = vadd.f32 %v3172_v31, %v3090_v19 }
 0x3f0   :  { %v3176_v56 = vpop.f32.mrf.mxu1 }
 0x3f1   :  { %v3177_v5 = vadd.f32 %v3176_v56, %v3094_v44 }
 0x3f2   :  { %v3178_v36 = vpop.f32.mrf.mxu1 }
 0x3f3   :  { %v3179_v27 = vadd.f32 %v3178_v36, %v3096_v26  ;;  %v3553_v26 = vld [vmem:[%s7717_s1 + $0xb10] sm:$0xff] }
 0x3f4   :  { %v3182_v50 = vpop.f32.mrf.mxu1 }
 0x3f6   :  { %v3184_v37 = vpop.f32.mrf.mxu1 }
 0x3f8   :  { %v3253_v28 = vpop.f32.mrf.mxu1 }
 0x3f9   :  { %v3254_v2 = vadd.f32 %v3253_v28, %v3171_v53 }
 0x3fa   :  { %v3255_v8 = vpop.f32.mrf.mxu1 }
 0x3fb   :  { %v3256_v61 = vadd.f32 %v3255_v8, %v3173_v32  ;;  %v3270_v24 = vmax.f32 %v3254_v2, 0.0  ;;  %v3617_v2 = vld [vmem:[%s7717_s1 + $0xf10] sm:$0xff] }
 0x3fc   :  { %v3099_v49 = vpop.f32.mrf.mxu0  ;;  %v3259_v60 = vpop.f32.mrf.mxu1  ;;  %3805 = vmatpush1.msra.mxu1 %v3617_v2 }
 0x3fd   :  { %v3271_v17 = vmax.f32 %v3256_v61, 0.0  ;;  %v3100_v63 = vadd.f32 %v3099_v49, %v3017_v16  ;;  %v3260_v10 = vadd.f32 %v3259_v60, %v3177_v5  ;;  %3806 = vmatprep.subr.mxu1 %v4379_v39  ;;  %v3615_v16 = vld [vmem:[%s7717_s1 + $0xef0] sm:$0xff]  ;;  %v3568_v5 = vld [vmem:[%s7717_s1 + $0xc00] sm:$0xff] }
 0x3fe   :  { %v3101_v59 = vpop.f32.mrf.mxu0  ;;  %v3261_v4 = vpop.f32.mrf.mxu1  ;;  %v3569_v61 = vld [vmem:[%s7717_s1 + $0xc10] sm:$0xff]  ;;  %3807 = vmatpush1.msra.mxu1 %v3616_v51  ;;  %v3614_v49 = vld [vmem:[%s7717_s1 + $0xee0] sm:$0xff] }
 0x3ff   :  { %v3282_v0 = vcombine.low %v3270_v24, %v3271_v17  ;;  %v3102_v54 = vadd.f32 %v3101_v59, %v3019_v35  ;;  %v3262_v52 = vadd.f32 %v3261_v4, %v3179_v27  ;;  %v3183_v1 = vadd.f32 %v3182_v50, %v3100_v63  ;;  %3808 = vmatprep.subr.mxu1 %v4379_v39  ;;  %v3552_v35 = vld [vmem:[%s7717_s1 + $0xb00] sm:$0xff]  ;;  %v3551_v63 = vld [vmem:[%s7717_s1 + $0xaf0] sm:$0xff] }
 0x400   :  { %v3265_v9 = vpop.f32.mrf.mxu1  ;;  %v3272_v6 = vmax.f32 %v3260_v10, 0.0  ;;  %v3283_v18 = vcombine.high %v3270_v24, %v3271_v17  ;;  %4157 = vmatprep.subr.mxu0 %v3569_v61  ;;  %3809 = vmatpush1.msra.mxu1 %v3615_v16  ;;  %v3613_v24 = vld [vmem:[%s7717_s1 + $0xed0] sm:$0xff]  ;;  %v3612_v27 = vld [vmem:[%s7717_s1 + $0xec0] sm:$0xff] }
 0x401   :  { %v7198_v46 = vrot.slane %v3282_v0, %v5535_v25  ;;  %v3185_v7 = vadd.f32 %v3184_v37, %v3102_v54  ;;  %v3273_v13 = vmax.f32 %v3262_v52, 0.0  ;;  %v3266_v41 = vadd.f32 %v3265_v9, %v3183_v1  ;;  %4158 = vmatpush3.msra.mxu0 %v3553_v26  ;;  %3810 = vmatprep.subr.mxu1 %v4379_v39  ;;  %v3567_v17 = vld [vmem:[%s7717_s1 + $0xbf0] sm:$0xff]  ;;  %v3566_v10 = vld [vmem:[%s7717_s1 + $0xbe0] sm:$0xff] }
 0x402   :  { %v3267_v45 = vpop.f32.mrf.mxu1  ;;  %v3297_v23 = vrot.slane %v3283_v18, %v5535_v25  ;;  %4159 = vmatprep.subr.mxu0 %v3568_v5  ;;  %3811 = vmatpush1.msra.mxu1 %v3614_v49  ;;  %v3550_v59 = vld [vmem:[%s7717_s1 + $0xae0] sm:$0xff]  ;;  %v3611_v4 = vld [vmem:[%s7717_s1 + $0xeb0] sm:$0xff] }
 0x403   :  { %v3268_v30 = vadd.f32 %v3267_v45, %v3185_v7  ;;  %v3298_v57 = vcombine.high %v7198_v46, %v7198_v46  ;;  %v3301_v55 = vcombine.high %v3272_v6, %v3273_v13  ;;  %v3274_v29 = vmax.f32 %v3266_v41, 0.0  ;;  %3812 = vmatprep.subr.mxu1 %v4379_v39  ;;  %4160 = vmatpush3.msra.mxu0 %v3552_v35  ;;  %v3565_v0 = vld [vmem:[%s7717_s1 + $0xbd0] sm:$0xff]  ;;  %v3610_v52 = vld [vmem:[%s7717_s1 + $0xea0] sm:$0xff] }
 0x404   :  { %v3300_v33 = vcombine.low %v3272_v6, %v3273_v13  ;;  %v4144_v3 = vrot.slane %v3297_v23, 9  ;;  %v3299_v50 = vcombine.high %v3297_v23, %v3297_v23  ;;  %v4142_v8 = vrot.slane %v7198_v46, 9  ;;  %3813 = vmatpush1.msra.mxu1 %v3613_v24  ;;  %4161 = vmatprep.subr.mxu0 %v3567_v17  ;;  %v3549_v54 = vld [vmem:[%s7717_s1 + $0xad0] sm:$0xff]  ;;  %v3564_v1 = vld [vmem:[%s7717_s1 + $0xbc0] sm:$0xff] }
 0x405   :  { %v3275_v22 = vmax.f32 %v3268_v30, 0.0  ;;  %v4143_v21 = vrot.slane %v3298_v57, 9  ;;  %v3315_v12 = vrot.slane %v3301_v55, %v5535_v25  ;;  %3814 = vmatprep.subr.mxu1 %v4379_v39  ;;  %4162 = vmatpush3.msra.mxu0 %v3551_v63  ;;  %v3609_v9 = vld [vmem:[%s7717_s1 + $0xe90] sm:$0xff]  ;;  %v3606_v6 = vld [vmem:[%s7717_s1 + $0xe60] sm:$0xff] }
 0x406   :  { %v3308_v43 = vrot.slane %v3300_v33, %v5535_v25  ;;  %v7218_v48 = vmax.f32 %v3297_v23, %v4144_v3  ;;  %v4145_v19 = vrot.slane %v3299_v50, 9  ;;  %v7267_v60 = vmax.f32 %v7198_v46, %v4142_v8  ;;  %3815 = vmatpush1.msra.mxu1 %v3612_v27  ;;  %4163 = vmatprep.subr.mxu0 %v3566_v10  ;;  %v3608_v46 = vld [vmem:[%s7717_s1 + $0xe80] sm:$0xff]  ;;  %v3607_v7 = vld [vmem:[%s7717_s1 + $0xe70] sm:$0xff] }
 0x407   :  { %v3318_v11 = vcombine.low %v3274_v29, %v3275_v22  ;;  %v7204_v20 = vmax.f32 %v3298_v57, %v4143_v21  ;;  %v4148_v31 = vrot.slane %v3315_v12, 9  ;;  %v3317_v40 = vcombine.high %v3315_v12, %v3315_v12  ;;  %3816 = vmatprep.subr.mxu1 %v4379_v39  ;;  %4164 = vmatpush3.msra.mxu0 %v3550_v59  ;;  %v3605_v13 = vld [vmem:[%s7717_s1 + $0xe50] sm:$0xff]  ;;  %v3604_v41 = vld [vmem:[%s7717_s1 + $0xe40] sm:$0xff] }
 0x408   :  { %v3316_v62 = vcombine.high %v3308_v43, %v3308_v43  ;;  %v7228_v28 = vmax.f32 %v3299_v50, %v4145_v19  ;;  %v4146_v47 = vrot.slane %v3308_v43, 9  ;;  %3817 = vmatpush1.msra.mxu1 %v3611_v4  ;;  %4165 = vmatprep.subr.mxu0 %v3565_v0  ;;  %v3548_v22 = vld [vmem:[%s7717_s1 + $0xac0] sm:$0xff]  ;;  %v3563_v21 = vld [vmem:[%s7717_s1 + $0xbb0] sm:$0xff] }
 0x409   :  { %v3325_v15 = vrot.slane %v3318_v11, %v5535_v25  ;;  %3389 = vrot.lane.b32.xlu0 %v7204_v20, %s4380_s8  ;;  %v4149_v56 = vrot.slane %v3317_v40, 9  ;;  %v7210_v34 = vmax.f32 %v3315_v12, %v4148_v31  ;;  %3818 = vmatprep.subr.mxu1 %v4379_v39  ;;  %v3603_v12 = vld [vmem:[%s7717_s1 + $0xe30] sm:$0xff]  ;;  %v3626_v35 = vld [vmem:[%s7717_s1 + $0xfa0] sm:$0xff] }
 0x40a   :  { %v4147_v14 = vrot.slane %v3316_v62, 9  ;;  %v7242_v44 = vmax.f32 %v3308_v43, %v4146_v47  ;;  %4166 = vmatpush3.msra.mxu0 %v3549_v54  ;;  %3819 = vmatpush1.msra.mxu1 %v3610_v52  ;;  %v3602_v43 = vld [vmem:[%s7717_s1 + $0xe20] sm:$0xff]  ;;  %v3561_v50 = vld [vmem:[%s7717_s1 + $0xb90] sm:$0xff] }
 0x40b   :  { %v3326_v36 = vcombine.high %v3325_v15, %v3325_v15  ;;  %v7212_v58 = vmax.f32 %v3317_v40, %v4149_v56  ;;  %v4150_v42 = vrot.slane %v3325_v15, 9  ;;  %4167 = vmatprep.subr.mxu0 %v3564_v1  ;;  %3820 = vmatprep.subr.mxu1 %v4379_v39  ;;  %v3562_v56 = vld [vmem:[%s7717_s1 + $0xba0] sm:$0xff]  ;;  %v3545_v49 = vld [vmem:[%s7717_s1 + $0xa90] sm:$0xff] }
 0x40c   :  { %v7234_v32 = vmax.f32 %v3316_v62, %v4147_v14  ;;  %3821 = vmatpush1.msra.mxu1 %v3609_v9  ;;  %4168 = vmatpush3.msra.mxu0 %v3548_v22  ;;  %v3544_v63 = vld [vmem:[%s7717_s1 + $0xa80] sm:$0xff]  ;;  %v3559_v27 = vld [vmem:[%s7717_s1 + $0xb70] sm:$0xff] }
 0x40d   :  { %3399 = vrot.lane.b32.xlu0 %v7210_v34, %s4380_s8  ;;  %3401 = vrot.lane.b32.xlu1 %v7212_v58, %s4380_s8  ;;  %v4151_v38 = vrot.slane %v3326_v36, 9  ;;  %v7220_v37 = vmax.f32 %v3325_v15, %v4150_v42  ;;  %v3547_v15 = vld [vmem:[%s7717_s1 + $0xab0] sm:$0xff]  ;;  %v3546_v42 = vld [vmem:[%s7717_s1 + $0xaa0] sm:$0xff] }
 0x40e   :  { %3822 = vmatprep.subr.mxu1 %v4379_v39  ;;  %4169 = vmatprep.subr.mxu0 %v3563_v21  ;;  %v3625_v10 = vld [vmem:[%s7717_s1 + $0xf90] sm:$0xff] }
 0x40f   :  { %v7226_v53 = vmax.f32 %v3326_v36, %v4151_v38  ;;  %3823 = vmatpush1.msra.mxu1 %v3608_v46  ;;  %4170 = vmatpush3.msra.mxu0 %v3547_v15  ;;  %v3627_v38 = vld [vmem:[%s7717_s1 + $0xfb0] sm:$0xff] }
 0x410   :  { %3824 = vmatprep.subr.mxu1 %v4379_v39  ;;  %4171 = vmatprep.subr.mxu0 %v3562_v56  ;;  %v3623_v22 = vld [vmem:[%s7717_s1 + $0xf70] sm:$0xff]  ;;  %v3556_v56 = vld [vmem:[%s7717_s1 + $0xb40] sm:$0xff] }
 0x411   :  { %3391 = vrot.lane.b32.xlu0 %v7218_v48, %s4380_s8  ;;  %3403 = vrot.lane.b32.xlu1 %v7220_v37, %s4380_s8  ;;  %v3541_v21 = vld [vmem:[%s7717_s1 + $0xa50] sm:$0xff] }
 0x412   :  { %3825 = vmatpush1.msra.mxu1 %v3607_v7  ;;  %4172 = vmatpush3.msra.mxu0 %v3546_v42  ;;  %v3621_v42 = vld [vmem:[%s7717_s1 + $0xf50] sm:$0xff] }
 0x413   :  { %3826 = vmatprep.subr.mxu1 %v4379_v39  ;;  %4173 = vmatprep.subr.mxu0 %v3561_v50 }
 0x414   :  { %3827 = vmatpush1.msra.mxu1 %v3606_v6  ;;  %4174 = vmatpush3.msra.mxu0 %v3545_v49  ;;  %v3618_v49 = vld [vmem:[%s7717_s1 + $0xf20] sm:$0xff] }
 0x415   :  { %3405 = vrot.lane.b32.xlu0 %v7226_v53, %s4380_s8  ;;  %3393 = vrot.lane.b32.xlu1 %v7228_v28, %s4380_s8 }
 0x416   :  { %3828 = vmatprep.subr.mxu1 %v4379_v39 }
 0x417   :  { %3829 = vmatpush1.msra.mxu1 %v3605_v13 }
 0x418   :  { %3830 = vmatprep.subr.mxu1 %v4379_v39 }
 0x419   :  { %3397 = vrot.lane.b32.xlu0 %v7234_v32, %s4380_s8  ;;  %3395 = vrot.lane.b32.xlu1 %v7242_v44, %s4380_s8 }
 0x41a   :  { %3831 = vmatpush1.msra.mxu1 %v3604_v41 }
 0x41b   :  { %3832 = vmatprep.subr.mxu1 %v4379_v39 }
 0x41c   :  { %3833 = vmatpush1.msra.mxu1 %v3603_v12 }
 0x41d   :  { %3387 = vrot.lane.b32.xlu1 %v7267_v60, %s4380_s8  ;;  %3834 = vmatprep.subr.mxu1 %v4379_v39 }
 0x41e   :  { %3835 = vmatpush1.msra.mxu1 %v3602_v43  ;;  %v3622_v43 = vld [vmem:[%s7717_s1 + $0xf60] sm:$0xff] }
 0x41f   :  { %3848 = vmatprep.subr.mxu1 %v4379_v39 }
 0x420   :  { %3849 = vmatpush2.msra.mxu1 %v3627_v38 }
 0x421   :  { %3850 = vmatprep.subr.mxu1 %v4379_v39 }
 0x422   :  { %3851 = vmatpush2.msra.mxu1 %v3626_v35 }
 0x423   :  { %3852 = vmatprep.subr.mxu1 %v4379_v39 }
 0x424   :  { %3853 = vmatpush2.msra.mxu1 %v3625_v10 }
 0x425   :  { %3854 = vmatprep.subr.mxu1 %v4379_v39 }
 0x47b   :  { %v3390_v45 = vpop.permute.xlu0 %3389 }
 0x47c   :  { %v3408_v18 = vrot.slane %v3390_v45, 2 }
 0x47e   :  { %v3419_v23 = vsel %vm3417_vm4, %v3390_v45, %v3408_v18  ;;  %v3543_v45 = vld [vmem:[%s7717_s1 + $0xa70] sm:$0xff]  ;;  %v3558_v18 = vld [vmem:[%s7717_s1 + $0xb60] sm:$0xff] }
 0x47f   :  { %v3400_v30 = vpop.permute.xlu0 %3399  ;;  %v3402_v57 = vpop.permute.xlu1 %3401  ;;  %v3439_v62 = vmax.f32 %v7204_v20, %v3419_v23 }
 0x480   :  { %v3413_v55 = vrot.slane %v3400_v30, 2  ;;  %v3414_v29 = vrot.slane %v3402_v57, 2 }
 0x482   :  { %v3424_v33 = vsel %vm3417_vm4, %v3400_v30, %v3413_v55  ;;  %v3425_v11 = vsel %vm3417_vm4, %v3402_v57, %v3414_v29  ;;  %v3557_v57 = vld [vmem:[%s7717_s1 + $0xb50] sm:$0xff] }
 0x483   :  { %v3444_v31 = vmax.f32 %v7210_v34, %v3424_v33  ;;  %v3392_v40 = vpop.permute.xlu0 %3391  ;;  %v3445_v3 = vmax.f32 %v7212_v58, %v3425_v11  ;;  %v3404_v36 = vpop.permute.xlu1 %3403 }
 0x484   :  { %v3409_v34 = vrot.slane %v3392_v40, 2  ;;  %v3415_v58 = vrot.slane %v3404_v36, 2 }
 0x485   :  { %v3465_v19 = vrot.slane %v3444_v31, 7  ;;  %v3484_v47 = vrot.slane %v3445_v3, 7 }
 0x486   :  { %v3420_v14 = vsel %vm3417_vm4, %v3392_v40, %v3409_v34  ;;  %v3426_v2 = vsel %vm3417_vm4, %v3404_v36, %v3415_v58  ;;  %v3555_v34 = vld [vmem:[%s7717_s1 + $0xb30] sm:$0xff] }
 0x487   :  { %v3440_v51 = vmax.f32 %v7218_v48, %v3420_v14  ;;  %v3406_v8 = vpop.permute.xlu0 %3405  ;;  %v3466_v16 = vsel %vm1824_vm14, %v3465_v19, %v3439_v62  ;;  %v3446_v20 = vmax.f32 %v7220_v37, %v3426_v2  ;;  %v3394_v61 = vpop.permute.xlu1 %3393  ;;  %v3560_v48 = vld [vmem:[%s7717_s1 + $0xb80] sm:$0xff]  ;;  %v3539_v62 = vld [vmem:[%s7717_s1 + $0xa30] sm:$0xff] }
 0x488   :  { %v3416_v26 = vrot.slane %v3406_v8, 2  ;;  %v3467_v5 = vsel %vm1828_vm0, %v3465_v19, %v3466_v16  ;;  %v3410_v17 = vrot.slane %v3394_v61, 2  ;;  %4175 = vmatprep.subr.mxu0 %v3560_v48  ;;  %v3601_v16 = vld [vmem:[%s7717_s1 + $0xe10] sm:$0xff] }
 0x489   :  { %v3485_v24 = vsel %vm1824_vm14, %v3484_v47, %v3440_v51  ;;  %v3468_v37 = vsel %vm1832_vm2, %v3465_v19, %v3467_v5  ;;  %v3502_v54 = vrot.slane %v3446_v20, 7  ;;  %4176 = vmatpush3.msra.mxu0 %v3544_v63  ;;  %v3620_v51 = vld [vmem:[%s7717_s1 + $0xf40] sm:$0xff] }
 0x48a   :  { %v3427_v59 = vsel %vm3417_vm4, %v3406_v8, %v3416_v26  ;;  %v3469_v4 = vsel %vm7744_vm6, %v3465_v19, %v3468_v37  ;;  %v3486_v0 = vsel %vm1828_vm0, %v3484_v47, %v3485_v24  ;;  %v3421_v52 = vsel %vm3417_vm4, %v3394_v61, %v3410_v17  ;;  %4177 = vmatprep.subr.mxu0 %v3559_v27  ;;  %v3619_v61 = vld [vmem:[%s7717_s1 + $0xf30] sm:$0xff] }
 0x48b   :  { %3470 = vrot.lane.b32.xlu0 %v3469_v4, %s4381_s0  ;;  %v3398_v1 = vpop.permute.xlu0 %3397  ;;  %v3487_v9 = vsel %vm1832_vm2, %v3484_v47, %v3486_v0  ;;  %v3441_v46 = vmax.f32 %v7228_v28, %v3421_v52  ;;  %v3447_v7 = vmax.f32 %v7226_v53, %v3427_v59  ;;  %v3396_v6 = vpop.permute.xlu1 %3395  ;;  %4178 = vmatpush3.msra.mxu0 %v3543_v45  ;;  %v3624_v53 = vld [vmem:[%s7717_s1 + $0xf80] sm:$0xff]  ;;  %vm3514_vm6 = vcmask 519170  }
 0x48c   :  { %v3412_v13 = vrot.slane %v3398_v1, 2  ;;  %v3488_v41 = vsel %vm7745_vm10, %v3484_v47, %v3487_v9  ;;  %v3411_v30 = vrot.slane %v3396_v6, 2  ;;  %v3542_v28 = vld [vmem:[%s7717_s1 + $0xa60] sm:$0xff]  ;;  %4179 = vmatprep.subr.mxu0 %v3558_v18  ;;  %3855 = vmatpush2.msra.mxu1 %v3624_v53  ;;  %vm3510_vm10 = vcmask 392192   ;;  %v3583_v53 = vld [vmem:[%s7717_s1 + $0xcf0] sm:$0xff] }
 0x48d   :  { %3489 = vrot.lane.b32.xlu1 %v3488_v41, %s4370_s18  ;;  %v3503_v55 = vsel %vm1824_vm14, %v3502_v54, %v3441_v46  ;;  %4180 = vmatpush3.msra.mxu0 %v3542_v28  ;;  %v3521_v33 = vrot.slane %v3447_v7, 7  ;;  %v3554_v47 = vld [vmem:[%s7717_s1 + $0xb20] sm:$0xff] }
 0x48e   :  { %v3423_v29 = vsel %vm3417_vm4, %v3398_v1, %v3412_v13  ;;  %v3422_v12 = vsel %vm3417_vm4, %v3396_v6, %v3411_v30  ;;  %v3504_v23 = vsel %vm1828_vm0, %v3502_v54, %v3503_v55  ;;  %3856 = vmatprep.subr.mxu1 %v4379_v39  ;;  %4181 = vmatprep.subr.mxu0 %v3557_v57  ;;  %v3585_v6 = vld [vmem:[%s7717_s1 + $0xd10] sm:$0xff]  ;;  %v3600_v41 = vld [vmem:[%s7717_s1 + $0xe00] sm:$0xff] }
 0x48f   :  { %v3442_v11 = vmax.f32 %v7242_v44, %v3422_v12  ;;  %v3443_v31 = vmax.f32 %v7234_v32, %v3423_v29  ;;  %v3388_v40 = vpop.permute.xlu1 %3387  ;;  %v3505_v15 = vsel %vm1832_vm2, %v3502_v54, %v3504_v23  ;;  %3857 = vmatpush2.msra.mxu1 %v3623_v22  ;;  %4182 = vmatpush3.msra.mxu0 %v3541_v21  ;;  %v3540_v32 = vld [vmem:[%s7717_s1 + $0xa40] sm:$0xff]  ;;  %v3599_v30 = vld [vmem:[%s7717_s1 + $0xdf0] sm:$0xff] }
 0x490   :  { %v3407_v3 = vrot.slane %v3388_v40, 2  ;;  %v3506_v36 = vsel %vm7746_vm12, %v3502_v54, %v3505_v15  ;;  %3858 = vmatprep.subr.mxu1 %v4379_v39  ;;  %4183 = vmatprep.subr.mxu0 %v3556_v56  ;;  %v3598_v28 = vld [vmem:[%s7717_s1 + $0xde0] sm:$0xff]  ;;  %v3597_v55 = vld [vmem:[%s7717_s1 + $0xdd0] sm:$0xff] }
 0x491   :  { %v3522_v44 = vsel %vm1824_vm14, %v3521_v33, %v3442_v11  ;;  %3507 = vrot.lane.b32.xlu0 %v3506_v36, %s4382_s4  ;;  %3859 = vmatpush2.msra.mxu1 %v3622_v43  ;;  %v3452_v19 = vrot.slane %v3443_v31, 7  ;;  %v3582_v57 = vld [vmem:[%s7717_s1 + $0xce0] sm:$0xff]  ;;  %v3581_v29 = vld [vmem:[%s7717_s1 + $0xcd0] sm:$0xff] }
 0x492   :  { %v3418_v50 = vsel %vm3417_vm4, %v3388_v40, %v3407_v3  ;;  %v3523_v38 = vsel %vm1828_vm0, %v3521_v33, %v3522_v44  ;;  %4184 = vmatpush3.msra.mxu0 %v3540_v32  ;;  %3860 = vmatprep.subr.mxu1 %v4379_v39  ;;  %vm3513_vm4 = vcmask 1041792   ;;  %v3596_v22 = vld [vmem:[%s7717_s1 + $0xdc0] sm:$0xff]  ;;  %v3595_v12 = vld [vmem:[%s7717_s1 + $0xdb0] sm:$0xff] }
 0x493   :  { %v3438_v58 = vmax.f32 %v7267_v60, %v3418_v50  ;;  %v3524_v14 = vsel %vm1832_vm2, %v3521_v33, %v3523_v38  ;;  %4185 = vmatprep.subr.mxu0 %v3555_v34  ;;  %3861 = vmatpush2.msra.mxu1 %v3621_v42  ;;  %v3538_v60 = vld [vmem:[%s7717_s1 + $0xa20] sm:$0xff]  ;;  %vm3515_vm12 = vmor %vm3514_vm6, %vm3513_vm4  ;;  %v3579_v23 = vld [vmem:[%s7717_s1 + $0xcb0] sm:$0xff] }
 0x494   :  { %v3525_v2 = vsel %vm7747_vm5, %v3521_v33, %v3524_v14  ;;  %4186 = vmatpush3.msra.mxu0 %v3539_v62  ;;  %3862 = vmatprep.subr.mxu1 %v4379_v39  ;;  %v3580_v21 = vld [vmem:[%s7717_s1 + $0xcc0] sm:$0xff]  ;;  %v3593_v31 = vld [vmem:[%s7717_s1 + $0xd90] sm:$0xff] }
 0x495   :  { %v3453_v8 = vsel %vm1824_vm14, %v3452_v19, %v3438_v58  ;;  %3526 = vrot.lane.b32.xlu1 %v3525_v2, %s4371_s21  ;;  %4187 = vmatprep.subr.mxu0 %v3554_v47  ;;  %vm7748_vm14 = vmmov %vm7747_vm5  ;;  %vm3533_vm5 = vcmask 650242   ;;  %v3594_v33 = vld [vmem:[%s7717_s1 + $0xda0] sm:$0xff]  ;;  %v3577_v40 = vld [vmem:[%s7717_s1 + $0xc90] sm:$0xff] }
 0x496   :  { %v3454_v20 = vsel %vm1828_vm0, %v3452_v19, %v3453_v8  ;;  %3863 = vmatpush2.msra.mxu1 %v3620_v51  ;;  %4188 = vmatpush3.msra.mxu0 %v3538_v60  ;;  %vm3476_vm0 = vcmask 1041536   ;;  %v3578_v11 = vld [vmem:[%s7717_s1 + $0xca0] sm:$0xff]  ;;  %v3591_v43 = vld [vmem:[%s7717_s1 + $0xd70] sm:$0xff] }
 0x497   :  { %v3455_v26 = vsel %vm1832_vm2, %v3452_v19, %v3454_v20  ;;  %3864 = vmatprep.subr.mxu1 %v4379_v39  ;;  %4192 = vmatprep.subr.mxu0 %v3601_v16  ;;  %vm3494_vm2 = vcmask 1041664   ;;  %vm3478_vm1 = vmor %vm3477_vm11, %vm3476_vm0  ;;  %vm3661_vm0 = vcmask 654336   ;;  %v3592_v15 = vld [vmem:[%s7717_s1 + $0xd80] sm:$0xff]  ;;  %v3575_v3 = vld [vmem:[%s7717_s1 + $0xc70] sm:$0xff]  ;;  %vm4383_vm11 = vmmov 0  }
 0x498   :  { %v3456_v5 = vsel %vm7748_vm14, %v3452_v19, %v3455_v26  ;;  %3865 = vmatpush2.msra.mxu1 %v3619_v61  ;;  %vm3496_vm7 = vmor %vm3495_vm13, %vm3494_vm2  ;;  %v3576_v56 = vld [vmem:[%s7717_s1 + $0xc80] sm:$0xff]  ;;  %v3589_v44 = vld [vmem:[%s7717_s1 + $0xd50] sm:$0xff]  ;;  %vm7750_vm2 = vcmask 1043456   ;;  %vm3978_vm13 = vcmask 687104  }
 0x499   :  { %3460 = vst.msk [vmem:[#allocation4] sm:$0xf] %vm3459_vm9, %v3456_v5  ;;  %3866 = vmatprep.subr.mxu1 %v4379_v39  ;;  %vm3529_vm9 = vcmask 523264   ;;  %vm3534_vm14 = vmor %vm3533_vm5, %vm3532_vm15  ;;  %v3590_v36 = vld [vmem:[%s7717_s1 + $0xd60] sm:$0xff]  ;;  %v3573_v34 = vld [vmem:[%s7717_s1 + $0xc50] sm:$0xff] }
 0x49a   :  { %3867 = vmatpush2.msra.mxu1 %v3618_v49  ;;  %v3574_v32 = vld [vmem:[%s7717_s1 + $0xc60] sm:$0xff]  ;;  %v3587_v38 = vld [vmem:[%s7717_s1 + $0xd30] sm:$0xff] }
 0x49b   :  { %v3588_v42 = vld [vmem:[%s7717_s1 + $0xd40] sm:$0xff]  ;;  %v3571_v62 = vld [vmem:[%s7717_s1 + $0xc30] sm:$0xff] }
 0x49c   :  { %v3572_v50 = vld [vmem:[%s7717_s1 + $0xc40] sm:$0xff]  ;;  %v3888_v47 = vld [vmem:[%s7717_s1 + $0x1090] sm:$0xff] }
 0x49d   :  { %v3586_v19 = vld [vmem:[%s7717_s1 + $0xd20] sm:$0xff]  ;;  %v3886_v51 = vld [vmem:[%s7717_s1 + $0x1070] sm:$0xff] }
 0x49e   :  { %v3570_v58 = vld [vmem:[%s7717_s1 + $0xc20] sm:$0xff]  ;;  %v3884_v8 = vld [vmem:[%s7717_s1 + $0x1050] sm:$0xff] }
 0x49f   :  { %v3889_v14 = vld [vmem:[%s7717_s1 + $0x10a0] sm:$0xff]  ;;  %v3882_v20 = vld [vmem:[%s7717_s1 + $0x1030] sm:$0xff] }
 0x4a0   :  { %v3887_v2 = vld [vmem:[%s7717_s1 + $0x1080] sm:$0xff]  ;;  %v3880_v26 = vld [vmem:[%s7717_s1 + $0x1010] sm:$0xff] }
 0x4a1   :  { %v3885_v60 = vld [vmem:[%s7717_s1 + $0x1060] sm:$0xff]  ;;  %v3878_v49 = vld [vmem:[%s7717_s1 + $0xff0] sm:$0xff] }
 0x4a2   :  { %v3883_v16 = vld [vmem:[%s7717_s1 + $0x1040] sm:$0xff] }
 0x4a3   :  { %v3881_v61 = vld [vmem:[%s7717_s1 + $0x1020] sm:$0xff] }
 0x4a4   :  { %v3879_v5 = vld [vmem:[%s7717_s1 + $0x1000] sm:$0xff] }
 0x4fd   :  { %v3471_v48 = vpop.permute.xlu0 %3470 }
 0x4fe   :  { %v3472_v35 = vrot.slane %v3471_v48, 6 }
 0x4ff   :  { %v3490_v24 = vpop.permute.xlu1 %3489 }
 0x500   :  { %v3474_v17 = vsel %vm3473_vm8, %v3472_v35, %v3471_v48  ;;  %v3491_v37 = vrot.slane %v3490_v24, 6  ;;  %v3877_v48 = vld [vmem:[%s7717_s1 + $0xfe0] sm:$0xff]  ;;  %v3876_v35 = vld [vmem:[%s7717_s1 + $0xfd0] sm:$0xff]  ;;  %vm3891_vm8 = vcmask 982016  }
 0x501   :  { %3479 = vst.msk [vmem:[#allocation4 + $0x2] sm:$0xf] %vm3478_vm1, %v3474_v17  ;;  %vm4055_vm1 = vcmask 74752  }
 0x502   :  { %v3492_v63 = vsel %vm7749_vm3, %v3491_v37, %v3490_v24  ;;  %v3875_v24 = vld [vmem:[%s7717_s1 + $0xfc0] sm:$0xff] }
 0x503   :  { %3497 = vst.msk [vmem:[#allocation4 + $0x4] sm:$0xf] %vm3496_vm7, %v3492_v63  ;;  %v3508_v27 = vpop.permute.xlu0 %3507 }
 0x504   :  { %v3509_v10 = vrot.slane %v3508_v27, 6 }
 0x506   :  { %v3511_v59 = vsel %vm3510_vm10, %v3509_v10, %v3508_v27 }
 0x507   :  { %3516 = vst.msk [vmem:[#allocation4 + $0x6] sm:$0xf] %vm3515_vm12, %v3511_v59  ;;  %v3527_v4 = vpop.permute.xlu1 %3526  ;;  %v3628_v59 = vld [vmem:[%s7718_s2 + $0x2] ss:$0 sm:$0xff] }
 0x508   :  { %v3528_v0 = vrot.slane %v3527_v4, 6 }
 0x50a   :  { %v3530_v54 = vsel %vm3529_vm9, %v3528_v0, %v3527_v4 }
 0x50b   :  { %3535 = vst.msk [vmem:[#allocation4 + $0x8] sm:$0xf] %vm3534_vm14, %v3530_v54 }
 0x50e   :  { %v3536_v52 = vld [vmem:[#allocation4] sm:$0xff] }
 0x50f   :  { %v3638_v1 = vrot.slane %v3536_v52, %v5535_v25  ;;  %v3631_v9 = vcombine.high %v3536_v52, %v3536_v52 }
 0x511   :  { %v3646_v46 = vcombine.high %v3638_v1, %v3638_v1  ;;  %v7497_v7 = vrot.slane %v3631_v9, %v5535_v25  ;;  %v3584_v25 = vld [vmem:[%s7717_s1 + $0xd00] sm:$0xff] }
 0x512   :  { %v4152_v13 = vld.sshfl [vmem:[#allocation4 + $0x8] sm:$0x33 pattern:$0x76325410] }
 0x513   :  { %3728 = vmatprep.mubr.f32.mxu0 %v3646_v46  ;;  %v3647_v45 = vcombine.high %v7497_v7, %v7497_v7  ;;  %v3655_v18 = vcombine.high %v4152_v13, %v4152_v13 }
 0x514   :  { %3729 = vmatmul.mubr.f32.vlgmr.msra.gmra.mxu0 %v3638_v1 }
 0x515   :  { %4193 = vmatpush3.msra.mxu0 %v3585_v6  ;;  %3798 = vmatprep.mubr.f32.mxu0 %v3647_v45  ;;  %v3975_v6 = vld [vmem:[%s7717_s1 + $0x1150] sm:$0xff]  ;;  %v3972_v45 = vld [vmem:[%s7717_s1 + $0x1120] sm:$0xff] }
 0x516   :  { %4194 = vmatprep.subr.mxu0 %v3600_v41  ;;  %4153 = vmatprep.mubr.msk.f32.mxu1 %vm3661_vm0, %v3655_v18  ;;  %v3973_v41 = vld [vmem:[%s7717_s1 + $0x1130] sm:$0xff] }
 0x517   :  { %4195 = vmatpush3.msra.mxu0 %v3584_v25  ;;  %3869 = vmatmul.mubr.f32.vlgmr.msra.gmra.mxu1 %v4152_v13  ;;  %v3974_v13 = vld [vmem:[%s7717_s1 + $0x1140] sm:$0xff]  ;;  %v3971_v18 = vld [vmem:[%s7717_s1 + $0x1110] sm:$0xff] }
 0x518   :  { %4196 = vmatprep.subr.mxu0 %v3599_v30  ;;  %v3970_v25 = vld [vmem:[%s7717_s1 + $0x1100] sm:$0xff]  ;;  %v3969_v30 = vld [vmem:[%s7717_s1 + $0x10f0] sm:$0xff] }
 0x519   :  { %4197 = vmatpush3.msra.mxu0 %v3583_v53  ;;  %v3968_v53 = vld [vmem:[%s7717_s1 + $0x10e0] sm:$0xff] }
 0x51a   :  { %4198 = vmatprep.subr.mxu0 %v3598_v28  ;;  %v3967_v28 = vld [vmem:[%s7717_s1 + $0x10d0] sm:$0xff] }
 0x51b   :  { %4199 = vmatpush3.msra.mxu0 %v3582_v57  ;;  %v3966_v57 = vld [vmem:[%s7717_s1 + $0x10c0] sm:$0xff] }
 0x51c   :  { %4200 = vmatprep.subr.mxu0 %v3597_v55  ;;  %v3890_v55 = vld [vmem:[%s7718_s2 + $0x3] ss:$0 sm:$0xff] }
 0x51d   :  { %4201 = vmatpush3.msra.mxu0 %v3581_v29 }
 0x51e   :  { %4202 = vmatprep.subr.mxu0 %v3596_v22 }
 0x51f   :  { %4203 = vmatpush3.msra.mxu0 %v3580_v21 }
 0x520   :  { %4204 = vmatprep.subr.mxu0 %v3595_v12 }
 0x521   :  { %4205 = vmatpush3.msra.mxu0 %v3579_v23  ;;  %v3977_v23 = vld [vmem:[%s7718_s2 + $0x4] ss:$0 sm:$0xff] }
 0x522   :  { %4206 = vmatprep.subr.mxu0 %v3594_v33 }
 0x523   :  { %4207 = vmatpush3.msra.mxu0 %v3578_v11 }
 0x524   :  { %4208 = vmatprep.subr.mxu0 %v3593_v31 }
 0x525   :  { %4209 = vmatpush3.msra.mxu0 %v3577_v40 }
 0x526   :  { %4210 = vmatprep.subr.mxu0 %v3592_v15 }
 0x527   :  { %4211 = vmatpush3.msra.mxu0 %v3576_v56 }
 0x528   :  { %4212 = vmatprep.subr.mxu0 %v3591_v43 }
 0x529   :  { %4213 = vmatpush3.msra.mxu0 %v3575_v3 }
 0x52a   :  { %4214 = vmatprep.subr.mxu0 %v3590_v36 }
 0x52b   :  { %4215 = vmatpush3.msra.mxu0 %v3574_v32 }
 0x52c   :  { %4216 = vmatprep.subr.mxu0 %v3589_v44 }
 0x52d   :  { %4217 = vmatpush3.msra.mxu0 %v3573_v34 }
 0x52e   :  { %4218 = vmatprep.subr.mxu0 %v3588_v42 }
 0x52f   :  { %4219 = vmatpush3.msra.mxu0 %v3572_v50 }
 0x530   :  { %4220 = vmatprep.subr.mxu0 %v3587_v38 }
 0x531   :  { %4221 = vmatpush3.msra.mxu0 %v3571_v62 }
 0x532   :  { %4222 = vmatprep.subr.mxu0 %v3586_v19 }
 0x533   :  { %4223 = vmatpush3.msra.mxu0 %v3570_v58 }
 0x534   :  { %3799 = vmatmul.mubr.f32.vlgmr.msra.gmra.mxu0 %v7497_v7  ;;  %4255 = vmatprep.subr.mxu0 %v4379_v39  ;;  %v3976_v7 = vld [vmem:[%s7717_s1 + $0x1160] sm:$0xf]  ;;  %s4063_s1 = sshll.u32 %s4384_s24, 4  ;;  %s4064_s1 = int_to_ptr.vmem [resolvable:$true] %s4063_s1 }
 0x535   :  { %4256 = vmatpush3.msra.mxu0 %v3889_v14  ;;  %4285 = vmatprep.mubr.msk.f32.mxu0 %vm4383_vm11, %v4379_v39  ;;  %s4348_s4 = scalar_lea.vmem %s4064_s1, 32  ;;  %p4353_p1 = scmp.lt.s32.totalorder %s4064_s1, %s4064_s1 }
 0x536   :  { %4257 = vmatprep.subr.mxu0 %v4379_v39  ;;  %p4349_p0 = scmp.ne.s32.totalorder %s4064_s1, %s4348_s4  ;;  %p4354_p2 = scmp.lt.s32.totalorder %s4348_s4, %s4348_s4 }
 0x537   :  { %4258 = vmatpush3.msra.mxu0 %v3888_v47 }
 0x538   :  { %4259 = vmatprep.subr.mxu0 %v4379_v39  ;;  %p4355_p3 = por %p4354_p2, %p4353_p1 }
 0x539   :  { %4260 = vmatpush3.msra.mxu0 %v3887_v2 }
 0x53a   :  { %4261 = vmatprep.subr.mxu0 %v4379_v39  ;;  %p4356_p4 = pnand %p4355_p3, %p4349_p0 }
 0x53b   :  { %4262 = vmatpush3.msra.mxu0 %v3886_v51 }
 0x53c   :  { %4263 = vmatprep.subr.mxu0 %v4379_v39 }
 0x53d   :  { %4264 = vmatpush3.msra.mxu0 %v3885_v60 }
 0x53e   :  { %4265 = vmatprep.subr.mxu0 %v4379_v39 }
 0x53f   :  { %4266 = vmatpush3.msra.mxu0 %v3884_v8 }
 0x540   :  { %4267 = vmatprep.subr.mxu0 %v4379_v39 }
 0x541   :  { %4268 = vmatpush3.msra.mxu0 %v3883_v16 }
 0x542   :  { %4269 = vmatprep.subr.mxu0 %v4379_v39 }
 0x543   :  { %4270 = vmatpush3.msra.mxu0 %v3882_v20 }
 0x544   :  { %4271 = vmatprep.subr.mxu0 %v4379_v39 }
 0x545   :  { %4272 = vmatpush3.msra.mxu0 %v3881_v61 }
 0x546   :  { %4273 = vmatprep.subr.mxu0 %v4379_v39 }
 0x547   :  { %4274 = vmatpush3.msra.mxu0 %v3880_v26 }
 0x548   :  { %4275 = vmatprep.subr.mxu0 %v4379_v39 }
 0x549   :  { %4276 = vmatpush3.msra.mxu0 %v3879_v5 }
 0x54a   :  { %4277 = vmatprep.subr.mxu0 %v4379_v39 }
 0x54b   :  { %4278 = vmatpush3.msra.mxu0 %v3878_v49 }
 0x54c   :  { %4279 = vmatprep.subr.mxu0 %v4379_v39 }
 0x54d   :  { %4280 = vmatpush3.msra.mxu0 %v3877_v48 }
 0x54e   :  { %4281 = vmatprep.subr.mxu0 %v4379_v39 }
 0x54f   :  { %4282 = vmatpush3.msra.mxu0 %v3876_v35 }
 0x550   :  { %4283 = vmatprep.subr.mxu0 %v4379_v39 }
 0x551   :  { %4284 = vmatpush3.msra.mxu0 %v3875_v24 }
 0x552   :  { %4288 = vmatprep.subr.mxu0 %v4379_v39 }
 0x5d4   :  { %v4189_v63 = vpop.f32.mrf.mxu0 }
 0x5d6   :  { %v4190_v27 = vpop.f32.mrf.mxu0 }
 0x5d7   :  { %v3870_v17 = vpop.f32.mrf.mxu1  ;;  %v4191_v10 = vadd.f32 %v4190_v27, %v4189_v63 }
 0x5d9   :  { %v3872_v37 = vpop.f32.mrf.mxu1  ;;  %v3731_v54 = vadd.f32 %v4191_v10, %v3628_v59 }
 0x5f4   :  { %v4224_v4 = vpop.f32.mrf.mxu0 }
 0x5f6   :  { %v4225_v0 = vpop.f32.mrf.mxu0 }
 0x5f7   :  { %v4226_v52 = vadd.f32 %v4225_v0, %v4224_v4 }
 0x5f9   :  { %v3801_v1 = vadd.f32 %v4226_v52, %v3731_v54 }
 0x5fb   :  { %v3871_v9 = vadd.f32 %v3870_v17, %v3801_v1 }
 0x5fd   :  { %v3874_v46 = vmax.f32 %v3871_v9, 0.0 }
 0x5ff   :  { %4286 = vmatmul.mubr.msk.f32.vlgmr.msra.gmra.mxu0 %vm3891_vm8, %v3874_v46 }
 0x600   :  { %4289 = vmatpush3.msk.msra.mxu0 %vm7750_vm2, %v3976_v7  ;;  %4310 = vmatprep.mubr.msk.f32.mxu0 %vm4383_vm11, %v4379_v39 }
 0x601   :  { %4290 = vmatprep.subr.mxu0 %v4379_v39 }
 0x602   :  { %4291 = vmatpush3.msra.mxu0 %v3975_v6 }
 0x603   :  { %4292 = vmatprep.subr.mxu0 %v4379_v39 }
 0x604   :  { %4293 = vmatpush3.msra.mxu0 %v3974_v13 }
 0x605   :  { %4294 = vmatprep.subr.mxu0 %v4379_v39 }
 0x606   :  { %4295 = vmatpush3.msra.mxu0 %v3973_v41 }
 0x607   :  { %4296 = vmatprep.subr.mxu0 %v4379_v39 }
 0x608   :  { %4297 = vmatpush3.msra.mxu0 %v3972_v45 }
 0x609   :  { %4298 = vmatprep.subr.mxu0 %v4379_v39 }
 0x60a   :  { %4299 = vmatpush3.msra.mxu0 %v3971_v18 }
 0x60b   :  { %4300 = vmatprep.subr.mxu0 %v4379_v39 }
 0x60c   :  { %4301 = vmatpush3.msra.mxu0 %v3970_v25 }
 0x60d   :  { %4302 = vmatprep.subr.mxu0 %v4379_v39 }
 0x60e   :  { %4303 = vmatpush3.msra.mxu0 %v3969_v30 }
 0x60f   :  { %4304 = vmatprep.subr.mxu0 %v4379_v39 }
 0x610   :  { %4305 = vmatpush3.msra.mxu0 %v3968_v53 }
 0x611   :  { %4306 = vmatprep.subr.mxu0 %v4379_v39 }
 0x612   :  { %4307 = vmatpush3.msra.mxu0 %v3967_v28 }
 0x613   :  { %4308 = vmatprep.subr.mxu0 %v4379_v39 }
 0x614   :  { %4309 = vmatpush3.msra.mxu0 %v3966_v57 }
 0x6bf   :  { %v3961_v29 = vpop.f32.mrf.mxu0 }
 0x6c0   :  { %v3962_v22 = vadd.f32 %v3961_v29, %v3890_v55 }
 0x6c1   :  { %v4287_v21 = vpop.f32.mrf.mxu0 }
 0x6c2   :  { %v3965_v12 = vmax.f32 %v3962_v22, 0.0 }
 0x6c4   :  { %4311 = vmatmul.mubr.msk.f32.vlgmr.msra.gmra.mxu0 %vm3978_vm13, %v3965_v12 }
 0x784   :  { %v4051_v33 = vpop.f32.mrf.mxu0 }
 0x785   :  { %v4052_v39 = vadd.f32 %v4051_v33, %v3977_v23 }
 0x786   :  { %v4312_v11 = vpop.f32.mrf.mxu0 }
 0x787   :  { %4056 = vst.msk [vmem:[#allocation5] sm:$0x3] %vm4055_vm1, %v4052_v39 }
 0x788   :  { %4359 = shalt.err (!%p4356_p4)
}
 0x789   :  { %4066 = dma.vmem_to_hbm [thread:$0]  %s4064_s1, 32, %s7719_s3, [#allocation6]  }
 0x78a   :  { %4368 = dma.done.wait [#allocation6], 32  }
 0x78b   :  { %4369 = vsyncadd [#allocation6], 4294967264 }
 0x78c   :  { %4070 = vsyncpa [#allocation6], 1 }

</bundles_post_ra>
